<compile_context>
chip_gen: v5e
topology: v5e:2x2
jax: 0.10.0
libtpu: 0.0.40
codegen_flags: <defaults>
</compile_context>

<pallas_src>
import functools
import math

import jax
import jax.numpy as jnp
import numpy as np
from jax.experimental import pallas as pl
from jax.experimental.pallas import tpu as pltpu

_BN_EPS = 1e-5


@functools.lru_cache(maxsize=None)
def _vmem_limit():
    """Generation-aware scoped-VMEM limit (~3/4 of physical)."""
    try:
        cap = int(pltpu.get_tpu_info().vmem_capacity_bytes)
    except Exception:  # query unavailable -> conservative default
        cap = 64 * 1024 * 1024
    return max(32 * 1024 * 1024, (cap * 3) // 4)


def _choose_bt(n, h):
    """Images per grid step: Bt | N, Bt*H %8==0 (or Bt==N), Bt*H <= 512."""
    cands = [bt for bt in range(1, n + 1)
             if n % bt == 0 and (bt == n or (bt * h) % 8 == 0)]
    small = [bt for bt in cands if bt * h <= 512]
    return max(small) if small else min(cands)


# ----------------------------------------------------------------------------
# Pallas kernels
# ----------------------------------------------------------------------------
def _conv_layer_kernel(x_ref, s_ref, t_ref, w_ref, sel_ref, out_ref, stats_ref,
                       *, H, in_act):
    """Fused CNN layer for one batch tile (grid axis = batch tiles).

    x_ref    : (Bt*H, W*Cin)       pre-BN producer activation (f32, lane-dense)
    s_ref/t  : (1, W*Cin)          producer BN scale/shift tiled along lanes
    w_ref    : (3, W*Cin, W*Cout)  block-Toeplitz conv weight slabs (bf16)
    sel_ref  : (W*Cout, Cpad)      lane-padded 0/1 channel-selection matrix (f32)
    out_ref  : (Bt*H, W*Cout)      pre-BN output of THIS layer (f32)
    stats_ref: (2, Cpad)           per-tile [sum; sum of squares] per channel
    """
    # previous layer's BatchNorm + activation (f32 math; v5e-safe)
    x = x_ref[...] * s_ref[...] + t_ref[...]
    if in_act == "relu":
        x = jnp.maximum(x, 0.0)
    xb = x.astype(jnp.bfloat16)                       # single bf16 cast, reused 3x

    # 3x3 'same' conv: width halo lives in the Toeplitz slabs; height halo is
    # realised by shifting the kh=0 / kh=2 partial outputs by one row and
    # masking the per-image boundary rows (conv bias dropped - it cancels
    # exactly under train-mode BN).
    y0 = jnp.dot(xb, w_ref[0], preferred_element_type=jnp.float32)
    y1 = jnp.dot(xb, w_ref[1], preferred_element_type=jnp.float32)
    y2 = jnp.dot(xb, w_ref[2], preferred_element_type=jnp.float32)

    m, wcout = y1.shape
    zrow = jnp.zeros((1, wcout), jnp.float32)
    y0s = jnp.concatenate([zrow, y0[:-1, :]], axis=0)   # row m gets x[m-1] @ w0
    y2s = jnp.concatenate([y2[1:, :], zrow], axis=0)    # row m gets x[m+1] @ w2
    r = jax.lax.broadcasted_iota(jnp.int32, (m, 1), 0) % H
    acc = y1
    acc = acc + jnp.where(r != 0, y0s, 0.0)             # no tap above image top
    acc = acc + jnp.where(r != H - 1, y2s, 0.0)         # no tap below image bottom
    out_ref[...] = acc

    # per-tile per-channel statistics for THIS layer's BN: one f32 matmul,
    # lane-dense (2, Cpad) output tile.
    moments = jnp.concatenate([jnp.sum(acc, axis=0, keepdims=True),
                               jnp.sum(acc * acc, axis=0, keepdims=True)], axis=0)
    stats_ref[...] = jnp.dot(moments, sel_ref[...],
                             preferred_element_type=jnp.float32)


def _linear_bottleneck_kernel(x_ref, s_ref, t_ref, w1_ref, b1_ref, w2_ref, b2_ref, o_ref):
    """Fused: downsampler final BN (scale/shift) -> Linear -> Linear (whole batch)."""
    x = x_ref[...] * s_ref[...] + t_ref[...]                       # final down-BN, act='none'
    h = jnp.dot(x.astype(jnp.bfloat16), w1_ref[...],
                preferred_element_type=jnp.float32) + b1_ref[...]
    y = jnp.dot(h.astype(jnp.bfloat16), w2_ref[...],
                preferred_element_type=jnp.float32) + b2_ref[...]
    o_ref[...] = y


def _bn_act_apply_kernel(x_ref, s_ref, t_ref, o_ref, *, act):
    """Final BatchNorm(scale/shift) + output activation, whole batch in one step."""
    y = x_ref[...] * s_ref[...] + t_ref[...]
    if act == "relu":
        y = jnp.maximum(y, 0.0)
    elif act == "sigmoid":
        # numerically-stable sigmoid (never overflows exp)
        e = jnp.exp(-jnp.abs(y))
        p = 1.0 / (1.0 + e)
        y = jnp.where(y >= 0.0, p, e * p)
    o_ref[...] = y


# ----------------------------------------------------------------------------
# Pallas wrappers
# ----------------------------------------------------------------------------
def _conv_layer(x, s_row, t_row, pack, H, W, Cin, Cout, in_act):
    """x: (N, H, W*Cin) f32 -> (out (N, H, W*Cout) f32, stats (nb, 2, Cpad))."""
    n = x.shape[0]
    bt = _choose_bt(n, H)
    nb = n // bt
    m = bt * H
    wcin, wcout = W * Cin, W * Cout
    cpad = pack["sel"].shape[1]
    x2 = x.reshape(n * H, wcin)                       # free reshape (leading dims)

    kern = functools.partial(_conv_layer_kernel, H=H, in_act=in_act)
    out, stats = pl.pallas_call(
        kern,
        out_shape=(jax.ShapeDtypeStruct((n * H, wcout), jnp.float32),
                   jax.ShapeDtypeStruct((nb, 2, cpad), jnp.float32)),
        grid=(nb,),
        in_specs=[
            pl.BlockSpec((m, wcin), lambda i: (i, 0)),
            pl.BlockSpec((1, wcin), lambda i: (0, 0)),
            pl.BlockSpec((1, wcin), lambda i: (0, 0)),
            # constant operands: single-buffered (critical for v7x's 64 MiB VMEM)
            pl.BlockSpec((3, wcin, wcout), lambda i: (0, 0, 0),
                         pipeline_mode=pl.Buffered(1)),
            pl.BlockSpec((wcout, cpad), lambda i: (0, 0),
                         pipeline_mode=pl.Buffered(1)),
        ],
        out_specs=(
            pl.BlockSpec((m, wcout), lambda i: (i, 0)),
            pl.BlockSpec((None, 2, cpad), lambda i: (i, 0, 0)),
        ),
        compiler_params=pltpu.CompilerParams(
            dimension_semantics=("parallel",),        # megacore-shard batch tiles
            vmem_limit_bytes=_vmem_limit()),
    )(x2, s_row, t_row, pack["toeplitz"], pack["sel"])
    return out.reshape(n, H, wcout), stats


def _linear_bottleneck(flat, s_flat, t_flat, w1, b1, w2, b2):
    n, d1 = flat.shape
    cd = w1.shape[1]
    d2 = w2.shape[1]
    return pl.pallas_call(
        _linear_bottleneck_kernel,
        out_shape=jax.ShapeDtypeStruct((n, d2), jnp.float32),
        grid=(1,),
        in_specs=[
            pl.BlockSpec((n, d1), lambda i: (0, 0)),
            pl.BlockSpec((1, d1), lambda i: (0, 0)),
            pl.BlockSpec((1, d1), lambda i: (0, 0)),
            pl.BlockSpec((d1, cd), lambda i: (0, 0)),
            pl.BlockSpec((1, cd), lambda i: (0, 0)),
            pl.BlockSpec((cd, d2), lambda i: (0, 0)),
            pl.BlockSpec((1, d2), lambda i: (0, 0)),
        ],
        out_specs=pl.BlockSpec((n, d2), lambda i: (0, 0)),
        compiler_params=pltpu.CompilerParams(
            dimension_semantics=("arbitrary",),
            vmem_limit_bytes=_vmem_limit()),
    )(flat, s_flat, t_flat, w1, b1, w2, b2)


def _bn_act_apply(x, s_row, t_row, act):
    """x: (N, H, W*C) -> same shape; whole batch in ONE grid step (latency-bound)."""
    n, h, wc = x.shape
    x2 = x.reshape(n * h, wc)
    kern = functools.partial(_bn_act_apply_kernel, act=act)
    out = pl.pallas_call(
        kern,
        out_shape=jax.ShapeDtypeStruct((n * h, wc), jnp.float32),
        grid=(1,),
        in_specs=[
            pl.BlockSpec((n * h, wc), lambda i: (0, 0)),
            pl.BlockSpec((1, wc), lambda i: (0, 0)),
            pl.BlockSpec((1, wc), lambda i: (0, 0)),
        ],
        out_specs=pl.BlockSpec((n * h, wc), lambda i: (0, 0)),
        compiler_params=pltpu.CompilerParams(
            dimension_semantics=("arbitrary",),
            vmem_limit_bytes=_vmem_limit()),
    )(x2, s_row, t_row)
    return out.reshape(n, h, wc)


# ----------------------------------------------------------------------------
# JAX glue: resize + CNN driver
# ----------------------------------------------------------------------------
def _resize_nearest(x, c, out_hw):
    """Nearest-neighbour resize on a (N, H, W*C) lane-dense activation."""
    n, h, wc = x.shape
    w = wc // c
    ho, wo = out_hw
    if (h, w) == (ho, wo):
        return x
    hi = (jnp.arange(ho) * h) // ho
    wi = (jnp.arange(wo) * w) // wo
    x4 = x.reshape(n, h, w, c)
    return x4[:, hi][:, :, wi].reshape(n, ho, wo * c)


def _run_cnn(x, layer_packs, channels, imdims):
    """Runs all conv layers of one ReLU_CNN.

    Returns the LAST layer's pre-BN output plus its per-channel (scale, shift);
    the caller fuses that final BN (+ output activation) into the consumer.
    """
    n = x.shape[0]
    scale_c = jnp.ones((channels[0],), jnp.float32)
    shift_c = jnp.zeros((channels[0],), jnp.float32)
    in_act = "none"
    nconv = len(channels) - 1
    for i in range(nconv):
        cin, cout = channels[i], channels[i + 1]
        ho, wo = imdims[i + 1]
        x = _resize_nearest(x, cin, (ho, wo))
        # TODO(synk): lane expansion of (C,)->(1,W*C) scale/shift could move
        # into the kernel (SMEM) to shorten the glue critical path further.
        s_row = jnp.tile(scale_c, wo).reshape(1, wo * cin)
        t_row = jnp.tile(shift_c, wo).reshape(1, wo * cin)
        x, stats = _conv_layer(x, s_row, t_row, layer_packs[i], ho, wo, cin, cout, in_act)
        # finalize this layer's train-mode BN (biased variance) from in-kernel partials
        ssum = jnp.sum(stats[:, 0, :cout], axis=0)
        ssq = jnp.sum(stats[:, 1, :cout], axis=0)
        cnt = float(n * ho * wo)
        mean = ssum / cnt
        var = jnp.maximum(ssq / cnt - mean * mean, 0.0)
        scale_c = layer_packs[i]["gamma"] * jax.lax.rsqrt(var + _BN_EPS)
        shift_c = layer_packs[i]["beta"] - mean * scale_c
        in_act = "relu"   # hidden-layer activation, fused into the consumer kernel
    return x, scale_c, shift_c


# ----------------------------------------------------------------------------
# ImageSampler: config / params / packing / forward
# ----------------------------------------------------------------------------
def make_image_sampler_config(input_im_size, output_im_size,
                              downsampler_layers, upsampler_layers,
                              downsampler_channels, upsampler_channels):
    d_scale = (input_im_size / 8) ** (-1 / (downsampler_layers - 1))
    u_scale = (output_im_size / 8) ** (1 / (upsampler_layers - 1))
    d_dims = ([input_im_size]
              + [math.ceil(input_im_size * d_scale ** k) for k in range(1, downsampler_layers - 1)]
              + [8])
    u_dims = ([8]
              + [math.ceil(8 * u_scale ** k) for k in range(1, upsampler_layers - 1)]
              + [output_im_size])
    return dict(
        downsampler_imdims=[(x, x) for x in d_dims],
        upsampler_imdims=[(x, x) for x in u_dims],
        downsampler_channels=list(downsampler_channels),
        upsampler_channels=list(upsampler_channels),
    )


def _init_cnn(key, channels):
    # conv bias omitted: it cancels exactly under the following train-mode BN
    ws, gammas, betas = [], [], []
    for i in range(len(channels) - 1):
        key, k1 = jax.random.split(key)
        fan_in = 9 * channels[i]
        ws.append(jax.random.normal(k1, (3, 3, channels[i], channels[i + 1]),
                                    jnp.float32) / math.sqrt(fan_in))
        gammas.append(jnp.ones((channels[i + 1],), jnp.float32))
        betas.append(jnp.zeros((channels[i + 1],), jnp.float32))
    return {"w": ws, "gamma": gammas, "beta": betas}, key


def init_image_sampler_params(key, cfg):
    down, key = _init_cnn(key, cfg["downsampler_channels"])
    up, key = _init_cnn(key, cfg["upsampler_channels"])
    d_feat = 8 * 8 * cfg["downsampler_channels"][-1]
    d_out = cfg["downsampler_channels"][-1]
    u_in = cfg["upsampler_channels"][0]
    u_feat = 8 * 8 * cfg["upsampler_channels"][0]
    key, k1, k2, k3, k4 = jax.random.split(key, 5)
    return {
        "down": down,
        "up": up,
        # Linear weights stored (in_features, out_features): y = x @ W + b
        "downlinproj_w": jax.random.normal(k1, (d_feat, d_out), jnp.float32) / math.sqrt(d_feat),
        "downlinproj_b": 0.01 * jax.random.normal(k2, (d_out,), jnp.float32),
        "uplinproj_w": jax.random.normal(k3, (u_in, u_feat), jnp.float32) / math.sqrt(u_in),
        "uplinproj_b": 0.01 * jax.random.normal(k4, (u_feat,), jnp.float32),
    }


def _build_toeplitz_slabs(w_np, wo):
    """(3,3,Cin,Cout) conv kernel -> (3, wo*Cin, wo*Cout) block-Toeplitz slabs.

    out[h, o*Cout+co] = sum_kh  x_row(h+kh-1) @ slab[kh]     (width halo folded in)
    TODO(synk): needs a width-tiled path once wo*C grows large (O(W^2*C) memory).
    """
    _, _, cin, cout = w_np.shape
    big = np.zeros((3, wo * cin, wo * cout), np.float32)
    for kh in range(3):
        for kw in range(3):
            blk = w_np[kh, kw]                            # (cin, cout)
            for o in range(wo):
                i = o + kw - 1
                if 0 <= i < wo:
                    big[kh, i * cin:(i + 1) * cin, o * cout:(o + 1) * cout] = blk
    return big


def _build_sel(wo, cout):
    """Lane-padded 0/1 selection matrix (wo*cout, Cpad>=128) for the stats matmul."""
    cpad = max(128, ((cout + 127) // 128) * 128)
    sel = np.zeros((wo * cout, cpad), np.float32)
    for o in range(wo):
        for c in range(cout):
            sel[o * cout + c, c] = 1.0
    return sel


def _pack_cnn(raw, channels, imdims):
    packs = []
    for i in range(len(channels) - 1):
        cout = channels[i + 1]
        _, wo = imdims[i + 1]
        w_np = np.asarray(raw["w"][i], np.float32)
        packs.append(dict(
            toeplitz=jnp.asarray(_build_toeplitz_slabs(w_np, wo), jnp.bfloat16),
            sel=jnp.asarray(_build_sel(wo, cout)),
            gamma=raw["gamma"][i].astype(jnp.float32),
            beta=raw["beta"][i].astype(jnp.float32),
        ))
    return packs


def pack_image_sampler_params(cfg, params):
    """One-time (host-side) repack of the weights into kernel-ready layouts."""
    return dict(
        down=_pack_cnn(params["down"], cfg["downsampler_channels"], cfg["downsampler_imdims"]),
        up=_pack_cnn(params["up"], cfg["upsampler_channels"], cfg["upsampler_imdims"]),
        downlinproj_w=params["downlinproj_w"].astype(jnp.bfloat16),
        downlinproj_b=params["downlinproj_b"].reshape(1, -1).astype(jnp.float32),
        uplinproj_w=params["uplinproj_w"].astype(jnp.bfloat16),
        uplinproj_b=params["uplinproj_b"].reshape(1, -1).astype(jnp.float32),
    )


def image_sampler_forward(cfg, packed, input_image_nchw):
    """input_image_nchw: (N, C_in, H, W) like the PyTorch module."""
    x_nchw = input_image_nchw.astype(jnp.float32)
    n, c0, h0, w0 = x_nchw.shape
    # NCHW -> lane-dense (N, H, W*C)
    x = jnp.transpose(x_nchw, (0, 2, 3, 1)).reshape(n, h0, w0 * c0)

    d_ch, d_dims = cfg["downsampler_channels"], cfg["downsampler_imdims"]
    u_ch, u_dims = cfg["upsampler_channels"], cfg["upsampler_imdims"]

    # ---- downsampler (ReLU_CNN, output='none'); its final BN is fused into
    #      the linear-bottleneck kernel below.
    down_pre, d_scale, d_shift = _run_cnn(x, packed["down"], d_ch, d_dims)
    cd = d_ch[-1]
    hd, wd = d_dims[-1]
    # flatten(start_dim=1) in NCHW element order, exactly as in PyTorch
    flat = jnp.transpose(down_pre.reshape(n, hd, wd, cd), (0, 3, 1, 2)).reshape(n, hd * wd * cd)
    s_flat = jnp.repeat(d_scale, hd * wd).reshape(1, -1)
    t_flat = jnp.repeat(d_shift, hd * wd).reshape(1, -1)

    # ---- fused BN(none) -> downlinproj -> uplinproj
    up_flat = _linear_bottleneck(flat, s_flat, t_flat,
                                 packed["downlinproj_w"], packed["downlinproj_b"],
                                 packed["uplinproj_w"], packed["uplinproj_b"])
    cu0 = u_ch[0]
    up_in = jnp.transpose(up_flat.reshape(n, cu0, 8, 8), (0, 2, 3, 1)).reshape(n, 8, 8 * cu0)

    # ---- upsampler (ReLU_CNN, output='sigmoid'); final BN + stable sigmoid
    #      applied in one whole-batch kernel.
    up_pre, u_scale, u_shift = _run_cnn(up_in, packed["up"], u_ch, u_dims)
    cu = u_ch[-1]
    hu, wu = u_dims[-1]
    s_row = jnp.tile(u_scale, wu).reshape(1, wu * cu)
    t_row = jnp.tile(u_shift, wu).reshape(1, wu * cu)
    out = _bn_act_apply(up_pre, s_row, t_row, "sigmoid")

    return jnp.transpose(out.reshape(n, hu, wu, cu), (0, 3, 1, 2))   # -> NCHW


# ----------------------------------------------------------------------------
if __name__ == "__main__":
    # Small, self-consistent configuration:
    #   input 16x16 RGB -> downsample to 8x8 -> bottleneck -> upsample to 16x16 RGB
    INPUT_IM, OUTPUT_IM = 16, 16
    D_LAYERS, U_LAYERS = 3, 3
    D_CHANNELS = [3, 8, 8]   # channels[0] = input image channels
    U_CHANNELS = [8, 8, 3]   # channels[-1] = output image channels

    cfg = make_image_sampler_config(INPUT_IM, OUTPUT_IM, D_LAYERS, U_LAYERS,
                                    D_CHANNELS, U_CHANNELS)

    root = jax.random.PRNGKey(0)
    key_params, key_input = jax.random.split(root)
    params = init_image_sampler_params(key_params, cfg)
    packed = pack_image_sampler_params(cfg, params)

    x = jax.random.uniform(key_input, (2, 3, INPUT_IM, INPUT_IM), jnp.float32)

    fwd = jax.jit(functools.partial(image_sampler_forward, cfg))
    out = fwd(packed, x)
    out = jax.block_until_ready(out)

    assert out.shape == (2, 3, OUTPUT_IM, OUTPUT_IM), out.shape
    assert out.dtype == jnp.float32
    assert bool(jnp.all(jnp.isfinite(out)))
    # sigmoid output must lie in (0, 1)
    assert bool(jnp.all(out > 0.0)) and bool(jnp.all(out < 1.0))
    print("KERNEL_OK")
</pallas_src>

<mosaic_0001>
module attributes {stable_mosaic.version = 11 : i64} {
  func.func @_conv_layer_kernel(%arg0: i32, %arg1: memref<24x36xf32, #tpu.memory_space<vmem>>, %arg2: memref<1x36xf32, #tpu.memory_space<vmem>>, %arg3: memref<1x36xf32, #tpu.memory_space<vmem>>, %arg4: memref<3x36x96xbf16, #tpu.memory_space<vmem>>, %arg5: memref<96x128xf32, #tpu.memory_space<vmem>>, %arg6: memref<24x96xf32, #tpu.memory_space<vmem>>, %arg7: memref<1x2x128xf32, #tpu.memory_space<vmem>>) attributes {dimension_semantics = [#tpu.dimension_semantics<parallel>], iteration_bounds = array<i64: 1>, scalar_prefetch = 0 : i64, scratch_operands = 0 : i64, tpu.core_type = #tpu.core_type<tc>, window_params = [{transform_indices = @transform_0, window_bounds = array<i64: 24, 36>}, {pipeline_mode = #tpu.pipeline_mode<synchronous>, transform_indices = @transform_1, window_bounds = array<i64: 1, 36>}, {pipeline_mode = #tpu.pipeline_mode<synchronous>, transform_indices = @transform_2, window_bounds = array<i64: 1, 36>}, {pipeline_mode = #tpu.pipeline_mode<synchronous>, transform_indices = @transform_3, window_bounds = array<i64: 3, 36, 96>}, {pipeline_mode = #tpu.pipeline_mode<synchronous>, transform_indices = @transform_4, window_bounds = array<i64: 96, 128>}, {transform_indices = @transform_5, window_bounds = array<i64: 24, 96>}, {transform_indices = @transform_6, window_bounds = array<i64: 1, 2, 128>}]} {
    %c0 = arith.constant 0 : index
    %c0_0 = arith.constant 0 : index
    %0 = vector.load %arg1[%c0, %c0_0] : memref<24x36xf32, #tpu.memory_space<vmem>>, vector<24x36xf32>
    %c0_1 = arith.constant 0 : index
    %c0_2 = arith.constant 0 : index
    %1 = vector.load %arg2[%c0_1, %c0_2] : memref<1x36xf32, #tpu.memory_space<vmem>>, vector<1x36xf32>
    %2 = vector.broadcast %1 : vector<1x36xf32> to vector<24x36xf32>
    %3 = arith.mulf %0, %2 : vector<24x36xf32>
    %c0_3 = arith.constant 0 : index
    %c0_4 = arith.constant 0 : index
    %4 = vector.load %arg3[%c0_3, %c0_4] : memref<1x36xf32, #tpu.memory_space<vmem>>, vector<1x36xf32>
    %5 = vector.broadcast %4 : vector<1x36xf32> to vector<24x36xf32>
    %6 = arith.addf %3, %5 : vector<24x36xf32>
    %7 = arith.truncf %6 : vector<24x36xf32> to vector<24x36xbf16>
    %c0_5 = arith.constant 0 : index
    %c0_6 = arith.constant 0 : index
    %c0_7 = arith.constant 0 : index
    %8 = vector.load %arg4[%c0_5, %c0_6, %c0_7] : memref<3x36x96xbf16, #tpu.memory_space<vmem>>, vector<1x36x96xbf16>
    %9 = vector.shape_cast %8 : vector<1x36x96xbf16> to vector<36x96xbf16>
    %cst = arith.constant dense<0.000000e+00> : vector<24x96xf32>
    %10 = tpu.matmul %7, %9, %cst {dimension_numbers = #tpu.dot_dimension_numbers<[1], [0], [0], [1], [0, 0, 1, 1], [], []>} : vector<24x36xbf16>, vector<36x96xbf16>, vector<24x96xf32> -> vector<24x96xf32>
    %c1 = arith.constant 1 : index
    %c0_8 = arith.constant 0 : index
    %c0_9 = arith.constant 0 : index
    %11 = vector.load %arg4[%c1, %c0_8, %c0_9] : memref<3x36x96xbf16, #tpu.memory_space<vmem>>, vector<1x36x96xbf16>
    %12 = vector.shape_cast %11 : vector<1x36x96xbf16> to vector<36x96xbf16>
    %cst_10 = arith.constant dense<0.000000e+00> : vector<24x96xf32>
    %13 = tpu.matmul %7, %12, %cst_10 {dimension_numbers = #tpu.dot_dimension_numbers<[1], [0], [0], [1], [0, 0, 1, 1], [], []>} : vector<24x36xbf16>, vector<36x96xbf16>, vector<24x96xf32> -> vector<24x96xf32>
    %c2 = arith.constant 2 : index
    %c0_11 = arith.constant 0 : index
    %c0_12 = arith.constant 0 : index
    %14 = vector.load %arg4[%c2, %c0_11, %c0_12] : memref<3x36x96xbf16, #tpu.memory_space<vmem>>, vector<1x36x96xbf16>
    %15 = vector.shape_cast %14 : vector<1x36x96xbf16> to vector<36x96xbf16>
    %cst_13 = arith.constant dense<0.000000e+00> : vector<24x96xf32>
    %16 = tpu.matmul %7, %15, %cst_13 {dimension_numbers = #tpu.dot_dimension_numbers<[1], [0], [0], [1], [0, 0, 1, 1], [], []>} : vector<24x36xbf16>, vector<36x96xbf16>, vector<24x96xf32> -> vector<24x96xf32>
    %cst_14 = arith.constant 0.000000e+00 : f32
    %17 = vector.broadcast %cst_14 : f32 to vector<1x96xf32>
    %18 = vector.extract_strided_slice %10 {offsets = [0, 0], sizes = [23, 96], strides = [1, 1]} : vector<24x96xf32> to vector<23x96xf32>
    %19 = tpu.concatenate %17, %18 in 0 : vector<1x96xf32>, vector<23x96xf32> -> vector<24x96xf32>
    %20 = vector.extract_strided_slice %16 {offsets = [1, 0], sizes = [23, 96], strides = [1, 1]} : vector<24x96xf32> to vector<23x96xf32>
    %21 = tpu.concatenate %20, %17 in 0 : vector<23x96xf32>, vector<1x96xf32> -> vector<24x96xf32>
    %22 = tpu.iota {dimensions = array<i32: 0>} : vector<24x1xi32>
    %c12_i32 = arith.constant 12 : i32
    %c0_i32 = arith.constant 0 : i32
    %23 = arith.cmpi eq, %c12_i32, %c0_i32 : i32
    %c1_i32 = arith.constant 1 : i32
    %24 = arith.select %23, %c1_i32, %c12_i32 : i32
    %25 = vector.broadcast %24 : i32 to vector<24x1xi32>
    %26 = arith.remsi %22, %25 : vector<24x1xi32>
    %c0_i32_15 = arith.constant 0 : i32
    %27 = vector.broadcast %c0_i32_15 : i32 to vector<24x1xi32>
    %28 = arith.cmpi ne, %26, %27 : vector<24x1xi32>
    %c0_i32_16 = arith.constant 0 : i32
    %29 = vector.broadcast %c0_i32_16 : i32 to vector<24x1xi32>
    %30 = arith.cmpi slt, %26, %29 : vector<24x1xi32>
    %c0_i32_17 = arith.constant 0 : i32
    %31 = arith.cmpi slt, %24, %c0_i32_17 : i32
    %32 = vector.broadcast %31 : i1 to vector<24x1xi1>
    %33 = vector.broadcast %32 : vector<24x1xi1> to vector<24x1xi1>
    %34 = arith.xori %30, %33 : vector<24x1xi1>
    %35 = arith.andi %34, %28 : vector<24x1xi1>
    %36 = vector.broadcast %24 : i32 to vector<24x1xi32>
    %37 = arith.addi %26, %36 : vector<24x1xi32>
    %38 = arith.select %35, %37, %26 : vector<24x1xi1>, vector<24x1xi32>
    %c0_i32_18 = arith.constant 0 : i32
    %39 = vector.broadcast %c0_i32_18 : i32 to vector<24x1xi32>
    %40 = arith.cmpi ne, %38, %39 : vector<24x1xi32>
    %cst_19 = arith.constant 0.000000e+00 : f32
    %41 = vector.shape_cast %40 : vector<24x1xi1> to vector<24x1xi1>
    %42 = vector.broadcast %41 : vector<24x1xi1> to vector<24x96xi1>
    %43 = vector.broadcast %cst_19 : f32 to vector<24x96xf32>
    %44 = arith.select %42, %19, %43 : vector<24x96xi1>, vector<24x96xf32>
    %45 = arith.addf %13, %44 : vector<24x96xf32>
    %c11_i32 = arith.constant 11 : i32
    %46 = vector.broadcast %c11_i32 : i32 to vector<24x1xi32>
    %47 = arith.cmpi ne, %38, %46 : vector<24x1xi32>
    %cst_20 = arith.constant 0.000000e+00 : f32
    %48 = vector.shape_cast %47 : vector<24x1xi1> to vector<24x1xi1>
    %49 = vector.broadcast %48 : vector<24x1xi1> to vector<24x96xi1>
    %50 = vector.broadcast %cst_20 : f32 to vector<24x96xf32>
    %51 = arith.select %49, %21, %50 : vector<24x96xi1>, vector<24x96xf32>
    %52 = arith.addf %45, %51 : vector<24x96xf32>
    %c0_21 = arith.constant 0 : index
    %c0_22 = arith.constant 0 : index
    %53 = vector.load %arg6[%c0_21, %c0_22] : memref<24x96xf32, #tpu.memory_space<vmem>>, vector<24x96xf32>
    tpu.vector_store %arg6[%c0_21, %c0_22], %52 {strides = array<i32>} : memref<24x96xf32, #tpu.memory_space<vmem>>, vector<24x96xf32>,
    %cst_23 = arith.constant dense<0.000000e+00> : vector<96xf32>
    %54 = vector.multi_reduction <add>, %52, %cst_23 [0] : vector<24x96xf32> to vector<96xf32>
    %55 = vector.shape_cast %54 : vector<96xf32> to vector<1x96xf32>
    %56 = arith.mulf %52, %52 : vector<24x96xf32>
    %cst_24 = arith.constant dense<0.000000e+00> : vector<96xf32>
    %57 = vector.multi_reduction <add>, %56, %cst_24 [0] : vector<24x96xf32> to vector<96xf32>
    %58 = vector.shape_cast %57 : vector<96xf32> to vector<1x96xf32>
    %59 = tpu.concatenate %55, %58 in 0 : vector<1x96xf32>, vector<1x96xf32> -> vector<2x96xf32>
    %c0_25 = arith.constant 0 : index
    %c0_26 = arith.constant 0 : index
    %60 = vector.load %arg5[%c0_25, %c0_26] : memref<96x128xf32, #tpu.memory_space<vmem>>, vector<96x128xf32>
    %cst_27 = arith.constant dense<0.000000e+00> : vector<2x128xf32>
    %61 = tpu.matmul %59, %60, %cst_27 {dimension_numbers = #tpu.dot_dimension_numbers<[1], [0], [0], [1], [0, 0, 1, 1], [], []>} : vector<2x96xf32>, vector<96x128xf32>, vector<2x128xf32> -> vector<2x128xf32>
    %c0_28 = arith.constant 0 : index
    %c0_29 = arith.constant 0 : index
    %c0_30 = arith.constant 0 : index
    %62 = vector.load %arg7[%c0_28, %c0_29, %c0_30] : memref<1x2x128xf32, #tpu.memory_space<vmem>>, vector<1x2x128xf32>
    %63 = vector.shape_cast %62 : vector<1x2x128xf32> to vector<2x128xf32>
    %64 = vector.shape_cast %61 : vector<2x128xf32> to vector<1x2x128xf32>
    tpu.vector_store %arg7[%c0_28, %c0_29, %c0_30], %64 {strides = array<i32>} : memref<1x2x128xf32, #tpu.memory_space<vmem>>, vector<1x2x128xf32>,
    return
  }
  func.func @transform_0(%arg0: i32) -> (i32, i32) {
    %c0_i32 = arith.constant 0 : i32
    %c0_i32_0 = arith.constant 0 : i32
    return %arg0, %c0_i32 : i32, i32
  }
  func.func @transform_1(%arg0: i32) -> (i32, i32) {
    %c0_i32 = arith.constant 0 : i32
    %c0_i32_0 = arith.constant 0 : i32
    %c0_i32_1 = arith.constant 0 : i32
    return %c0_i32, %c0_i32_0 : i32, i32
  }
  func.func @transform_2(%arg0: i32) -> (i32, i32) {
    %c0_i32 = arith.constant 0 : i32
    %c0_i32_0 = arith.constant 0 : i32
    %c0_i32_1 = arith.constant 0 : i32
    return %c0_i32, %c0_i32_0 : i32, i32
  }
  func.func @transform_3(%arg0: i32) -> (i32, i32, i32) {
    %c0_i32 = arith.constant 0 : i32
    %c0_i32_0 = arith.constant 0 : i32
    %c0_i32_1 = arith.constant 0 : i32
    %c0_i32_2 = arith.constant 0 : i32
    return %c0_i32, %c0_i32_0, %c0_i32_1 : i32, i32, i32
  }
  func.func @transform_4(%arg0: i32) -> (i32, i32) {
    %c0_i32 = arith.constant 0 : i32
    %c0_i32_0 = arith.constant 0 : i32
    %c0_i32_1 = arith.constant 0 : i32
    return %c0_i32, %c0_i32_0 : i32, i32
  }
  func.func @transform_5(%arg0: i32) -> (i32, i32) {
    %c0_i32 = arith.constant 0 : i32
    %c0_i32_0 = arith.constant 0 : i32
    return %arg0, %c0_i32 : i32, i32
  }
  func.func @transform_6(%arg0: i32) -> (i32, i32, i32) {
    %c0_i32 = arith.constant 0 : i32
    %c0_i32_0 = arith.constant 0 : i32
    %c0_i32_1 = arith.constant 0 : i32
    return %arg0, %c0_i32, %c0_i32_0 : i32, i32, i32
  }
}

module attributes {stable_mosaic.version = 11 : i64} {
  func.func @_conv_layer_kernel(%arg0: i32, %arg1: memref<16x64xf32, #tpu.memory_space<vmem>>, %arg2: memref<1x64xf32, #tpu.memory_space<vmem>>, %arg3: memref<1x64xf32, #tpu.memory_space<vmem>>, %arg4: memref<3x64x64xbf16, #tpu.memory_space<vmem>>, %arg5: memref<64x128xf32, #tpu.memory_space<vmem>>, %arg6: memref<16x64xf32, #tpu.memory_space<vmem>>, %arg7: memref<1x2x128xf32, #tpu.memory_space<vmem>>) attributes {dimension_semantics = [#tpu.dimension_semantics<parallel>], iteration_bounds = array<i64: 1>, scalar_prefetch = 0 : i64, scratch_operands = 0 : i64, tpu.core_type = #tpu.core_type<tc>, window_params = [{transform_indices = @transform_0, window_bounds = array<i64: 16, 64>}, {pipeline_mode = #tpu.pipeline_mode<synchronous>, transform_indices = @transform_1, window_bounds = array<i64: 1, 64>}, {pipeline_mode = #tpu.pipeline_mode<synchronous>, transform_indices = @transform_2, window_bounds = array<i64: 1, 64>}, {pipeline_mode = #tpu.pipeline_mode<synchronous>, transform_indices = @transform_3, window_bounds = array<i64: 3, 64, 64>}, {pipeline_mode = #tpu.pipeline_mode<synchronous>, transform_indices = @transform_4, window_bounds = array<i64: 64, 128>}, {transform_indices = @transform_5, window_bounds = array<i64: 16, 64>}, {transform_indices = @transform_6, window_bounds = array<i64: 1, 2, 128>}]} {
    %c0 = arith.constant 0 : index
    %c0_0 = arith.constant 0 : index
    %0 = vector.load %arg1[%c0, %c0_0] : memref<16x64xf32, #tpu.memory_space<vmem>>, vector<16x64xf32>
    %c0_1 = arith.constant 0 : index
    %c0_2 = arith.constant 0 : index
    %1 = vector.load %arg2[%c0_1, %c0_2] : memref<1x64xf32, #tpu.memory_space<vmem>>, vector<1x64xf32>
    %2 = vector.broadcast %1 : vector<1x64xf32> to vector<16x64xf32>
    %3 = arith.mulf %0, %2 : vector<16x64xf32>
    %c0_3 = arith.constant 0 : index
    %c0_4 = arith.constant 0 : index
    %4 = vector.load %arg3[%c0_3, %c0_4] : memref<1x64xf32, #tpu.memory_space<vmem>>, vector<1x64xf32>
    %5 = vector.broadcast %4 : vector<1x64xf32> to vector<16x64xf32>
    %6 = arith.addf %3, %5 : vector<16x64xf32>
    %cst = arith.constant 0.000000e+00 : f32
    %7 = vector.broadcast %cst : f32 to vector<16x64xf32>
    %8 = arith.maximumf %6, %7 : vector<16x64xf32>
    %9 = arith.truncf %8 : vector<16x64xf32> to vector<16x64xbf16>
    %c0_5 = arith.constant 0 : index
    %c0_6 = arith.constant 0 : index
    %c0_7 = arith.constant 0 : index
    %10 = vector.load %arg4[%c0_5, %c0_6, %c0_7] : memref<3x64x64xbf16, #tpu.memory_space<vmem>>, vector<1x64x64xbf16>
    %11 = vector.shape_cast %10 : vector<1x64x64xbf16> to vector<64x64xbf16>
    %cst_8 = arith.constant dense<0.000000e+00> : vector<16x64xf32>
    %12 = tpu.matmul %9, %11, %cst_8 {dimension_numbers = #tpu.dot_dimension_numbers<[1], [0], [0], [1], [0, 0, 1, 1], [], []>} : vector<16x64xbf16>, vector<64x64xbf16>, vector<16x64xf32> -> vector<16x64xf32>
    %c1 = arith.constant 1 : index
    %c0_9 = arith.constant 0 : index
    %c0_10 = arith.constant 0 : index
    %13 = vector.load %arg4[%c1, %c0_9, %c0_10] : memref<3x64x64xbf16, #tpu.memory_space<vmem>>, vector<1x64x64xbf16>
    %14 = vector.shape_cast %13 : vector<1x64x64xbf16> to vector<64x64xbf16>
    %cst_11 = arith.constant dense<0.000000e+00> : vector<16x64xf32>
    %15 = tpu.matmul %9, %14, %cst_11 {dimension_numbers = #tpu.dot_dimension_numbers<[1], [0], [0], [1], [0, 0, 1, 1], [], []>} : vector<16x64xbf16>, vector<64x64xbf16>, vector<16x64xf32> -> vector<16x64xf32>
    %c2 = arith.constant 2 : index
    %c0_12 = arith.constant 0 : index
    %c0_13 = arith.constant 0 : index
    %16 = vector.load %arg4[%c2, %c0_12, %c0_13] : memref<3x64x64xbf16, #tpu.memory_space<vmem>>, vector<1x64x64xbf16>
    %17 = vector.shape_cast %16 : vector<1x64x64xbf16> to vector<64x64xbf16>
    %cst_14 = arith.constant dense<0.000000e+00> : vector<16x64xf32>
    %18 = tpu.matmul %9, %17, %cst_14 {dimension_numbers = #tpu.dot_dimension_numbers<[1], [0], [0], [1], [0, 0, 1, 1], [], []>} : vector<16x64xbf16>, vector<64x64xbf16>, vector<16x64xf32> -> vector<16x64xf32>
    %cst_15 = arith.constant 0.000000e+00 : f32
    %19 = vector.broadcast %cst_15 : f32 to vector<1x64xf32>
    %20 = vector.extract_strided_slice %12 {offsets = [0, 0], sizes = [15, 64], strides = [1, 1]} : vector<16x64xf32> to vector<15x64xf32>
    %21 = tpu.concatenate %19, %20 in 0 : vector<1x64xf32>, vector<15x64xf32> -> vector<16x64xf32>
    %22 = vector.extract_strided_slice %18 {offsets = [1, 0], sizes = [15, 64], strides = [1, 1]} : vector<16x64xf32> to vector<15x64xf32>
    %23 = tpu.concatenate %22, %19 in 0 : vector<15x64xf32>, vector<1x64xf32> -> vector<16x64xf32>
    %24 = tpu.iota {dimensions = array<i32: 0>} : vector<16x1xi32>
    %c8_i32 = arith.constant 8 : i32
    %c0_i32 = arith.constant 0 : i32
    %25 = arith.cmpi eq, %c8_i32, %c0_i32 : i32
    %c1_i32 = arith.constant 1 : i32
    %26 = arith.select %25, %c1_i32, %c8_i32 : i32
    %27 = vector.broadcast %26 : i32 to vector<16x1xi32>
    %28 = arith.remsi %24, %27 : vector<16x1xi32>
    %c0_i32_16 = arith.constant 0 : i32
    %29 = vector.broadcast %c0_i32_16 : i32 to vector<16x1xi32>
    %30 = arith.cmpi ne, %28, %29 : vector<16x1xi32>
    %c0_i32_17 = arith.constant 0 : i32
    %31 = vector.broadcast %c0_i32_17 : i32 to vector<16x1xi32>
    %32 = arith.cmpi slt, %28, %31 : vector<16x1xi32>
    %c0_i32_18 = arith.constant 0 : i32
    %33 = arith.cmpi slt, %26, %c0_i32_18 : i32
    %34 = vector.broadcast %33 : i1 to vector<16x1xi1>
    %35 = vector.broadcast %34 : vector<16x1xi1> to vector<16x1xi1>
    %36 = arith.xori %32, %35 : vector<16x1xi1>
    %37 = arith.andi %36, %30 : vector<16x1xi1>
    %38 = vector.broadcast %26 : i32 to vector<16x1xi32>
    %39 = arith.addi %28, %38 : vector<16x1xi32>
    %40 = arith.select %37, %39, %28 : vector<16x1xi1>, vector<16x1xi32>
    %c0_i32_19 = arith.constant 0 : i32
    %41 = vector.broadcast %c0_i32_19 : i32 to vector<16x1xi32>
    %42 = arith.cmpi ne, %40, %41 : vector<16x1xi32>
    %cst_20 = arith.constant 0.000000e+00 : f32
    %43 = vector.shape_cast %42 : vector<16x1xi1> to vector<16x1xi1>
    %44 = vector.broadcast %43 : vector<16x1xi1> to vector<16x64xi1>
    %45 = vector.broadcast %cst_20 : f32 to vector<16x64xf32>
    %46 = arith.select %44, %21, %45 : vector<16x64xi1>, vector<16x64xf32>
    %47 = arith.addf %15, %46 : vector<16x64xf32>
    %c7_i32 = arith.constant 7 : i32
    %48 = vector.broadcast %c7_i32 : i32 to vector<16x1xi32>
    %49 = arith.cmpi ne, %40, %48 : vector<16x1xi32>
    %cst_21 = arith.constant 0.000000e+00 : f32
    %50 = vector.shape_cast %49 : vector<16x1xi1> to vector<16x1xi1>
    %51 = vector.broadcast %50 : vector<16x1xi1> to vector<16x64xi1>
    %52 = vector.broadcast %cst_21 : f32 to vector<16x64xf32>
    %53 = arith.select %51, %23, %52 : vector<16x64xi1>, vector<16x64xf32>
    %54 = arith.addf %47, %53 : vector<16x64xf32>
    %c0_22 = arith.constant 0 : index
    %c0_23 = arith.constant 0 : index
    %55 = vector.load %arg6[%c0_22, %c0_23] : memref<16x64xf32, #tpu.memory_space<vmem>>, vector<16x64xf32>
    tpu.vector_store %arg6[%c0_22, %c0_23], %54 {strides = array<i32>} : memref<16x64xf32, #tpu.memory_space<vmem>>, vector<16x64xf32>,
    %cst_24 = arith.constant dense<0.000000e+00> : vector<64xf32>
    %56 = vector.multi_reduction <add>, %54, %cst_24 [0] : vector<16x64xf32> to vector<64xf32>
    %57 = vector.shape_cast %56 : vector<64xf32> to vector<1x64xf32>
    %58 = arith.mulf %54, %54 : vector<16x64xf32>
    %cst_25 = arith.constant dense<0.000000e+00> : vector<64xf32>
    %59 = vector.multi_reduction <add>, %58, %cst_25 [0] : vector<16x64xf32> to vector<64xf32>
    %60 = vector.shape_cast %59 : vector<64xf32> to vector<1x64xf32>
    %61 = tpu.concatenate %57, %60 in 0 : vector<1x64xf32>, vector<1x64xf32> -> vector<2x64xf32>
    %c0_26 = arith.constant 0 : index
    %c0_27 = arith.constant 0 : index
    %62 = vector.load %arg5[%c0_26, %c0_27] : memref<64x128xf32, #tpu.memory_space<vmem>>, vector<64x128xf32>
    %cst_28 = arith.constant dense<0.000000e+00> : vector<2x128xf32>
    %63 = tpu.matmul %61, %62, %cst_28 {dimension_numbers = #tpu.dot_dimension_numbers<[1], [0], [0], [1], [0, 0, 1, 1], [], []>} : vector<2x64xf32>, vector<64x128xf32>, vector<2x128xf32> -> vector<2x128xf32>
    %c0_29 = arith.constant 0 : index
    %c0_30 = arith.constant 0 : index
    %c0_31 = arith.constant 0 : index
    %64 = vector.load %arg7[%c0_29, %c0_30, %c0_31] : memref<1x2x128xf32, #tpu.memory_space<vmem>>, vector<1x2x128xf32>
    %65 = vector.shape_cast %64 : vector<1x2x128xf32> to vector<2x128xf32>
    %66 = vector.shape_cast %63 : vector<2x128xf32> to vector<1x2x128xf32>
    tpu.vector_store %arg7[%c0_29, %c0_30, %c0_31], %66 {strides = array<i32>} : memref<1x2x128xf32, #tpu.memory_space<vmem>>, vector<1x2x128xf32>,
    return
  }
  func.func @transform_0(%arg0: i32) -> (i32, i32) {
    %c0_i32 = arith.constant 0 : i32
    %c0_i32_0 = arith.constant 0 : i32
    return %arg0, %c0_i32 : i32, i32
  }
  func.func @transform_1(%arg0: i32) -> (i32, i32) {
    %c0_i32 = arith.constant 0 : i32
    %c0_i32_0 = arith.constant 0 : i32
    %c0_i32_1 = arith.constant 0 : i32
    return %c0_i32, %c0_i32_0 : i32, i32
  }
  func.func @transform_2(%arg0: i32) -> (i32, i32) {
    %c0_i32 = arith.constant 0 : i32
    %c0_i32_0 = arith.constant 0 : i32
    %c0_i32_1 = arith.constant 0 : i32
    return %c0_i32, %c0_i32_0 : i32, i32
  }
  func.func @transform_3(%arg0: i32) -> (i32, i32, i32) {
    %c0_i32 = arith.constant 0 : i32
    %c0_i32_0 = arith.constant 0 : i32
    %c0_i32_1 = arith.constant 0 : i32
    %c0_i32_2 = arith.constant 0 : i32
    return %c0_i32, %c0_i32_0, %c0_i32_1 : i32, i32, i32
  }
  func.func @transform_4(%arg0: i32) -> (i32, i32) {
    %c0_i32 = arith.constant 0 : i32
    %c0_i32_0 = arith.constant 0 : i32
    %c0_i32_1 = arith.constant 0 : i32
    return %c0_i32, %c0_i32_0 : i32, i32
  }
  func.func @transform_5(%arg0: i32) -> (i32, i32) {
    %c0_i32 = arith.constant 0 : i32
    %c0_i32_0 = arith.constant 0 : i32
    return %arg0, %c0_i32 : i32, i32
  }
  func.func @transform_6(%arg0: i32) -> (i32, i32, i32) {
    %c0_i32 = arith.constant 0 : i32
    %c0_i32_0 = arith.constant 0 : i32
    %c0_i32_1 = arith.constant 0 : i32
    return %arg0, %c0_i32, %c0_i32_0 : i32, i32, i32
  }
}

module attributes {stable_mosaic.version = 11 : i64} {
  func.func @_linear_bottleneck_kernel(%arg0: i32, %arg1: memref<2x512xf32, #tpu.memory_space<vmem>>, %arg2: memref<1x512xf32, #tpu.memory_space<vmem>>, %arg3: memref<1x512xf32, #tpu.memory_space<vmem>>, %arg4: memref<512x8xbf16, #tpu.memory_space<vmem>>, %arg5: memref<1x8xf32, #tpu.memory_space<vmem>>, %arg6: memref<8x512xbf16, #tpu.memory_space<vmem>>, %arg7: memref<1x512xf32, #tpu.memory_space<vmem>>, %arg8: memref<2x512xf32, #tpu.memory_space<vmem>>) attributes {dimension_semantics = [#tpu.dimension_semantics<arbitrary>], iteration_bounds = array<i64: 1>, scalar_prefetch = 0 : i64, scratch_operands = 0 : i64, tpu.core_type = #tpu.core_type<tc>, window_params = [{pipeline_mode = #tpu.pipeline_mode<synchronous>, transform_indices = @transform_0, window_bounds = array<i64: 2, 512>}, {pipeline_mode = #tpu.pipeline_mode<synchronous>, transform_indices = @transform_1, window_bounds = array<i64: 1, 512>}, {pipeline_mode = #tpu.pipeline_mode<synchronous>, transform_indices = @transform_2, window_bounds = array<i64: 1, 512>}, {pipeline_mode = #tpu.pipeline_mode<synchronous>, transform_indices = @transform_3, window_bounds = array<i64: 512, 8>}, {pipeline_mode = #tpu.pipeline_mode<synchronous>, transform_indices = @transform_4, window_bounds = array<i64: 1, 8>}, {pipeline_mode = #tpu.pipeline_mode<synchronous>, transform_indices = @transform_5, window_bounds = array<i64: 8, 512>}, {pipeline_mode = #tpu.pipeline_mode<synchronous>, transform_indices = @transform_6, window_bounds = array<i64: 1, 512>}, {pipeline_mode = #tpu.pipeline_mode<synchronous>, transform_indices = @transform_7, window_bounds = array<i64: 2, 512>}]} {
    %c0 = arith.constant 0 : index
    %c0_0 = arith.constant 0 : index
    %0 = vector.load %arg1[%c0, %c0_0] : memref<2x512xf32, #tpu.memory_space<vmem>>, vector<2x512xf32>
    %c0_1 = arith.constant 0 : index
    %c0_2 = arith.constant 0 : index
    %1 = vector.load %arg2[%c0_1, %c0_2] : memref<1x512xf32, #tpu.memory_space<vmem>>, vector<1x512xf32>
    %2 = vector.broadcast %1 : vector<1x512xf32> to vector<2x512xf32>
    %3 = arith.mulf %0, %2 : vector<2x512xf32>
    %c0_3 = arith.constant 0 : index
    %c0_4 = arith.constant 0 : index
    %4 = vector.load %arg3[%c0_3, %c0_4] : memref<1x512xf32, #tpu.memory_space<vmem>>, vector<1x512xf32>
    %5 = vector.broadcast %4 : vector<1x512xf32> to vector<2x512xf32>
    %6 = arith.addf %3, %5 : vector<2x512xf32>
    %7 = arith.truncf %6 : vector<2x512xf32> to vector<2x512xbf16>
    %c0_5 = arith.constant 0 : index
    %c0_6 = arith.constant 0 : index
    %8 = vector.load %arg4[%c0_5, %c0_6] : memref<512x8xbf16, #tpu.memory_space<vmem>>, vector<512x8xbf16>
    %cst = arith.constant dense<0.000000e+00> : vector<2x8xf32>
    %9 = tpu.matmul %7, %8, %cst {dimension_numbers = #tpu.dot_dimension_numbers<[1], [0], [0], [1], [0, 0, 1, 1], [], []>} : vector<2x512xbf16>, vector<512x8xbf16>, vector<2x8xf32> -> vector<2x8xf32>
    %c0_7 = arith.constant 0 : index
    %c0_8 = arith.constant 0 : index
    %10 = vector.load %arg5[%c0_7, %c0_8] : memref<1x8xf32, #tpu.memory_space<vmem>>, vector<1x8xf32>
    %11 = vector.broadcast %10 : vector<1x8xf32> to vector<2x8xf32>
    %12 = arith.addf %9, %11 : vector<2x8xf32>
    %13 = arith.truncf %12 : vector<2x8xf32> to vector<2x8xbf16>
    %c0_9 = arith.constant 0 : index
    %c0_10 = arith.constant 0 : index
    %14 = vector.load %arg6[%c0_9, %c0_10] : memref<8x512xbf16, #tpu.memory_space<vmem>>, vector<8x512xbf16>
    %cst_11 = arith.constant dense<0.000000e+00> : vector<2x512xf32>
    %15 = tpu.matmul %13, %14, %cst_11 {dimension_numbers = #tpu.dot_dimension_numbers<[1], [0], [0], [1], [0, 0, 1, 1], [], []>} : vector<2x8xbf16>, vector<8x512xbf16>, vector<2x512xf32> -> vector<2x512xf32>
    %c0_12 = arith.constant 0 : index
    %c0_13 = arith.constant 0 : index
    %16 = vector.load %arg7[%c0_12, %c0_13] : memref<1x512xf32, #tpu.memory_space<vmem>>, vector<1x512xf32>
    %17 = vector.broadcast %16 : vector<1x512xf32> to vector<2x512xf32>
    %18 = arith.addf %15, %17 : vector<2x512xf32>
    %c0_14 = arith.constant 0 : index
    %c0_15 = arith.constant 0 : index
    %19 = vector.load %arg8[%c0_14, %c0_15] : memref<2x512xf32, #tpu.memory_space<vmem>>, vector<2x512xf32>
    tpu.vector_store %arg8[%c0_14, %c0_15], %18 {strides = array<i32>} : memref<2x512xf32, #tpu.memory_space<vmem>>, vector<2x512xf32>,
    return
  }
  func.func @transform_0(%arg0: i32) -> (i32, i32) {
    %c0_i32 = arith.constant 0 : i32
    %c0_i32_0 = arith.constant 0 : i32
    %c0_i32_1 = arith.constant 0 : i32
    return %c0_i32, %c0_i32_0 : i32, i32
  }
  func.func @transform_1(%arg0: i32) -> (i32, i32) {
    %c0_i32 = arith.constant 0 : i32
    %c0_i32_0 = arith.constant 0 : i32
    %c0_i32_1 = arith.constant 0 : i32
    return %c0_i32, %c0_i32_0 : i32, i32
  }
  func.func @transform_2(%arg0: i32) -> (i32, i32) {
    %c0_i32 = arith.constant 0 : i32
    %c0_i32_0 = arith.constant 0 : i32
    %c0_i32_1 = arith.constant 0 : i32
    return %c0_i32, %c0_i32_0 : i32, i32
  }
  func.func @transform_3(%arg0: i32) -> (i32, i32) {
    %c0_i32 = arith.constant 0 : i32
    %c0_i32_0 = arith.constant 0 : i32
    %c0_i32_1 = arith.constant 0 : i32
    return %c0_i32, %c0_i32_0 : i32, i32
  }
  func.func @transform_4(%arg0: i32) -> (i32, i32) {
    %c0_i32 = arith.constant 0 : i32
    %c0_i32_0 = arith.constant 0 : i32
    %c0_i32_1 = arith.constant 0 : i32
    return %c0_i32, %c0_i32_0 : i32, i32
  }
  func.func @transform_5(%arg0: i32) -> (i32, i32) {
    %c0_i32 = arith.constant 0 : i32
    %c0_i32_0 = arith.constant 0 : i32
    %c0_i32_1 = arith.constant 0 : i32
    return %c0_i32, %c0_i32_0 : i32, i32
  }
  func.func @transform_6(%arg0: i32) -> (i32, i32) {
    %c0_i32 = arith.constant 0 : i32
    %c0_i32_0 = arith.constant 0 : i32
    %c0_i32_1 = arith.constant 0 : i32
    return %c0_i32, %c0_i32_0 : i32, i32
  }
  func.func @transform_7(%arg0: i32) -> (i32, i32) {
    %c0_i32 = arith.constant 0 : i32
    %c0_i32_0 = arith.constant 0 : i32
    %c0_i32_1 = arith.constant 0 : i32
    return %c0_i32, %c0_i32_0 : i32, i32
  }
}

module attributes {stable_mosaic.version = 11 : i64} {
  func.func @_conv_layer_kernel(%arg0: i32, %arg1: memref<24x96xf32, #tpu.memory_space<vmem>>, %arg2: memref<1x96xf32, #tpu.memory_space<vmem>>, %arg3: memref<1x96xf32, #tpu.memory_space<vmem>>, %arg4: memref<3x96x96xbf16, #tpu.memory_space<vmem>>, %arg5: memref<96x128xf32, #tpu.memory_space<vmem>>, %arg6: memref<24x96xf32, #tpu.memory_space<vmem>>, %arg7: memref<1x2x128xf32, #tpu.memory_space<vmem>>) attributes {dimension_semantics = [#tpu.dimension_semantics<parallel>], iteration_bounds = array<i64: 1>, scalar_prefetch = 0 : i64, scratch_operands = 0 : i64, tpu.core_type = #tpu.core_type<tc>, window_params = [{transform_indices = @transform_0, window_bounds = array<i64: 24, 96>}, {pipeline_mode = #tpu.pipeline_mode<synchronous>, transform_indices = @transform_1, window_bounds = array<i64: 1, 96>}, {pipeline_mode = #tpu.pipeline_mode<synchronous>, transform_indices = @transform_2, window_bounds = array<i64: 1, 96>}, {pipeline_mode = #tpu.pipeline_mode<synchronous>, transform_indices = @transform_3, window_bounds = array<i64: 3, 96, 96>}, {pipeline_mode = #tpu.pipeline_mode<synchronous>, transform_indices = @transform_4, window_bounds = array<i64: 96, 128>}, {transform_indices = @transform_5, window_bounds = array<i64: 24, 96>}, {transform_indices = @transform_6, window_bounds = array<i64: 1, 2, 128>}]} {
    %c0 = arith.constant 0 : index
    %c0_0 = arith.constant 0 : index
    %0 = vector.load %arg1[%c0, %c0_0] : memref<24x96xf32, #tpu.memory_space<vmem>>, vector<24x96xf32>
    %c0_1 = arith.constant 0 : index
    %c0_2 = arith.constant 0 : index
    %1 = vector.load %arg2[%c0_1, %c0_2] : memref<1x96xf32, #tpu.memory_space<vmem>>, vector<1x96xf32>
    %2 = vector.broadcast %1 : vector<1x96xf32> to vector<24x96xf32>
    %3 = arith.mulf %0, %2 : vector<24x96xf32>
    %c0_3 = arith.constant 0 : index
    %c0_4 = arith.constant 0 : index
    %4 = vector.load %arg3[%c0_3, %c0_4] : memref<1x96xf32, #tpu.memory_space<vmem>>, vector<1x96xf32>
    %5 = vector.broadcast %4 : vector<1x96xf32> to vector<24x96xf32>
    %6 = arith.addf %3, %5 : vector<24x96xf32>
    %7 = arith.truncf %6 : vector<24x96xf32> to vector<24x96xbf16>
    %c0_5 = arith.constant 0 : index
    %c0_6 = arith.constant 0 : index
    %c0_7 = arith.constant 0 : index
    %8 = vector.load %arg4[%c0_5, %c0_6, %c0_7] : memref<3x96x96xbf16, #tpu.memory_space<vmem>>, vector<1x96x96xbf16>
    %9 = vector.shape_cast %8 : vector<1x96x96xbf16> to vector<96x96xbf16>
    %cst = arith.constant dense<0.000000e+00> : vector<24x96xf32>
    %10 = tpu.matmul %7, %9, %cst {dimension_numbers = #tpu.dot_dimension_numbers<[1], [0], [0], [1], [0, 0, 1, 1], [], []>} : vector<24x96xbf16>, vector<96x96xbf16>, vector<24x96xf32> -> vector<24x96xf32>
    %c1 = arith.constant 1 : index
    %c0_8 = arith.constant 0 : index
    %c0_9 = arith.constant 0 : index
    %11 = vector.load %arg4[%c1, %c0_8, %c0_9] : memref<3x96x96xbf16, #tpu.memory_space<vmem>>, vector<1x96x96xbf16>
    %12 = vector.shape_cast %11 : vector<1x96x96xbf16> to vector<96x96xbf16>
    %cst_10 = arith.constant dense<0.000000e+00> : vector<24x96xf32>
    %13 = tpu.matmul %7, %12, %cst_10 {dimension_numbers = #tpu.dot_dimension_numbers<[1], [0], [0], [1], [0, 0, 1, 1], [], []>} : vector<24x96xbf16>, vector<96x96xbf16>, vector<24x96xf32> -> vector<24x96xf32>
    %c2 = arith.constant 2 : index
    %c0_11 = arith.constant 0 : index
    %c0_12 = arith.constant 0 : index
    %14 = vector.load %arg4[%c2, %c0_11, %c0_12] : memref<3x96x96xbf16, #tpu.memory_space<vmem>>, vector<1x96x96xbf16>
    %15 = vector.shape_cast %14 : vector<1x96x96xbf16> to vector<96x96xbf16>
    %cst_13 = arith.constant dense<0.000000e+00> : vector<24x96xf32>
    %16 = tpu.matmul %7, %15, %cst_13 {dimension_numbers = #tpu.dot_dimension_numbers<[1], [0], [0], [1], [0, 0, 1, 1], [], []>} : vector<24x96xbf16>, vector<96x96xbf16>, vector<24x96xf32> -> vector<24x96xf32>
    %cst_14 = arith.constant 0.000000e+00 : f32
    %17 = vector.broadcast %cst_14 : f32 to vector<1x96xf32>
    %18 = vector.extract_strided_slice %10 {offsets = [0, 0], sizes = [23, 96], strides = [1, 1]} : vector<24x96xf32> to vector<23x96xf32>
    %19 = tpu.concatenate %17, %18 in 0 : vector<1x96xf32>, vector<23x96xf32> -> vector<24x96xf32>
    %20 = vector.extract_strided_slice %16 {offsets = [1, 0], sizes = [23, 96], strides = [1, 1]} : vector<24x96xf32> to vector<23x96xf32>
    %21 = tpu.concatenate %20, %17 in 0 : vector<23x96xf32>, vector<1x96xf32> -> vector<24x96xf32>
    %22 = tpu.iota {dimensions = array<i32: 0>} : vector<24x1xi32>
    %c12_i32 = arith.constant 12 : i32
    %c0_i32 = arith.constant 0 : i32
    %23 = arith.cmpi eq, %c12_i32, %c0_i32 : i32
    %c1_i32 = arith.constant 1 : i32
    %24 = arith.select %23, %c1_i32, %c12_i32 : i32
    %25 = vector.broadcast %24 : i32 to vector<24x1xi32>
    %26 = arith.remsi %22, %25 : vector<24x1xi32>
    %c0_i32_15 = arith.constant 0 : i32
    %27 = vector.broadcast %c0_i32_15 : i32 to vector<24x1xi32>
    %28 = arith.cmpi ne, %26, %27 : vector<24x1xi32>
    %c0_i32_16 = arith.constant 0 : i32
    %29 = vector.broadcast %c0_i32_16 : i32 to vector<24x1xi32>
    %30 = arith.cmpi slt, %26, %29 : vector<24x1xi32>
    %c0_i32_17 = arith.constant 0 : i32
    %31 = arith.cmpi slt, %24, %c0_i32_17 : i32
    %32 = vector.broadcast %31 : i1 to vector<24x1xi1>
    %33 = vector.broadcast %32 : vector<24x1xi1> to vector<24x1xi1>
    %34 = arith.xori %30, %33 : vector<24x1xi1>
    %35 = arith.andi %34, %28 : vector<24x1xi1>
    %36 = vector.broadcast %24 : i32 to vector<24x1xi32>
    %37 = arith.addi %26, %36 : vector<24x1xi32>
    %38 = arith.select %35, %37, %26 : vector<24x1xi1>, vector<24x1xi32>
    %c0_i32_18 = arith.constant 0 : i32
    %39 = vector.broadcast %c0_i32_18 : i32 to vector<24x1xi32>
    %40 = arith.cmpi ne, %38, %39 : vector<24x1xi32>
    %cst_19 = arith.constant 0.000000e+00 : f32
    %41 = vector.shape_cast %40 : vector<24x1xi1> to vector<24x1xi1>
    %42 = vector.broadcast %41 : vector<24x1xi1> to vector<24x96xi1>
    %43 = vector.broadcast %cst_19 : f32 to vector<24x96xf32>
    %44 = arith.select %42, %19, %43 : vector<24x96xi1>, vector<24x96xf32>
    %45 = arith.addf %13, %44 : vector<24x96xf32>
    %c11_i32 = arith.constant 11 : i32
    %46 = vector.broadcast %c11_i32 : i32 to vector<24x1xi32>
    %47 = arith.cmpi ne, %38, %46 : vector<24x1xi32>
    %cst_20 = arith.constant 0.000000e+00 : f32
    %48 = vector.shape_cast %47 : vector<24x1xi1> to vector<24x1xi1>
    %49 = vector.broadcast %48 : vector<24x1xi1> to vector<24x96xi1>
    %50 = vector.broadcast %cst_20 : f32 to vector<24x96xf32>
    %51 = arith.select %49, %21, %50 : vector<24x96xi1>, vector<24x96xf32>
    %52 = arith.addf %45, %51 : vector<24x96xf32>
    %c0_21 = arith.constant 0 : index
    %c0_22 = arith.constant 0 : index
    %53 = vector.load %arg6[%c0_21, %c0_22] : memref<24x96xf32, #tpu.memory_space<vmem>>, vector<24x96xf32>
    tpu.vector_store %arg6[%c0_21, %c0_22], %52 {strides = array<i32>} : memref<24x96xf32, #tpu.memory_space<vmem>>, vector<24x96xf32>,
    %cst_23 = arith.constant dense<0.000000e+00> : vector<96xf32>
    %54 = vector.multi_reduction <add>, %52, %cst_23 [0] : vector<24x96xf32> to vector<96xf32>
    %55 = vector.shape_cast %54 : vector<96xf32> to vector<1x96xf32>
    %56 = arith.mulf %52, %52 : vector<24x96xf32>
    %cst_24 = arith.constant dense<0.000000e+00> : vector<96xf32>
    %57 = vector.multi_reduction <add>, %56, %cst_24 [0] : vector<24x96xf32> to vector<96xf32>
    %58 = vector.shape_cast %57 : vector<96xf32> to vector<1x96xf32>
    %59 = tpu.concatenate %55, %58 in 0 : vector<1x96xf32>, vector<1x96xf32> -> vector<2x96xf32>
    %c0_25 = arith.constant 0 : index
    %c0_26 = arith.constant 0 : index
    %60 = vector.load %arg5[%c0_25, %c0_26] : memref<96x128xf32, #tpu.memory_space<vmem>>, vector<96x128xf32>
    %cst_27 = arith.constant dense<0.000000e+00> : vector<2x128xf32>
    %61 = tpu.matmul %59, %60, %cst_27 {dimension_numbers = #tpu.dot_dimension_numbers<[1], [0], [0], [1], [0, 0, 1, 1], [], []>} : vector<2x96xf32>, vector<96x128xf32>, vector<2x128xf32> -> vector<2x128xf32>
    %c0_28 = arith.constant 0 : index
    %c0_29 = arith.constant 0 : index
    %c0_30 = arith.constant 0 : index
    %62 = vector.load %arg7[%c0_28, %c0_29, %c0_30] : memref<1x2x128xf32, #tpu.memory_space<vmem>>, vector<1x2x128xf32>
    %63 = vector.shape_cast %62 : vector<1x2x128xf32> to vector<2x128xf32>
    %64 = vector.shape_cast %61 : vector<2x128xf32> to vector<1x2x128xf32>
    tpu.vector_store %arg7[%c0_28, %c0_29, %c0_30], %64 {strides = array<i32>} : memref<1x2x128xf32, #tpu.memory_space<vmem>>, vector<1x2x128xf32>,
    return
  }
  func.func @transform_0(%arg0: i32) -> (i32, i32) {
    %c0_i32 = arith.constant 0 : i32
    %c0_i32_0 = arith.constant 0 : i32
    return %arg0, %c0_i32 : i32, i32
  }
  func.func @transform_1(%arg0: i32) -> (i32, i32) {
    %c0_i32 = arith.constant 0 : i32
    %c0_i32_0 = arith.constant 0 : i32
    %c0_i32_1 = arith.constant 0 : i32
    return %c0_i32, %c0_i32_0 : i32, i32
  }
  func.func @transform_2(%arg0: i32) -> (i32, i32) {
    %c0_i32 = arith.constant 0 : i32
    %c0_i32_0 = arith.constant 0 : i32
    %c0_i32_1 = arith.constant 0 : i32
    return %c0_i32, %c0_i32_0 : i32, i32
  }
  func.func @transform_3(%arg0: i32) -> (i32, i32, i32) {
    %c0_i32 = arith.constant 0 : i32
    %c0_i32_0 = arith.constant 0 : i32
    %c0_i32_1 = arith.constant 0 : i32
    %c0_i32_2 = arith.constant 0 : i32
    return %c0_i32, %c0_i32_0, %c0_i32_1 : i32, i32, i32
  }
  func.func @transform_4(%arg0: i32) -> (i32, i32) {
    %c0_i32 = arith.constant 0 : i32
    %c0_i32_0 = arith.constant 0 : i32
    %c0_i32_1 = arith.constant 0 : i32
    return %c0_i32, %c0_i32_0 : i32, i32
  }
  func.func @transform_5(%arg0: i32) -> (i32, i32) {
    %c0_i32 = arith.constant 0 : i32
    %c0_i32_0 = arith.constant 0 : i32
    return %arg0, %c0_i32 : i32, i32
  }
  func.func @transform_6(%arg0: i32) -> (i32, i32, i32) {
    %c0_i32 = arith.constant 0 : i32
    %c0_i32_0 = arith.constant 0 : i32
    %c0_i32_1 = arith.constant 0 : i32
    return %arg0, %c0_i32, %c0_i32_0 : i32, i32, i32
  }
}

module attributes {stable_mosaic.version = 11 : i64} {
  func.func @_conv_layer_kernel(%arg0: i32, %arg1: memref<32x128xf32, #tpu.memory_space<vmem>>, %arg2: memref<1x128xf32, #tpu.memory_space<vmem>>, %arg3: memref<1x128xf32, #tpu.memory_space<vmem>>, %arg4: memref<3x128x48xbf16, #tpu.memory_space<vmem>>, %arg5: memref<48x128xf32, #tpu.memory_space<vmem>>, %arg6: memref<32x48xf32, #tpu.memory_space<vmem>>, %arg7: memref<1x2x128xf32, #tpu.memory_space<vmem>>) attributes {dimension_semantics = [#tpu.dimension_semantics<parallel>], iteration_bounds = array<i64: 1>, scalar_prefetch = 0 : i64, scratch_operands = 0 : i64, tpu.core_type = #tpu.core_type<tc>, window_params = [{transform_indices = @transform_0, window_bounds = array<i64: 32, 128>}, {pipeline_mode = #tpu.pipeline_mode<synchronous>, transform_indices = @transform_1, window_bounds = array<i64: 1, 128>}, {pipeline_mode = #tpu.pipeline_mode<synchronous>, transform_indices = @transform_2, window_bounds = array<i64: 1, 128>}, {pipeline_mode = #tpu.pipeline_mode<synchronous>, transform_indices = @transform_3, window_bounds = array<i64: 3, 128, 48>}, {pipeline_mode = #tpu.pipeline_mode<synchronous>, transform_indices = @transform_4, window_bounds = array<i64: 48, 128>}, {transform_indices = @transform_5, window_bounds = array<i64: 32, 48>}, {transform_indices = @transform_6, window_bounds = array<i64: 1, 2, 128>}]} {
    %c0 = arith.constant 0 : index
    %c0_0 = arith.constant 0 : index
    %0 = vector.load %arg1[%c0, %c0_0] : memref<32x128xf32, #tpu.memory_space<vmem>>, vector<32x128xf32>
    %c0_1 = arith.constant 0 : index
    %c0_2 = arith.constant 0 : index
    %1 = vector.load %arg2[%c0_1, %c0_2] : memref<1x128xf32, #tpu.memory_space<vmem>>, vector<1x128xf32>
    %2 = vector.broadcast %1 : vector<1x128xf32> to vector<32x128xf32>
    %3 = arith.mulf %0, %2 : vector<32x128xf32>
    %c0_3 = arith.constant 0 : index
    %c0_4 = arith.constant 0 : index
    %4 = vector.load %arg3[%c0_3, %c0_4] : memref<1x128xf32, #tpu.memory_space<vmem>>, vector<1x128xf32>
    %5 = vector.broadcast %4 : vector<1x128xf32> to vector<32x128xf32>
    %6 = arith.addf %3, %5 : vector<32x128xf32>
    %cst = arith.constant 0.000000e+00 : f32
    %7 = vector.broadcast %cst : f32 to vector<32x128xf32>
    %8 = arith.maximumf %6, %7 : vector<32x128xf32>
    %9 = arith.truncf %8 : vector<32x128xf32> to vector<32x128xbf16>
    %c0_5 = arith.constant 0 : index
    %c0_6 = arith.constant 0 : index
    %c0_7 = arith.constant 0 : index
    %10 = vector.load %arg4[%c0_5, %c0_6, %c0_7] : memref<3x128x48xbf16, #tpu.memory_space<vmem>>, vector<1x128x48xbf16>
    %11 = vector.shape_cast %10 : vector<1x128x48xbf16> to vector<128x48xbf16>
    %cst_8 = arith.constant dense<0.000000e+00> : vector<32x48xf32>
    %12 = tpu.matmul %9, %11, %cst_8 {dimension_numbers = #tpu.dot_dimension_numbers<[1], [0], [0], [1], [0, 0, 1, 1], [], []>} : vector<32x128xbf16>, vector<128x48xbf16>, vector<32x48xf32> -> vector<32x48xf32>
    %c1 = arith.constant 1 : index
    %c0_9 = arith.constant 0 : index
    %c0_10 = arith.constant 0 : index
    %13 = vector.load %arg4[%c1, %c0_9, %c0_10] : memref<3x128x48xbf16, #tpu.memory_space<vmem>>, vector<1x128x48xbf16>
    %14 = vector.shape_cast %13 : vector<1x128x48xbf16> to vector<128x48xbf16>
    %cst_11 = arith.constant dense<0.000000e+00> : vector<32x48xf32>
    %15 = tpu.matmul %9, %14, %cst_11 {dimension_numbers = #tpu.dot_dimension_numbers<[1], [0], [0], [1], [0, 0, 1, 1], [], []>} : vector<32x128xbf16>, vector<128x48xbf16>, vector<32x48xf32> -> vector<32x48xf32>
    %c2 = arith.constant 2 : index
    %c0_12 = arith.constant 0 : index
    %c0_13 = arith.constant 0 : index
    %16 = vector.load %arg4[%c2, %c0_12, %c0_13] : memref<3x128x48xbf16, #tpu.memory_space<vmem>>, vector<1x128x48xbf16>
    %17 = vector.shape_cast %16 : vector<1x128x48xbf16> to vector<128x48xbf16>
    %cst_14 = arith.constant dense<0.000000e+00> : vector<32x48xf32>
    %18 = tpu.matmul %9, %17, %cst_14 {dimension_numbers = #tpu.dot_dimension_numbers<[1], [0], [0], [1], [0, 0, 1, 1], [], []>} : vector<32x128xbf16>, vector<128x48xbf16>, vector<32x48xf32> -> vector<32x48xf32>
    %cst_15 = arith.constant 0.000000e+00 : f32
    %19 = vector.broadcast %cst_15 : f32 to vector<1x48xf32>
    %20 = vector.extract_strided_slice %12 {offsets = [0, 0], sizes = [31, 48], strides = [1, 1]} : vector<32x48xf32> to vector<31x48xf32>
    %21 = tpu.concatenate %19, %20 in 0 : vector<1x48xf32>, vector<31x48xf32> -> vector<32x48xf32>
    %22 = vector.extract_strided_slice %18 {offsets = [1, 0], sizes = [31, 48], strides = [1, 1]} : vector<32x48xf32> to vector<31x48xf32>
    %23 = tpu.concatenate %22, %19 in 0 : vector<31x48xf32>, vector<1x48xf32> -> vector<32x48xf32>
    %24 = tpu.iota {dimensions = array<i32: 0>} : vector<32x1xi32>
    %c16_i32 = arith.constant 16 : i32
    %c0_i32 = arith.constant 0 : i32
    %25 = arith.cmpi eq, %c16_i32, %c0_i32 : i32
    %c1_i32 = arith.constant 1 : i32
    %26 = arith.select %25, %c1_i32, %c16_i32 : i32
    %27 = vector.broadcast %26 : i32 to vector<32x1xi32>
    %28 = arith.remsi %24, %27 : vector<32x1xi32>
    %c0_i32_16 = arith.constant 0 : i32
    %29 = vector.broadcast %c0_i32_16 : i32 to vector<32x1xi32>
    %30 = arith.cmpi ne, %28, %29 : vector<32x1xi32>
    %c0_i32_17 = arith.constant 0 : i32
    %31 = vector.broadcast %c0_i32_17 : i32 to vector<32x1xi32>
    %32 = arith.cmpi slt, %28, %31 : vector<32x1xi32>
    %c0_i32_18 = arith.constant 0 : i32
    %33 = arith.cmpi slt, %26, %c0_i32_18 : i32
    %34 = vector.broadcast %33 : i1 to vector<32x1xi1>
    %35 = vector.broadcast %34 : vector<32x1xi1> to vector<32x1xi1>
    %36 = arith.xori %32, %35 : vector<32x1xi1>
    %37 = arith.andi %36, %30 : vector<32x1xi1>
    %38 = vector.broadcast %26 : i32 to vector<32x1xi32>
    %39 = arith.addi %28, %38 : vector<32x1xi32>
    %40 = arith.select %37, %39, %28 : vector<32x1xi1>, vector<32x1xi32>
    %c0_i32_19 = arith.constant 0 : i32
    %41 = vector.broadcast %c0_i32_19 : i32 to vector<32x1xi32>
    %42 = arith.cmpi ne, %40, %41 : vector<32x1xi32>
    %cst_20 = arith.constant 0.000000e+00 : f32
    %43 = vector.shape_cast %42 : vector<32x1xi1> to vector<32x1xi1>
    %44 = vector.broadcast %43 : vector<32x1xi1> to vector<32x48xi1>
    %45 = vector.broadcast %cst_20 : f32 to vector<32x48xf32>
    %46 = arith.select %44, %21, %45 : vector<32x48xi1>, vector<32x48xf32>
    %47 = arith.addf %15, %46 : vector<32x48xf32>
    %c15_i32 = arith.constant 15 : i32
    %48 = vector.broadcast %c15_i32 : i32 to vector<32x1xi32>
    %49 = arith.cmpi ne, %40, %48 : vector<32x1xi32>
    %cst_21 = arith.constant 0.000000e+00 : f32
    %50 = vector.shape_cast %49 : vector<32x1xi1> to vector<32x1xi1>
    %51 = vector.broadcast %50 : vector<32x1xi1> to vector<32x48xi1>
    %52 = vector.broadcast %cst_21 : f32 to vector<32x48xf32>
    %53 = arith.select %51, %23, %52 : vector<32x48xi1>, vector<32x48xf32>
    %54 = arith.addf %47, %53 : vector<32x48xf32>
    %c0_22 = arith.constant 0 : index
    %c0_23 = arith.constant 0 : index
    %55 = vector.load %arg6[%c0_22, %c0_23] : memref<32x48xf32, #tpu.memory_space<vmem>>, vector<32x48xf32>
    tpu.vector_store %arg6[%c0_22, %c0_23], %54 {strides = array<i32>} : memref<32x48xf32, #tpu.memory_space<vmem>>, vector<32x48xf32>,
    %cst_24 = arith.constant dense<0.000000e+00> : vector<48xf32>
    %56 = vector.multi_reduction <add>, %54, %cst_24 [0] : vector<32x48xf32> to vector<48xf32>
    %57 = vector.shape_cast %56 : vector<48xf32> to vector<1x48xf32>
    %58 = arith.mulf %54, %54 : vector<32x48xf32>
    %cst_25 = arith.constant dense<0.000000e+00> : vector<48xf32>
    %59 = vector.multi_reduction <add>, %58, %cst_25 [0] : vector<32x48xf32> to vector<48xf32>
    %60 = vector.shape_cast %59 : vector<48xf32> to vector<1x48xf32>
    %61 = tpu.concatenate %57, %60 in 0 : vector<1x48xf32>, vector<1x48xf32> -> vector<2x48xf32>
    %c0_26 = arith.constant 0 : index
    %c0_27 = arith.constant 0 : index
    %62 = vector.load %arg5[%c0_26, %c0_27] : memref<48x128xf32, #tpu.memory_space<vmem>>, vector<48x128xf32>
    %cst_28 = arith.constant dense<0.000000e+00> : vector<2x128xf32>
    %63 = tpu.matmul %61, %62, %cst_28 {dimension_numbers = #tpu.dot_dimension_numbers<[1], [0], [0], [1], [0, 0, 1, 1], [], []>} : vector<2x48xf32>, vector<48x128xf32>, vector<2x128xf32> -> vector<2x128xf32>
    %c0_29 = arith.constant 0 : index
    %c0_30 = arith.constant 0 : index
    %c0_31 = arith.constant 0 : index
    %64 = vector.load %arg7[%c0_29, %c0_30, %c0_31] : memref<1x2x128xf32, #tpu.memory_space<vmem>>, vector<1x2x128xf32>
    %65 = vector.shape_cast %64 : vector<1x2x128xf32> to vector<2x128xf32>
    %66 = vector.shape_cast %63 : vector<2x128xf32> to vector<1x2x128xf32>
    tpu.vector_store %arg7[%c0_29, %c0_30, %c0_31], %66 {strides = array<i32>} : memref<1x2x128xf32, #tpu.memory_space<vmem>>, vector<1x2x128xf32>,
    return
  }
  func.func @transform_0(%arg0: i32) -> (i32, i32) {
    %c0_i32 = arith.constant 0 : i32
    %c0_i32_0 = arith.constant 0 : i32
    return %arg0, %c0_i32 : i32, i32
  }
  func.func @transform_1(%arg0: i32) -> (i32, i32) {
    %c0_i32 = arith.constant 0 : i32
    %c0_i32_0 = arith.constant 0 : i32
    %c0_i32_1 = arith.constant 0 : i32
    return %c0_i32, %c0_i32_0 : i32, i32
  }
  func.func @transform_2(%arg0: i32) -> (i32, i32) {
    %c0_i32 = arith.constant 0 : i32
    %c0_i32_0 = arith.constant 0 : i32
    %c0_i32_1 = arith.constant 0 : i32
    return %c0_i32, %c0_i32_0 : i32, i32
  }
  func.func @transform_3(%arg0: i32) -> (i32, i32, i32) {
    %c0_i32 = arith.constant 0 : i32
    %c0_i32_0 = arith.constant 0 : i32
    %c0_i32_1 = arith.constant 0 : i32
    %c0_i32_2 = arith.constant 0 : i32
    return %c0_i32, %c0_i32_0, %c0_i32_1 : i32, i32, i32
  }
  func.func @transform_4(%arg0: i32) -> (i32, i32) {
    %c0_i32 = arith.constant 0 : i32
    %c0_i32_0 = arith.constant 0 : i32
    %c0_i32_1 = arith.constant 0 : i32
    return %c0_i32, %c0_i32_0 : i32, i32
  }
  func.func @transform_5(%arg0: i32) -> (i32, i32) {
    %c0_i32 = arith.constant 0 : i32
    %c0_i32_0 = arith.constant 0 : i32
    return %arg0, %c0_i32 : i32, i32
  }
  func.func @transform_6(%arg0: i32) -> (i32, i32, i32) {
    %c0_i32 = arith.constant 0 : i32
    %c0_i32_0 = arith.constant 0 : i32
    %c0_i32_1 = arith.constant 0 : i32
    return %arg0, %c0_i32, %c0_i32_0 : i32, i32, i32
  }
}

module attributes {stable_mosaic.version = 11 : i64} {
  func.func @_bn_act_apply_kernel(%arg0: i32, %arg1: memref<32x48xf32, #tpu.memory_space<vmem>>, %arg2: memref<1x48xf32, #tpu.memory_space<vmem>>, %arg3: memref<1x48xf32, #tpu.memory_space<vmem>>, %arg4: memref<32x48xf32, #tpu.memory_space<vmem>>) attributes {dimension_semantics = [#tpu.dimension_semantics<arbitrary>], iteration_bounds = array<i64: 1>, scalar_prefetch = 0 : i64, scratch_operands = 0 : i64, tpu.core_type = #tpu.core_type<tc>, window_params = [{pipeline_mode = #tpu.pipeline_mode<synchronous>, transform_indices = @transform_0, window_bounds = array<i64: 32, 48>}, {pipeline_mode = #tpu.pipeline_mode<synchronous>, transform_indices = @transform_1, window_bounds = array<i64: 1, 48>}, {pipeline_mode = #tpu.pipeline_mode<synchronous>, transform_indices = @transform_2, window_bounds = array<i64: 1, 48>}, {pipeline_mode = #tpu.pipeline_mode<synchronous>, transform_indices = @transform_3, window_bounds = array<i64: 32, 48>}]} {
    %c0 = arith.constant 0 : index
    %c0_0 = arith.constant 0 : index
    %0 = vector.load %arg1[%c0, %c0_0] : memref<32x48xf32, #tpu.memory_space<vmem>>, vector<32x48xf32>
    %c0_1 = arith.constant 0 : index
    %c0_2 = arith.constant 0 : index
    %1 = vector.load %arg2[%c0_1, %c0_2] : memref<1x48xf32, #tpu.memory_space<vmem>>, vector<1x48xf32>
    %2 = vector.broadcast %1 : vector<1x48xf32> to vector<32x48xf32>
    %3 = arith.mulf %0, %2 : vector<32x48xf32>
    %c0_3 = arith.constant 0 : index
    %c0_4 = arith.constant 0 : index
    %4 = vector.load %arg3[%c0_3, %c0_4] : memref<1x48xf32, #tpu.memory_space<vmem>>, vector<1x48xf32>
    %5 = vector.broadcast %4 : vector<1x48xf32> to vector<32x48xf32>
    %6 = arith.addf %3, %5 : vector<32x48xf32>
    %7 = math.absf %6 : vector<32x48xf32>
    %cst = arith.constant 0.000000e+00 : f32
    %8 = vector.broadcast %cst : f32 to vector<32x48xf32>
    %9 = arith.subf %8, %7 : vector<32x48xf32>
    %10 = math.exp %9 : vector<32x48xf32>
    %cst_5 = arith.constant 1.000000e+00 : f32
    %11 = vector.broadcast %cst_5 : f32 to vector<32x48xf32>
    %12 = arith.addf %11, %10 : vector<32x48xf32>
    %cst_6 = arith.constant 1.000000e+00 : f32
    %13 = vector.broadcast %cst_6 : f32 to vector<32x48xf32>
    %14 = arith.divf %13, %12 : vector<32x48xf32>
    %cst_7 = arith.constant 0.000000e+00 : f32
    %15 = vector.broadcast %cst_7 : f32 to vector<32x48xf32>
    %16 = arith.cmpf oge, %6, %15 : vector<32x48xf32>
    %17 = arith.mulf %10, %14 : vector<32x48xf32>
    %18 = arith.select %16, %14, %17 : vector<32x48xi1>, vector<32x48xf32>
    %c0_8 = arith.constant 0 : index
    %c0_9 = arith.constant 0 : index
    %19 = vector.load %arg4[%c0_8, %c0_9] : memref<32x48xf32, #tpu.memory_space<vmem>>, vector<32x48xf32>
    tpu.vector_store %arg4[%c0_8, %c0_9], %18 {strides = array<i32>} : memref<32x48xf32, #tpu.memory_space<vmem>>, vector<32x48xf32>,
    return
  }
  func.func @transform_0(%arg0: i32) -> (i32, i32) {
    %c0_i32 = arith.constant 0 : i32
    %c0_i32_0 = arith.constant 0 : i32
    %c0_i32_1 = arith.constant 0 : i32
    return %c0_i32, %c0_i32_0 : i32, i32
  }
  func.func @transform_1(%arg0: i32) -> (i32, i32) {
    %c0_i32 = arith.constant 0 : i32
    %c0_i32_0 = arith.constant 0 : i32
    %c0_i32_1 = arith.constant 0 : i32
    return %c0_i32, %c0_i32_0 : i32, i32
  }
  func.func @transform_2(%arg0: i32) -> (i32, i32) {
    %c0_i32 = arith.constant 0 : i32
    %c0_i32_0 = arith.constant 0 : i32
    %c0_i32_1 = arith.constant 0 : i32
    return %c0_i32, %c0_i32_0 : i32, i32
  }
  func.func @transform_3(%arg0: i32) -> (i32, i32) {
    %c0_i32 = arith.constant 0 : i32
    %c0_i32_0 = arith.constant 0 : i32
    %c0_i32_1 = arith.constant 0 : i32
    return %c0_i32, %c0_i32_0 : i32, i32
  }
}

</mosaic_0001>

<bundles_post_ra>
// kernel: tile.36
= control target key start
LH: loop header
LB: loop body
LE: loop exit
PB: predicated region body
PF: predicated region fallthrough
CT: control target
= control target key end

     0   :  { %s20_s0 = inlined_call_operand.<no memory space> [shape: f32[], index: 0, kind: input, shape index: {}]   ;;  %s21_s1 = inlined_call_operand.vmem [shape: f32[1,36], index: 1, kind: output, shape index: {}]  }
   0x1   :  { %v2_v0 = vstv %s20_s0 }
   0x2   :  { %3 = vst [vmem:[%s21_s1] sm:$0x1] %v2_v0 }

// kernel: tile.41
= control target key start
LH: loop header
LB: loop body
LE: loop exit
PB: predicated region body
PF: predicated region fallthrough
CT: control target
= control target key end

     0   :  { %s22_s0 = inlined_call_operand.vmem [shape: f32[8], index: 0, kind: input, shape index: {}]   ;;  %s23_s1 = inlined_call_operand.vmem [shape: f32[8,8], index: 1, kind: output, shape index: {}]  }
   0x1   :  { %v4_v0 = vld [vmem:[%s22_s0] ss:$0 sm:$0xff] }
   0x2   :  { %5 = vst [vmem:[%s23_s1] sm:$0xff] %v4_v0 }

// kernel: tile.42
= control target key start
LH: loop header
LB: loop body
LE: loop exit
PB: predicated region body
PF: predicated region fallthrough
CT: control target
= control target key end

     0   :  { %s67_s10 = smov 56   ;;  %s68_s11 = smov 40   ;;  %vm3_vm0 = vcmask 64512   ;;  %vm9_vm1 = vcmask 523712   ;;  %vm15_vm2 = vcmask 458112   ;;  %vm21_vm3 = vcmask 392512   ;;  %s111_s0 = inlined_call_operand.vmem [shape: f32[8,8], index: 0, kind: input, shape index: {}]   ;;  %s112_s1 = inlined_call_operand.vmem [shape: f32[1,64], index: 1, kind: output, shape index: {}]  }
   0x1   :  { %v53_v0 = vld [vmem:[%s111_s0 + $0x7] sm:$0x1]   ;;  %v55_v1 = vld [vmem:[%s111_s0 + $0x5] sm:$0x1]   ;;  %v57_v2 = vld [vmem:[%s111_s0 + $0x3] sm:$0x1]  }
   0x2   :  { %7 = vrot.lane.b32.xlu0 %v53_v0, %s67_s10  ;;  %19 = vrot.lane.b32.xlu1 %v55_v1, %s68_s11  ;;  %s69_s14 = smov 24   ;;  %v54_v3 = vld [vmem:[%s111_s0 + $0x6] sm:$0x1]   ;;  %v56_v4 = vld [vmem:[%s111_s0 + $0x4] sm:$0x1]   ;;  %s70_s21 = smov 48  }
   0x3   :  { %31 = vrot.lane.b32.xlu2 %v57_v2, %s69_s14  ;;  %v58_v5 = vld [vmem:[%s111_s0 + $0x2] sm:$0x1]   ;;  %s71_s22 = smov 32   ;;  %s72_s23 = smov 16   ;;  %v59_v6 = vld [vmem:[%s111_s0 + $0x1] sm:$0x1]  }
   0x4   :  { %s73_s26 = smov 8   ;;  %v2_v7 = vld [vmem:[%s111_s0] sm:$0x1]   ;;  %vm27_vm4 = vcmask 326912   ;;  %vm33_vm5 = vcmask 261312   ;;  %vm39_vm6 = vcmask 195712  }
   0x5   :  { %4 = vst.msk [vmem:[#allocation0] sm:$0x1] %vm3_vm0, %v2_v7   ;;  %vm45_vm7 = vcmask 130112  }
   0xa   :  { %13 = vrot.lane.b32.xlu0 %v54_v3, %s70_s21  ;;  %25 = vrot.lane.b32.xlu1 %v56_v4, %s71_s22 }
   0xb   :  { %37 = vrot.lane.b32.xlu2 %v58_v5, %s72_s23 }
  0x12   :  { %43 = vrot.lane.b32.xlu0 %v59_v6, %s73_s26 }
  0x5d   :  { %v32_v8 = vpop.permute.xlu2 %31  }
  0x65   :  { %v38_v9 = vpop.permute.xlu2 %37  }
  0x74   :  { %v8_v10 = vpop.permute.xlu0 %7   ;;  %v20_v11 = vpop.permute.xlu1 %19  }
  0x75   :  { %10 = vst.msk [vmem:[#allocation0] sm:$0x1] %vm9_vm1, %v8_v10  }
  0x7c   :  { %v14_v12 = vpop.permute.xlu0 %13   ;;  %v26_v13 = vpop.permute.xlu1 %25  }
  0x7d   :  { %16 = vst.msk [vmem:[#allocation0] sm:$0x1] %vm15_vm2, %v14_v12  }
  0x7e   :  { %22 = vst.msk [vmem:[#allocation0] sm:$0x1] %vm21_vm3, %v20_v11  }
  0x7f   :  { %28 = vst.msk [vmem:[#allocation0] sm:$0x1] %vm27_vm4, %v26_v13  }
  0x80   :  { %34 = vst.msk [vmem:[#allocation0] sm:$0x1] %vm33_vm5, %v32_v8  }
  0x81   :  { %40 = vst.msk [vmem:[#allocation0] sm:$0x1] %vm39_vm6, %v38_v9  }
  0x84   :  { %v44_v14 = vpop.permute.xlu0 %43  }
  0x85   :  { %46 = vst.msk [vmem:[#allocation0] sm:$0x1] %vm45_vm7, %v44_v14  }
  0x8c   :  { %v49_v15 = vld [vmem:[#allocation0] sm:$0x1] }
  0x8d   :  { %52 = vst [vmem:[%s112_s1] sm:$0x1] %v49_v15 }

// kernel: image_sampler_forward.6
= control target key start
LH: loop header
LB: loop body
LE: loop exit
PB: predicated region body
PF: predicated region fallthrough
CT: control target
= control target key end

     0   :  { %vm69_vm0 = vcmask 1041408   ;;  %vm62_vm1 = vcmask 293888   ;;  %v165_v31 = vlaneseq  ;;  %v458_v47 = vmov 0   ;;  %s619_s3 = inlined_call_operand.vmem [shape: bf16[3,36,96], index: 3, kind: input, shape index: {}]   ;;  %s620_s0 = inlined_call_operand.vmem [shape: f32[24,36], index: 0, kind: input, shape index: {}]   ;;  %s621_s1 = inlined_call_operand.vmem [shape: f32[1,36], index: 1, kind: input, shape index: {}]   ;;  %s622_s2 = inlined_call_operand.vmem [shape: f32[1,36], index: 2, kind: input, shape index: {}]   ;;  %s623_s4 = inlined_call_operand.vmem [shape: f32[96,128], index: 4, kind: input, shape index: {}]   ;;  %s624_s5 = inlined_call_operand.vmem [shape: f32[24,96], index: 5, kind: output, shape index: {0}]   ;;  %s625_s6 = inlined_call_operand.vmem [shape: f32[1,2,128], index: 6, kind: output, shape index: {1}]  }
   0x1   :  { %v46_v0 = vld [vmem:[%s619_s3 + $0x10] sm:$0x3]  ;;  %v427_v1 = vld [vmem:[%s619_s3 + $0x38] sm:$0x3]  ;;  %v422_v2 = vld [vmem:[%s619_s3 + $0x24] sm:$0x3] }
   0x2   :  { %v56_v3 = vunpack.c.l.b16 %v46_v0  ;;  %v112_v4 = vunpack.c.l.b16 %v427_v1  ;;  %v292_v5 = vunpack.c.l.b16 %v422_v2  ;;  %v23_v9 = vld [vmem:[%s620_s0] sm:$0xff]  ;;  %v24_v10 = vld [vmem:[%s620_s0 + $0x8] sm:$0xff]  ;;  %v454_v17 = vld [vmem:[%s619_s3 + $0x30] sm:$0xff]  ;;  %v536_v32 = vshrl.u32 %v165_v31, 7 }
   0x3   :  { %v456_v11 = vld [vmem:[%s621_s1] ss:$0 sm:$0xff]  ;;  %v450_v16 = vld [vmem:[%s619_s3 + $0x8] sm:$0xff]  ;;  %v451_v25 = vld [vmem:[%s619_s3 + $0x14] sm:$0xff]  ;;  %vm142_vm11 = vcmask 1040384   ;;  %vm155_vm15 = vcmask 1046528  }
   0x4   :  { %v59_v6 = vpack.c.b16 %v56_v3, %v56_v3  ;;  %v115_v7 = vpack.c.b16 %v112_v4, %v112_v4  ;;  %v295_v8 = vpack.c.b16 %v292_v5, %v292_v5  ;;  %v457_v15 = vld [vmem:[%s622_s2] ss:$0 sm:$0xff]  ;;  %v30_v18 = vmul.f32 %v456_v11, %v23_v9  ;;  %v453_v24 = vld [vmem:[%s619_s3 + $0x28] sm:$0xff]  ;;  %v25_v27 = vld [vmem:[%s620_s0 + $0x10] sm:$0xff] }
   0x5   :  { %v31_v19 = vmul.f32 %v456_v11, %v24_v10  ;;  %v452_v20 = vld [vmem:[%s619_s3 + $0x1c] sm:$0xff]  ;;  %v32_v28 = vmul.f32 %v456_v11, %v25_v27  ;;  %v172_v33 = vand.u32 65535, %v536_v32  ;;  %v173_v34 = vshrl.u32 %v536_v32, 16 }
   0x6   :  { %v71_v12 = vsel %vm69_vm0, %v59_v6, 0  ;;  %v119_v13 = vsel %vm69_vm0, %v115_v7, 0  ;;  %v299_v14 = vsel %vm69_vm0, %v295_v8, 0  ;;  %v37_v21 = vadd.f32 %v457_v15, %v30_v18  ;;  %v449_v23 = vld [vmem:[%s619_s3] sm:$0xff] }
   0x7   :  { %78 = vmatpush.bf16.msra.mxu0 %v71_v12  ;;  %126 = vmatpush.bf16.msra.mxu1 %v119_v13  ;;  %v38_v22 = vadd.f32 %v457_v15, %v31_v19  ;;  %v39_v29 = vadd.f32 %v457_v15, %v32_v28  ;;  %v176_v35 = vmul.u32 43690, %v172_v33  ;;  %v541_v36 = vadd.s32 8, %v536_v32 }
   0x8   :  { %306 = vmatpush.bf16.msra.mxu2 %v299_v14  ;;  %v177_v37 = vmul.u32 43691, %v173_v34  ;;  %v175_v38 = vmul.u32 43691, %v172_v33  ;;  %v545_v43 = vadd.s32 16, %v536_v32  ;;  %v178_v44 = vmul.u32 43690, %v173_v34  ;;  %v371_v34 = vld [vmem:[%s623_s4 + $0x38] sm:$0xff] }
   0x9   :  { %v40_v26 = vpack.c.bf16 %v38_v22, %v37_v21  ;;  %v41_v30 = vpack.c.bf16 %v39_v29, %v39_v29  ;;  %v179_v39 = vshll.u32 %v176_v35, 16  ;;  %v201_v40 = vand.u32 65535, %v541_v36  ;;  %v373_v29 = vld [vmem:[%s623_s4 + $0x48] sm:$0xff] }
   0xa   :  { %v181_v41 = vshll.u32 %v177_v37, 16  ;;  %v202_v45 = vshrl.u32 %v541_v36, 16  ;;  %v230_v49 = vand.u32 65535, %v545_v43  ;;  %v231_v55 = vshrl.u32 %v545_v43, 16 }
   0xb   :  { %79 = vmatpush.bf16.msra.mxu0 %v450_v16  ;;  %127 = vmatpush.bf16.msra.mxu1 %v454_v17  ;;  %vm183_vm2 = vc.u32 %v175_v38, %v179_v39  ;;  %v185_v42 = vadd.s32 %v179_v39, %v175_v38  ;;  %v205_v46 = vmul.u32 43690, %v201_v40  ;;  %v204_v51 = vmul.u32 43691, %v201_v40  ;;  %v370_v38 = vld [vmem:[%s623_s4 + $0x30] sm:$0xff]  ;;  %v369_v40 = vld [vmem:[%s623_s4 + $0x28] sm:$0xff] }
   0xc   :  { %307 = vmatpush.bf16.msra.mxu2 %v452_v20  ;;  %v184_v48 = vsel %vm183_vm2, 1, %v458_v47  ;;  %v206_v52 = vmul.u32 43691, %v202_v45  ;;  %v234_v56 = vmul.u32 43690, %v230_v49  ;;  %v180_v57 = vshrl.u32 %v176_v35, 16 }
   0xd   :  { %vm187_vm3 = vc.u32 %v185_v42, %v181_v41  ;;  %v186_v50 = vadd.s32 %v184_v48, %v178_v44  ;;  %v208_v53 = vshll.u32 %v205_v46, 16  ;;  %v233_v61 = vmul.u32 43691, %v230_v49 }
   0xe   :  { %v188_v54 = vsel %vm187_vm3, 1, %v458_v47  ;;  %v210_v59 = vshll.u32 %v206_v52, 16  ;;  %v235_v62 = vmul.u32 43691, %v231_v55  ;;  %v237_v63 = vshll.u32 %v234_v56, 16 }
   0xf   :  { %80 = vmatpush.bf16.msra.mxu0 %v449_v23  ;;  %128 = vmatpush.bf16.msra.mxu1 %v453_v24  ;;  %v190_v58 = vadd.s32 %v188_v54, %v186_v50  ;;  %vm212_vm4 = vc.u32 %v204_v51, %v208_v53  ;;  %v214_v60 = vadd.s32 %v208_v53, %v204_v51  ;;  %v207_v0 = vmul.u32 43690, %v202_v45  ;;  %v375_v24 = vld [vmem:[%s623_s4 + $0x58] sm:$0xff]  ;;  %v368_v45 = vld [vmem:[%s623_s4 + $0x20] sm:$0xff]  ;;  %v365_v54 = vld [vmem:[%s623_s4 + $0x8] sm:$0xff] }
  0x10   :  { %308 = vmatpush.bf16.msra.mxu2 %v451_v25  ;;  %v182_v1 = vshrl.u32 %v177_v37, 16  ;;  %v213_v3 = vsel %vm212_vm4, 1, %v458_v47  ;;  %v239_v4 = vshll.u32 %v235_v62, 16  ;;  %vm241_vm6 = vc.u32 %v233_v61, %v237_v63  ;;  %383 = vmatpush.msra.mxu3 %v375_v24 }
  0x11   :  { %v191_v2 = vadd.s32 %v190_v58, %v180_v57  ;;  %vm216_vm5 = vc.u32 %v214_v60, %v210_v59  ;;  %v243_v5 = vadd.s32 %v237_v63, %v233_v61  ;;  %v215_v6 = vadd.s32 %v213_v3, %v207_v0 }
  0x12   :  { %416 = vmatmul.msk.bf16.vlgmr.msra.gmra.mxu0 %vm62_vm1, %v40_v26  ;;  %436 = vmatmul.msk.bf16.vlgmr.msra.gmra.mxu1 %vm62_vm1, %v40_v26  ;;  %v236_v7 = vmul.u32 43690, %v231_v55  ;;  %v217_v8 = vsel %vm216_vm5, 1, %v458_v47  ;;  %v242_v9 = vsel %vm241_vm6, 1, %v458_v47  ;;  %v209_v11 = vshrl.u32 %v205_v46, 16  ;;  %v367_v46 = vld [vmem:[%s623_s4 + $0x18] sm:$0xff] }
  0x13   :  { %446 = vmatmul.msk.bf16.vlgmr.msra.gmra.mxu2 %vm62_vm1, %v40_v26  ;;  %v192_v10 = vadd.s32 %v191_v2, %v182_v1  ;;  %vm245_vm7 = vc.u32 %v243_v5, %v239_v4  ;;  %v219_v12 = vadd.s32 %v217_v8, %v215_v6  ;;  %v211_v16 = vshrl.u32 %v206_v52, 16  ;;  %v374_v26 = vld [vmem:[%s623_s4 + $0x50] sm:$0xff] }
  0x14   :  { %v244_v13 = vadd.s32 %v242_v9, %v236_v7  ;;  %v246_v14 = vsel %vm245_vm7, 1, %v458_v47  ;;  %v238_v18 = vshrl.u32 %v234_v56, 16  ;;  %v240_v22 = vshrl.u32 %v235_v62, 16  ;;  %384 = vmatpush.msra.mxu3 %v374_v26 }
  0x15   :  { %v193_v15 = vshrl.u32 %v192_v10, 3  ;;  %v220_v17 = vadd.s32 %v219_v12, %v209_v11  ;;  %vm334_vm4 = vcmask 785408  }
  0x16   :  { %v248_v19 = vadd.s32 %v246_v14, %v244_v13  ;;  %385 = vmatpush.msra.mxu3 %v373_v29 }
  0x17   :  { %v194_v20 = vmul.u32 12, %v193_v15  ;;  %v221_v21 = vadd.s32 %v220_v17, %v211_v16 }
  0x18   :  { %v249_v23 = vadd.s32 %v248_v19, %v238_v18 }
  0x19   :  { %v195_v25 = vsub.s32 %v536_v32, %v194_v20  ;;  %v222_v27 = vshrl.u32 %v221_v21, 3 }
  0x1a   :  { %v250_v28 = vadd.s32 %v249_v23, %v240_v22 }
  0x1b   :  { %vm256_vm8 = vcmp.ne.s32.totalorder %v195_v25, 0  ;;  %vm259_vm9 = vcmp.lt.s32.totalorder %v195_v25, 0  ;;  %v265_v31 = vadd.s32 12, %v195_v25  ;;  %v223_v32 = vmul.u32 12, %v222_v27 }
  0x1c   :  { %v251_v33 = vshrl.u32 %v250_v28, 3  ;;  %vm262_vm10 = vmand %vm259_vm9, %vm256_vm8 }
  0x1d   :  { %v268_v41 = vsel %vm262_vm10, %v265_v31, %v195_v25  ;;  %v224_v42 = vsub.s32 %v541_v36, %v223_v32  ;;  %v366_v36 = vld [vmem:[%s623_s4 + $0x10] sm:$0xff] }
  0x1e   :  { %v252_v44 = vmul.u32 12, %v251_v33  ;;  %vm271_vm12 = vcmp.ne.s32.totalorder %v268_v41, 0  ;;  %vm319_vm0 = vcmp.ne.s32.totalorder %v268_v41, 11 }
  0x1f   :  { %vm257_vm13 = vcmp.ne.s32.totalorder %v224_v42, 0  ;;  %vm260_vm14 = vcmp.lt.s32.totalorder %v224_v42, 0  ;;  %v266_v53 = vadd.s32 12, %v224_v42 }
  0x20   :  { %v253_v48 = vsub.s32 %v545_v43, %v252_v44  ;;  %v364_v43 = vld [vmem:[%s623_s4] sm:$0xff] }
  0x22   :  { %417 = vmatmul.msk.bf16.gmra.mxu0 %vm62_vm1, %v41_v30  ;;  %437 = vmatmul.msk.bf16.gmra.mxu1 %vm62_vm1, %v41_v30  ;;  %vm258_vm2 = vcmp.ne.s32.totalorder %v253_v48, 0  ;;  %vm261_vm3 = vcmp.lt.s32.totalorder %v253_v48, 0  ;;  %v267_v63 = vadd.s32 12, %v253_v48 }
  0x23   :  { %447 = vmatmul.msk.bf16.gmra.mxu2 %vm62_vm1, %v41_v30  ;;  %v372_v30 = vld [vmem:[%s623_s4 + $0x40] sm:$0xff]  ;;  %vm263_vm1 = vmand %vm260_vm14, %vm257_vm13 }
  0x24   :  { %386 = vmatpush.msra.mxu3 %v372_v30  ;;  %v269_v60 = vsel %vm263_vm1, %v266_v53, %v224_v42  ;;  %vm264_vm5 = vmand %vm261_vm3, %vm258_vm2 }
  0x25   :  { %vm272_vm6 = vcmp.ne.s32.totalorder %v269_v60, 0  ;;  %vm320_vm7 = vcmp.ne.s32.totalorder %v269_v60, 11  ;;  %v270_v6 = vsel %vm264_vm5, %v267_v63, %v253_v48 }
  0x26   :  { %387 = vmatpush.msra.mxu3 %v371_v34  ;;  %vm273_vm8 = vcmp.ne.s32.totalorder %v270_v6, 0  ;;  %vm321_vm9 = vcmp.ne.s32.totalorder %v270_v6, 11 }
  0x28   :  { %388 = vmatpush.msra.mxu3 %v370_v38 }
  0x2a   :  { %389 = vmatpush.msra.mxu3 %v369_v40 }
  0x2c   :  { %390 = vmatpush.msra.mxu3 %v368_v45 }
  0x2e   :  { %391 = vmatpush.msra.mxu3 %v367_v46 }
  0x30   :  { %392 = vmatpush.msra.mxu3 %v366_v36 }
  0x32   :  { %393 = vmatpush.msra.mxu3 %v365_v54 }
  0x34   :  { %394 = vmatpush.msra.mxu3 %v364_v43 }
  0x8f   :  { %v82_v35 = vpop.f32.mrf.mxu0  ;;  %v130_v37 = vpop.f32.mrf.mxu1 }
  0x90   :  { %v143_v39 = vrot.slane %v82_v35, 7  ;;  %v156_v55 = vrot.slane %v130_v37, 1 }
  0x92   :  { %v151_v47 = vsel %vm142_vm11, 0.0, %v143_v39 }
  0x93   :  { %v280_v50 = vsel %vm271_vm12, %v151_v47, 0.0 }
  0x96   :  { %v310_v49 = vpop.f32.mrf.mxu2 }
  0x97   :  { %v84_v51 = vpop.f32.mrf.mxu0  ;;  %v132_v52 = vpop.f32.mrf.mxu1  ;;  %v311_v57 = vadd.f32 %v310_v49, %v280_v50 }
  0x98   :  { %v157_v56 = vrot.slane %v132_v52, 1  ;;  %v144_v58 = vrot.slane %v84_v51, 7 }
  0x9a   :  { %v158_v59 = vsel %vm155_vm15, %v156_v55, %v157_v56  ;;  %v145_v0 = vsel %vm142_vm11, %v143_v39, %v144_v58 }
  0x9b   :  { %v328_v61 = vsel %vm319_vm0, %v158_v59, 0.0  ;;  %v281_v7 = vsel %vm272_vm6, %v145_v0, 0.0 }
  0x9c   :  { %v331_v62 = vadd.f32 %v328_v61, %v311_v57 }
  0x9e   :  { %v312_v1 = vpop.f32.mrf.mxu2  ;;  %335 = vst.msk [vmem:[%s624_s5] sm:$0xff] %vm334_vm4, %v331_v62  ;;  %v349_v17 = vmul.f32 %v331_v62, %v331_v62  ;;  %v338_v24 = vsel %vm334_vm4, %v331_v62, 0.0 }
  0x9f   :  { %v87_v2 = vpop.f32.mrf.mxu0  ;;  %v135_v3 = vpop.f32.mrf.mxu1  ;;  %v313_v8 = vadd.f32 %v312_v1, %v281_v7 }
  0xa0   :  { %v146_v4 = vrot.slane %v87_v2, 7  ;;  %v159_v5 = vrot.slane %v135_v3, 1  ;;  %v352_v29 = vsel %vm334_vm4, %v349_v17, 0.0 }
  0xa2   :  { %v160_v9 = vsel %vm155_vm15, %v157_v56, %v159_v5  ;;  %v147_v11 = vsel %vm142_vm11, %v144_v58, %v146_v4  ;;  %v164_v13 = vsel %vm155_vm15, %v159_v5, 0.0 }
  0xa3   :  { %v329_v10 = vsel %vm320_vm7, %v160_v9, 0.0  ;;  %v282_v15 = vsel %vm273_vm8, %v147_v11, 0.0  ;;  %v330_v22 = vsel %vm321_vm9, %v164_v13, 0.0 }
  0xa4   :  { %v332_v12 = vadd.f32 %v329_v10, %v313_v8 }
  0xa6   :  { %v350_v14 = vmul.f32 %v332_v12, %v332_v12  ;;  %v315_v16 = vpop.f32.mrf.mxu2  ;;  %336 = vst.msk [vmem:[%s624_s5 + $0x8] sm:$0xff] %vm334_vm4, %v332_v12  ;;  %v339_v19 = vsel %vm334_vm4, %v332_v12, 0.0 }
  0xa7   :  { %v316_v18 = vadd.f32 %v315_v16, %v282_v15  ;;  %v89_v20 = vpop.f32.mrf.mxu0  ;;  %v137_v21 = vpop.f32.mrf.mxu1  ;;  %v340_v26 = vadd.f32 %v339_v19, %v338_v24 }
  0xa8   :  { %v353_v25 = vsel %vm334_vm4, %v350_v14, 0.0 }
  0xa9   :  { %v333_v23 = vadd.f32 %v330_v22, %v316_v18  ;;  %v354_v31 = vadd.f32 %v353_v25, %v352_v29 }
  0xab   :  { %337 = vst.msk [vmem:[%s624_s5 + $0x10] sm:$0xff] %vm334_vm4, %v333_v23  ;;  %v341_v27 = vsel %vm334_vm4, %v333_v23, 0.0  ;;  %v351_v28 = vmul.f32 %v333_v23, %v333_v23 }
  0xac   :  { %v342_v30 = vadd.f32 %v341_v27, %v340_v26 }
  0xad   :  { %v355_v32 = vsel %vm334_vm4, %v351_v28, 0.0 }
  0xae   :  { %v343_v33 = vrot.slane %v342_v30, 4  ;;  %v356_v34 = vadd.f32 %v355_v32, %v354_v31  ;;  %v317_v35 = vpop.f32.mrf.mxu2 }
  0xb0   :  { %v344_v37 = vadd.f32 %v343_v33, %v342_v30  ;;  %v357_v38 = vrot.slane %v356_v34, 4 }
  0xb2   :  { %v345_v39 = vrot.slane %v344_v37, 2  ;;  %v358_v40 = vadd.f32 %v357_v38, %v356_v34 }
  0xb4   :  { %v346_v41 = vadd.f32 %v345_v39, %v344_v37  ;;  %v359_v42 = vrot.slane %v358_v40, 2 }
  0xb6   :  { %v347_v44 = vrot.slane %v346_v41, 1  ;;  %v360_v45 = vadd.f32 %v359_v42, %v358_v40 }
  0xb8   :  { %v361_v46 = vrot.slane %v360_v45, 1  ;;  %v348_v47 = vadd.f32 %v347_v44, %v346_v41 }
  0xba   :  { %v362_v48 = vadd.f32 %v361_v46, %v360_v45 }
  0xbc   :  { %v363_v36 = vsel %vm142_vm11, %v348_v47, %v362_v48 }
  0xbd   :  { %448 = vmatmul.msk.f32.vlgmr.msra.gmra.mxu3 %vm334_vm4, %v363_v36 }
 0x140   :  { %v396_v49 = vpop.f32.mrf.mxu3 }
 0x141   :  { %399 = vst [vmem:[%s625_s6] sm:$0x3] %v396_v49 }

// kernel: image_sampler_forward.7
= control target key start
LH: loop header
LB: loop body
LE: loop exit
PB: predicated region body
PF: predicated region fallthrough
CT: control target
= control target key end

     0   :  { %vm72_vm0 = vcmask 523264   ;;  %v164_v25 = vlaneseq  ;;  %vm148_vm1 = vcmask 1040384   ;;  %vm157_vm3 = vcmask 1046528   ;;  %s521_s3 = inlined_call_operand.vmem [shape: bf16[3,64,64], index: 3, kind: input, shape index: {}]   ;;  %s522_s0 = inlined_call_operand.vmem [shape: f32[16,64], index: 0, kind: input, shape index: {}]   ;;  %s523_s1 = inlined_call_operand.vmem [shape: f32[1,64], index: 1, kind: input, shape index: {}]   ;;  %s524_s2 = inlined_call_operand.vmem [shape: f32[1,64], index: 2, kind: input, shape index: {}]   ;;  %s525_s4 = inlined_call_operand.vmem [shape: f32[64,128], index: 4, kind: input, shape index: {}]   ;;  %s526_s5 = inlined_call_operand.vmem [shape: f32[16,64], index: 5, kind: output, shape index: {0}]   ;;  %s527_s6 = inlined_call_operand.vmem [shape: f32[1,2,128], index: 6, kind: output, shape index: {1}]  }
   0x1   :  { %v381_v0 = vld [vmem:[%s521_s3 + $0x18] sm:$0xff]  ;;  %v380_v3 = vld [vmem:[%s521_s3 + $0x10] sm:$0xff]  ;;  %v23_v6 = vld [vmem:[%s522_s0] sm:$0xff] }
   0x2   :  { %v389_v1 = vld [vmem:[%s521_s3 + $0x58] sm:$0xff]  ;;  %80 = vmatpush.bf16.msra.mxu0 %v381_v0  ;;  %v388_v4 = vld [vmem:[%s521_s3 + $0x50] sm:$0xff]  ;;  %v24_v7 = vld [vmem:[%s522_s0 + $0x8] sm:$0xff]  ;;  %v165_v29 = vshrl.u32 %v164_v25, 7 }
   0x3   :  { %v385_v2 = vld [vmem:[%s521_s3 + $0x38] sm:$0xff]  ;;  %136 = vmatpush.bf16.msra.mxu1 %v389_v1  ;;  %v384_v5 = vld [vmem:[%s521_s3 + $0x30] sm:$0xff]  ;;  %v390_v8 = vld [vmem:[%s523_s1] ss:$0 sm:$0xff] }
   0x4   :  { %227 = vmatpush.bf16.msra.mxu2 %v385_v2  ;;  %v391_v9 = vld [vmem:[%s524_s2] ss:$0 sm:$0xff]  ;;  %v379_v10 = vld [vmem:[%s521_s3 + $0x8] sm:$0xff]  ;;  %v29_v13 = vmul.f32 %v390_v8, %v23_v6  ;;  %v30_v14 = vmul.f32 %v390_v8, %v24_v7  ;;  %v277_v23 = vld [vmem:[%s525_s4 + $0x38] sm:$0xff]  ;;  %v171_v35 = vand.u32 7, %v165_v29  ;;  %v166_v37 = vadd.s32 8, %v165_v29 }
   0x5   :  { %v387_v11 = vld [vmem:[%s521_s3 + $0x48] sm:$0xff]  ;;  %v378_v17 = vld [vmem:[%s521_s3] sm:$0xff]  ;;  %289 = vmatpush.msra.mxu3 %v277_v23  ;;  %v276_v24 = vld [vmem:[%s525_s4 + $0x30] sm:$0xff] }
   0x6   :  { %81 = vmatpush.bf16.msra.mxu0 %v380_v3  ;;  %v383_v12 = vld [vmem:[%s521_s3 + $0x28] sm:$0xff]  ;;  %v35_v15 = vadd.f32 %v391_v9, %v29_v13  ;;  %v36_v16 = vadd.f32 %v391_v9, %v30_v14  ;;  %v386_v18 = vld [vmem:[%s521_s3 + $0x40] sm:$0xff]  ;;  %v273_v28 = vld [vmem:[%s525_s4 + $0x18] sm:$0xff]  ;;  %vm191_vm2 = vcmp.ne.s32.totalorder %v171_v35, 0  ;;  %v178_v43 = vand.u32 7, %v166_v37 }
   0x7   :  { %137 = vmatpush.bf16.msra.mxu1 %v388_v4  ;;  %v382_v19 = vld [vmem:[%s521_s3 + $0x20] sm:$0xff]  ;;  %290 = vmatpush.msra.mxu3 %v276_v24  ;;  %v275_v26 = vld [vmem:[%s525_s4 + $0x28] sm:$0xff]  ;;  %v272_v30 = vld [vmem:[%s525_s4 + $0x10] sm:$0xff]  ;;  %vm237_vm4 = vcmp.ne.s32.totalorder %v171_v35, 7 }
   0x8   :  { %228 = vmatpush.bf16.msra.mxu2 %v384_v5  ;;  %v37_v20 = vmax.f32 %v35_v15, 0.0  ;;  %v38_v21 = vmax.f32 %v36_v16, 0.0  ;;  %v274_v27 = vld [vmem:[%s525_s4 + $0x20] sm:$0xff]  ;;  %v271_v33 = vld [vmem:[%s525_s4 + $0x8] sm:$0xff]  ;;  %vm192_vm5 = vcmp.ne.s32.totalorder %v178_v43, 0  ;;  %vm238_vm6 = vcmp.ne.s32.totalorder %v178_v43, 7 }
   0x9   :  { %291 = vmatpush.msra.mxu3 %v275_v26  ;;  %v270_v36 = vld [vmem:[%s525_s4] sm:$0xff] }
   0xa   :  { %82 = vmatpush.bf16.msra.mxu0 %v379_v10  ;;  %v39_v22 = vpack.c.bf16 %v38_v21, %v37_v20 }
   0xb   :  { %138 = vmatpush.bf16.msra.mxu1 %v387_v11  ;;  %292 = vmatpush.msra.mxu3 %v274_v27 }
   0xc   :  { %229 = vmatpush.bf16.msra.mxu2 %v383_v12 }
   0xd   :  { %293 = vmatpush.msra.mxu3 %v273_v28 }
   0xe   :  { %83 = vmatpush.bf16.msra.mxu0 %v378_v17 }
   0xf   :  { %139 = vmatpush.bf16.msra.mxu1 %v386_v18  ;;  %294 = vmatpush.msra.mxu3 %v272_v30 }
  0x10   :  { %230 = vmatpush.bf16.msra.mxu2 %v382_v19 }
  0x11   :  { %326 = vmatmul.msk.bf16.vlgmr.msra.gmra.mxu0 %vm72_vm0, %v39_v22  ;;  %295 = vmatpush.msra.mxu3 %v271_v33 }
  0x12   :  { %359 = vmatmul.msk.bf16.vlgmr.msra.gmra.mxu1 %vm72_vm0, %v39_v22 }
  0x13   :  { %376 = vmatmul.msk.bf16.vlgmr.msra.gmra.mxu2 %vm72_vm0, %v39_v22  ;;  %296 = vmatpush.msra.mxu3 %v270_v36 }
  0x8e   :  { %v85_v31 = vpop.f32.mrf.mxu0 }
  0x8f   :  { %v141_v32 = vpop.f32.mrf.mxu1  ;;  %v149_v34 = vrot.slane %v85_v31, 7 }
  0x90   :  { %v158_v44 = vrot.slane %v141_v32, 1 }
  0x91   :  { %v154_v38 = vsel %vm148_vm1, 0.0, %v149_v34 }
  0x92   :  { %v197_v40 = vsel %vm191_vm2, %v154_v38, 0.0 }
  0x96   :  { %v232_v39 = vpop.f32.mrf.mxu2  ;;  %v87_v41 = vpop.f32.mrf.mxu0 }
  0x97   :  { %v143_v42 = vpop.f32.mrf.mxu1  ;;  %v150_v45 = vrot.slane %v87_v41, 7  ;;  %v233_v47 = vadd.f32 %v232_v39, %v197_v40 }
  0x98   :  { %v159_v46 = vrot.slane %v143_v42, 1 }
  0x99   :  { %v151_v50 = vsel %vm148_vm1, %v149_v34, %v150_v45 }
  0x9a   :  { %v160_v48 = vsel %vm157_vm3, %v158_v44, %v159_v46  ;;  %v163_v52 = vsel %vm157_vm3, %v159_v46, 0.0  ;;  %v198_v53 = vsel %vm192_vm5, %v151_v50, 0.0 }
  0x9b   :  { %v243_v49 = vsel %vm237_vm4, %v160_v48, 0.0  ;;  %v244_v56 = vsel %vm238_vm6, %v163_v52, 0.0 }
  0x9c   :  { %v245_v51 = vadd.f32 %v243_v49, %v233_v47 }
  0x9e   :  { %v234_v54 = vpop.f32.mrf.mxu2  ;;  %247 = vst.msk [vmem:[%s526_s5] sm:$0xff] %vm72_vm0, %v245_v51  ;;  %v258_v57 = vmul.f32 %v245_v51, %v245_v51  ;;  %v249_v59 = vsel %vm72_vm0, %v245_v51, 0.0 }
  0x9f   :  { %v235_v55 = vadd.f32 %v234_v54, %v198_v53 }
  0xa0   :  { %v260_v63 = vsel %vm72_vm0, %v258_v57, 0.0 }
  0xa1   :  { %v246_v58 = vadd.f32 %v244_v56, %v235_v55 }
  0xa3   :  { %248 = vst.msk [vmem:[%s526_s5 + $0x8] sm:$0xff] %vm72_vm0, %v246_v58  ;;  %v250_v60 = vsel %vm72_vm0, %v246_v58, 0.0  ;;  %v259_v61 = vmul.f32 %v246_v58, %v246_v58 }
  0xa4   :  { %v251_v62 = vadd.f32 %v250_v60, %v249_v59 }
  0xa5   :  { %v261_v0 = vsel %vm72_vm0, %v259_v61, 0.0 }
  0xa6   :  { %v252_v1 = vrot.slane %v251_v62, 4  ;;  %v262_v2 = vadd.f32 %v261_v0, %v260_v63 }
  0xa8   :  { %v253_v3 = vadd.f32 %v252_v1, %v251_v62  ;;  %v263_v4 = vrot.slane %v262_v2, 4 }
  0xaa   :  { %v254_v5 = vrot.slane %v253_v3, 2  ;;  %v264_v6 = vadd.f32 %v263_v4, %v262_v2 }
  0xac   :  { %v255_v7 = vadd.f32 %v254_v5, %v253_v3  ;;  %v265_v8 = vrot.slane %v264_v6, 2 }
  0xae   :  { %v256_v9 = vrot.slane %v255_v7, 1  ;;  %v266_v10 = vadd.f32 %v265_v8, %v264_v6 }
  0xb0   :  { %v267_v11 = vrot.slane %v266_v10, 1  ;;  %v257_v12 = vadd.f32 %v256_v9, %v255_v7 }
  0xb2   :  { %v268_v13 = vadd.f32 %v267_v11, %v266_v10 }
  0xb4   :  { %v269_v14 = vsel %vm148_vm1, %v257_v12, %v268_v13 }
  0xb5   :  { %377 = vmatmul.msk.f32.vlgmr.msra.gmra.mxu3 %vm72_vm0, %v269_v14 }
 0x138   :  { %v298_v15 = vpop.f32.mrf.mxu3 }
 0x139   :  { %301 = vst [vmem:[%s527_s6] sm:$0x3] %v298_v15 }

// kernel: tile.34
= control target key start
LH: loop header
LB: loop body
LE: loop exit
PB: predicated region body
PF: predicated region fallthrough
CT: control target
= control target key end

     0   :  { %s20_s0 = inlined_call_operand.<no memory space> [shape: f32[], index: 0, kind: input, shape index: {}]   ;;  %s21_s1 = inlined_call_operand.vmem [shape: f32[1,96], index: 1, kind: output, shape index: {}]  }
   0x1   :  { %v2_v0 = vstv %s20_s0 }
   0x2   :  { %3 = vst [vmem:[%s21_s1] sm:$0x1] %v2_v0 }

// kernel: image_sampler_forward.8
= control target key start
LH: loop header
LB: loop body
LE: loop exit
PB: predicated region body
PF: predicated region fallthrough
CT: control target
= control target key end

     0   :  { %vm37_vm0 = vcmask 1041408   ;;  %vm39_vm1 = vcmask 1045508   ;;  %vm41_vm2 = vcmask 1043456   ;;  %vm408_vm3 = vcmask 64512   ;;  %s830_s3 = inlined_call_operand.vmem [shape: bf16[512,8], index: 3, kind: input, shape index: {}]   ;;  %s831_s1 = inlined_call_operand.vmem [shape: f32[1,512], index: 1, kind: input, shape index: {}]   ;;  %s832_s2 = inlined_call_operand.vmem [shape: f32[1,512], index: 2, kind: input, shape index: {}]   ;;  %s833_s4 = inlined_call_operand.vmem [shape: f32[1,8], index: 4, kind: input, shape index: {}]   ;;  %s834_s0 = inlined_call_operand.vmem [shape: f32[2,512], index: 0, kind: input, shape index: {}]   ;;  %s835_s5 = inlined_call_operand.vmem [shape: bf16[8,512], index: 5, kind: input, shape index: {}]   ;;  %s836_s6 = inlined_call_operand.vmem [shape: f32[1,512], index: 6, kind: input, shape index: {}]   ;;  %s837_s7 = inlined_call_operand.vmem [shape: f32[2,512], index: 7, kind: output, shape index: {}]  }
   0x1   :  { %v631_v0 = vld [vmem:[%s830_s3 + $0x38] sm:$0xff]  ;;  %v630_v4 = vld [vmem:[%s830_s3 + $0x30] sm:$0xff]  ;;  %v629_v8 = vld [vmem:[%s830_s3 + $0x28] sm:$0xff] }
   0x2   :  { %v639_v1 = vld [vmem:[%s830_s3 + $0x78] sm:$0xff]  ;;  %333 = vmatpush.bf16.msra.mxu0 %v631_v0  ;;  %v638_v5 = vld [vmem:[%s830_s3 + $0x70] sm:$0xff]  ;;  %v637_v9 = vld [vmem:[%s830_s3 + $0x68] sm:$0xff] }
   0x3   :  { %v647_v2 = vld [vmem:[%s830_s3 + $0xb8] sm:$0xff]  ;;  %346 = vmatpush.bf16.msra.mxu1 %v639_v1  ;;  %v646_v6 = vld [vmem:[%s830_s3 + $0xb0] sm:$0xff]  ;;  %v645_v10 = vld [vmem:[%s830_s3 + $0xa8] sm:$0xff] }
   0x4   :  { %v655_v3 = vld [vmem:[%s830_s3 + $0xf8] sm:$0xff]  ;;  %359 = vmatpush.bf16.msra.mxu2 %v647_v2  ;;  %v654_v7 = vld [vmem:[%s830_s3 + $0xf0] sm:$0xff]  ;;  %v653_v11 = vld [vmem:[%s830_s3 + $0xe8] sm:$0xff] }
   0x5   :  { %372 = vmatpush.bf16.msra.mxu3 %v655_v3  ;;  %v628_v12 = vld [vmem:[%s830_s3 + $0x20] sm:$0xff]  ;;  %v627_v26 = vld [vmem:[%s830_s3 + $0x18] sm:$0xff]  ;;  %v387_v42 = vld [vmem:[%s835_s5 + $0x8] sm:$0xff] }
   0x6   :  { %334 = vmatpush.bf16.msra.mxu0 %v630_v4  ;;  %v636_v13 = vld [vmem:[%s830_s3 + $0x60] sm:$0xff]  ;;  %v635_v27 = vld [vmem:[%s830_s3 + $0x58] sm:$0xff]  ;;  %v626_v43 = vld [vmem:[%s830_s3 + $0x10] sm:$0xff]  ;;  %v402_v50 = vunpack.c.l.b16 %v387_v42  ;;  %v403_v51 = vunpack.c.h.b16 %v387_v42 }
   0x7   :  { %347 = vmatpush.bf16.msra.mxu1 %v638_v5  ;;  %v644_v14 = vld [vmem:[%s830_s3 + $0xa0] sm:$0xff]  ;;  %v643_v31 = vld [vmem:[%s830_s3 + $0x98] sm:$0xff]  ;;  %v634_v44 = vld [vmem:[%s830_s3 + $0x50] sm:$0xff] }
   0x8   :  { %360 = vmatpush.bf16.msra.mxu2 %v646_v6  ;;  %v652_v15 = vld [vmem:[%s830_s3 + $0xe0] sm:$0xff]  ;;  %v651_v32 = vld [vmem:[%s830_s3 + $0xd8] sm:$0xff]  ;;  %v642_v47 = vld [vmem:[%s830_s3 + $0x90] sm:$0xff]  ;;  %v406_v56 = vpack.c.b16 %v402_v50, %v402_v50  ;;  %v407_v57 = vpack.c.b16 %v403_v51, %v403_v51 }
   0x9   :  { %373 = vmatpush.bf16.msra.mxu3 %v654_v7  ;;  %v28_v16 = vld [vmem:[%s831_s1] sm:$0xf]  ;;  %v650_v48 = vld [vmem:[%s830_s3 + $0xd0] sm:$0xff]  ;;  %v625_v52 = vld [vmem:[%s830_s3 + $0x8] sm:$0xff] }
   0xa   :  { %335 = vmatpush.bf16.msra.mxu0 %v629_v8  ;;  %v45_v17 = vld [vmem:[%s832_s2] sm:$0xf]  ;;  %v30_v18 = vperm.slane %v28_v16, 0  ;;  %v31_v19 = vperm.slane %v28_v16, 1  ;;  %v32_v20 = vperm.slane %v28_v16, 2  ;;  %v33_v21 = vperm.slane %v28_v16, 3 }
   0xb   :  { %348 = vmatpush.bf16.msra.mxu1 %v637_v9  ;;  %v47_v22 = vperm.slane %v45_v17, 0  ;;  %v48_v23 = vperm.slane %v45_v17, 1  ;;  %v49_v24 = vperm.slane %v45_v17, 2  ;;  %v50_v25 = vperm.slane %v45_v17, 3  ;;  %v27_v33 = vld [vmem:[%s834_s0] sm:$0xff]  ;;  %v633_v53 = vld [vmem:[%s830_s3 + $0x48] sm:$0xff] }
   0xc   :  { %361 = vmatpush.bf16.msra.mxu2 %v645_v10  ;;  %v34_v28 = vrot.slane %v31_v19, 6  ;;  %v35_v29 = vrot.slane %v32_v20, 4  ;;  %v36_v30 = vrot.slane %v33_v21, 2  ;;  %v641_v54 = vld [vmem:[%s830_s3 + $0x88] sm:$0xff]  ;;  %v624_v58 = vld [vmem:[%s830_s3] sm:$0xff]  ;;  %v419_v62 = vsel %vm41_vm2, %v406_v56, 0 }
   0xd   :  { %374 = vmatpush.bf16.msra.mxu3 %v653_v11  ;;  %v51_v34 = vrot.slane %v48_v23, 6  ;;  %v52_v35 = vrot.slane %v49_v24, 4  ;;  %v53_v36 = vrot.slane %v50_v25, 2  ;;  %v649_v55 = vld [vmem:[%s830_s3 + $0xc8] sm:$0xff]  ;;  %v632_v59 = vld [vmem:[%s830_s3 + $0x40] sm:$0xff]  ;;  %v422_v63 = vsel %vm41_vm2, %v407_v57, 0 }
   0xe   :  { %336 = vmatpush.bf16.msra.mxu0 %v628_v12  ;;  %v38_v37 = vsel %vm37_vm0, %v30_v18, %v34_v28  ;;  %v40_v38 = vsel %vm39_vm1, %v35_v29, %v36_v30  ;;  %v640_v60 = vld [vmem:[%s830_s3 + $0x80] sm:$0xff] }
   0xf   :  { %349 = vmatpush.bf16.msra.mxu1 %v636_v13  ;;  %v42_v39 = vsel %vm41_vm2, %v38_v37, %v40_v38  ;;  %v54_v40 = vsel %vm37_vm0, %v47_v22, %v51_v34  ;;  %v55_v41 = vsel %vm39_vm1, %v52_v35, %v53_v36  ;;  %v648_v61 = vld [vmem:[%s830_s3 + $0xc0] sm:$0xff] }
  0x10   :  { %362 = vmatpush.bf16.msra.mxu2 %v644_v14  ;;  %v44_v45 = vmul.f32 %v42_v39, %v27_v33  ;;  %v56_v46 = vsel %vm41_vm2, %v54_v40, %v55_v41  ;;  %v386_v8 = vld [vmem:[%s835_s5] sm:$0xff] }
  0x11   :  { %375 = vmatpush.bf16.msra.mxu3 %v652_v15  ;;  %v400_v9 = vunpack.c.l.b16 %v386_v8  ;;  %v401_v10 = vunpack.c.h.b16 %v386_v8  ;;  %v656_v15 = vld [vmem:[%s833_s4] ss:$0 sm:$0xff] }
  0x12   :  { %337 = vmatpush.bf16.msra.mxu0 %v627_v26  ;;  %v58_v49 = vadd.f32 %v56_v46, %v44_v45  ;;  %v388_v29 = vld [vmem:[%s836_s6] sm:$0xf] }
  0x13   :  { %350 = vmatpush.bf16.msra.mxu1 %v635_v27  ;;  %v404_v11 = vpack.c.b16 %v400_v9, %v400_v9  ;;  %v405_v12 = vpack.c.b16 %v401_v10, %v401_v10  ;;  %v392_v34 = vperm.slane %v388_v29, 2  ;;  %v393_v35 = vperm.slane %v388_v29, 3 }
  0x14   :  { %363 = vmatpush.bf16.msra.mxu2 %v643_v31  ;;  %60 = vst [vmem:[#allocation1] ss:$4 sm:$0xff] %v58_v49  ;;  %v391_v31 = vperm.slane %v388_v29, 1  ;;  %v390_v36 = vperm.slane %v388_v29, 0 }
  0x15   :  { %376 = vmatpush.bf16.msra.mxu3 %v651_v32  ;;  %v413_v13 = vsel %vm41_vm2, %v404_v11, 0  ;;  %v416_v14 = vsel %vm41_vm2, %v405_v12, 0 }
  0x16   :  { %338 = vmatpush.bf16.msra.mxu0 %v626_v43 }
  0x17   :  { %351 = vmatpush.bf16.msra.mxu1 %v634_v44 }
  0x18   :  { %364 = vmatpush.bf16.msra.mxu2 %v642_v47 }
  0x19   :  { %377 = vmatpush.bf16.msra.mxu3 %v650_v48 }
  0x1a   :  { %339 = vmatpush.bf16.msra.mxu0 %v625_v52 }
  0x1b   :  { %352 = vmatpush.bf16.msra.mxu1 %v633_v53  ;;  %v61_v0 = vld.sshfl [vmem:[#allocation1] sm:$0xff pattern:$0x73625140]  ;;  %v62_v1 = vld.sshfl [vmem:[#allocation1 + $0x8] sm:$0xff pattern:$0x73625140] }
  0x1c   :  { %365 = vmatpush.bf16.msra.mxu2 %v641_v54  ;;  %v69_v2 = vpack.c.bf16 %v61_v0, %v61_v0  ;;  %v70_v3 = vpack.c.bf16 %v62_v1, %v62_v1  ;;  %v63_v4 = vld.sshfl [vmem:[#allocation1 + $0x10] sm:$0xff pattern:$0x73625140]  ;;  %v64_v5 = vld.sshfl [vmem:[#allocation1 + $0x18] sm:$0xff pattern:$0x73625140] }
  0x1d   :  { %378 = vmatpush.bf16.msra.mxu3 %v649_v55  ;;  %v71_v6 = vpack.c.bf16 %v63_v4, %v63_v4  ;;  %v72_v7 = vpack.c.bf16 %v64_v5, %v64_v5 }
  0x1e   :  { %340 = vmatpush.bf16.msra.mxu0 %v624_v58 }
  0x1f   :  { %353 = vmatpush.bf16.msra.mxu1 %v632_v59 }
  0x20   :  { %366 = vmatpush.bf16.msra.mxu2 %v640_v60 }
  0x21   :  { %379 = vmatpush.bf16.msra.mxu3 %v648_v61  ;;  %341 = vmatmul.bf16.vlgmr.msra.gmra.mxu0 %v69_v2 }
  0x22   :  { %354 = vmatmul.bf16.vlgmr.msra.gmra.mxu1 %v70_v3  ;;  %431 = vmatpush.bf16.msrb.mxu0 %v413_v13 }
  0x23   :  { %367 = vmatmul.bf16.vlgmr.msra.gmra.mxu2 %v71_v6  ;;  %444 = vmatpush.bf16.msrb.mxu1 %v416_v14 }
  0x24   :  { %457 = vmatpush.bf16.msrb.mxu2 %v419_v62  ;;  %380 = vmatmul.bf16.vlgmr.msra.gmra.mxu3 %v72_v7 }
  0x25   :  { %470 = vmatpush.bf16.msrb.mxu3 %v422_v63 }
  0x9e   :  { %v342_v16 = vpop.f32.mrf.mxu0 }
  0x9f   :  { %v355_v17 = vpop.f32.mrf.mxu1  ;;  %v343_v18 = vadd.f32 %v656_v15, %v342_v16 }
  0xa1   :  { %v356_v19 = vadd.f32 %v355_v17, %v343_v18 }
  0xa6   :  { %v368_v20 = vpop.f32.mrf.mxu2  ;;  %v344_v23 = vpop.f32.mrf.mxu0 }
  0xa7   :  { %v381_v21 = vpop.f32.mrf.mxu3  ;;  %v369_v22 = vadd.f32 %v368_v20, %v356_v19  ;;  %v357_v24 = vpop.f32.mrf.mxu1 }
  0xa9   :  { %v382_v25 = vadd.f32 %v381_v21, %v369_v22 }
  0xab   :  { %v385_v26 = vpack.c.bf16 %v382_v25, %v382_v25 }
  0xad   :  { %620 = vmatmul.msk.bf16.vlgmr.msrb.gmra.mxu0 %vm408_vm3, %v385_v26  ;;  %621 = vmatmul.msk.bf16.vlgmr.msrb.gmra.mxu1 %vm408_vm3, %v385_v26 }
  0xae   :  { %622 = vmatmul.msk.bf16.vlgmr.msrb.gmra.mxu2 %vm408_vm3, %v385_v26  ;;  %623 = vmatmul.msk.bf16.vlgmr.msrb.gmra.mxu3 %vm408_vm3, %v385_v26  ;;  %v370_v27 = vpop.f32.mrf.mxu2 }
  0xaf   :  { %v383_v28 = vpop.f32.mrf.mxu3 }
 0x12a   :  { %v433_v30 = vpop.f32.mrf.mxu0  ;;  %v446_v32 = vpop.f32.mrf.mxu1 }
 0x12b   :  { %v447_v33 = vadd.f32 %v446_v32, %v391_v31  ;;  %v434_v44 = vadd.f32 %v433_v30, %v390_v36 }
 0x12d   :  { %v480_v39 = vrot.slane %v447_v33, 6 }
 0x12f   :  { %v483_v47 = vsel %vm37_vm0, %v434_v44, %v480_v39 }
 0x131   :  { %v459_v37 = vpop.f32.mrf.mxu2  ;;  %v472_v38 = vpop.f32.mrf.mxu3 }
 0x132   :  { %v460_v40 = vadd.f32 %v459_v37, %v392_v34  ;;  %v473_v41 = vadd.f32 %v472_v38, %v393_v35  ;;  %v435_v42 = vpop.f32.mrf.mxu0  ;;  %v448_v43 = vpop.f32.mrf.mxu1 }
 0x134   :  { %v481_v45 = vrot.slane %v460_v40, 4  ;;  %v482_v46 = vrot.slane %v473_v41, 2 }
 0x136   :  { %v484_v48 = vsel %vm39_vm1, %v481_v45, %v482_v46 }
 0x137   :  { %v485_v49 = vsel %vm41_vm2, %v483_v47, %v484_v48 }
 0x138   :  { %487 = vst [vmem:[%s837_s7] sm:$0xff] %v485_v49 }
 0x139   :  { %v461_v50 = vpop.f32.mrf.mxu2  ;;  %v474_v51 = vpop.f32.mrf.mxu3 }

// kernel: tile.51
= control target key start
LH: loop header
LB: loop body
LE: loop exit
PB: predicated region body
PF: predicated region fallthrough
CT: control target
= control target key end

     0   :  { %s28_s0 = inlined_call_operand.vmem [shape: f32[8], index: 0, kind: input, shape index: {}]   ;;  %s29_s1 = inlined_call_operand.vmem [shape: f32[16,8], index: 1, kind: output, shape index: {}]  }
   0x1   :  { %v4_v0 = vld [vmem:[%s28_s0] ss:$0 sm:$0xff] }
   0x2   :  { %5 = vst [vmem:[%s29_s1] sm:$0xff] %v4_v0 }
   0x3   :  { %8 = vst [vmem:[%s29_s1 + $0x8] sm:$0xff] %v4_v0 }

// kernel: tile.52
= control target key start
LH: loop header
LB: loop body
LE: loop exit
PB: predicated region body
PF: predicated region fallthrough
CT: control target
= control target key end

     0   :  { %s131_s10 = smov 120   ;;  %s132_s11 = smov 104   ;;  %vm3_vm0 = vcmask 64512   ;;  %vm9_vm1 = vcmask 1048512   ;;  %vm15_vm2 = vcmask 982912   ;;  %vm21_vm3 = vcmask 917312   ;;  %s207_s0 = inlined_call_operand.vmem [shape: f32[16,8], index: 0, kind: input, shape index: {}]   ;;  %s208_s1 = inlined_call_operand.vmem [shape: f32[1,128], index: 1, kind: output, shape index: {}]  }
   0x1   :  { %v101_v0 = vld [vmem:[%s207_s0 + $0xf] sm:$0x1]   ;;  %v103_v1 = vld [vmem:[%s207_s0 + $0xd] sm:$0x1]   ;;  %v105_v2 = vld [vmem:[%s207_s0 + $0xb] sm:$0x1]  }
   0x2   :  { %7 = vrot.lane.b32.xlu0 %v101_v0, %s131_s10  ;;  %19 = vrot.lane.b32.xlu1 %v103_v1, %s132_s11  ;;  %s133_s14 = smov 88   ;;  %v102_v3 = vld [vmem:[%s207_s0 + $0xe] sm:$0x1]   ;;  %v104_v4 = vld [vmem:[%s207_s0 + $0xc] sm:$0x1]   ;;  %s134_s19 = smov 112  }
   0x3   :  { %31 = vrot.lane.b32.xlu2 %v105_v2, %s133_s14  ;;  %s135_s20 = smov 96   ;;  %v106_v5 = vld [vmem:[%s207_s0 + $0xa] sm:$0x1]   ;;  %s136_s23 = smov 80   ;;  %v107_v6 = vld [vmem:[%s207_s0 + $0x9] sm:$0x1]  }
   0x4   :  { %v108_v7 = vld [vmem:[%s207_s0 + $0x8] sm:$0x1]   ;;  %s137_s28 = smov 72   ;;  %s138_s29 = smov 64   ;;  %v109_v8 = vld [vmem:[%s207_s0 + $0x7] sm:$0x1]  }
   0x5   :  { %s139_s3 = smov 56   ;;  %v110_v9 = vld [vmem:[%s207_s0 + $0x6] sm:$0x1]   ;;  %v111_v10 = vld [vmem:[%s207_s0 + $0x5] sm:$0x1]   ;;  %s140_s8 = smov 48  }
   0x6   :  { %s141_s9 = smov 40   ;;  %v112_v11 = vld [vmem:[%s207_s0 + $0x4] sm:$0x1]   ;;  %s142_s12 = smov 32   ;;  %v113_v12 = vld [vmem:[%s207_s0 + $0x3] sm:$0x1]  }
   0x7   :  { %v114_v13 = vld [vmem:[%s207_s0 + $0x2] sm:$0x1]   ;;  %s143_s17 = smov 24   ;;  %s144_s18 = smov 16   ;;  %v115_v14 = vld [vmem:[%s207_s0 + $0x1] sm:$0x1]  }
   0x8   :  { %s145_s21 = smov 8   ;;  %v2_v15 = vld [vmem:[%s207_s0] sm:$0x1]   ;;  %vm27_vm4 = vcmask 851712   ;;  %vm33_vm5 = vcmask 786112   ;;  %vm39_vm6 = vcmask 720512  }
   0x9   :  { %4 = vst.msk [vmem:[#allocation0] sm:$0x1] %vm3_vm0, %v2_v15   ;;  %vm45_vm7 = vcmask 654912   ;;  %vm51_vm8 = vcmask 589312   ;;  %vm57_vm9 = vcmask 523712   ;;  %vm63_vm10 = vcmask 458112  }
   0xa   :  { %13 = vrot.lane.b32.xlu0 %v102_v3, %s134_s19  ;;  %25 = vrot.lane.b32.xlu1 %v104_v4, %s135_s20  ;;  %vm69_vm11 = vcmask 392512   ;;  %vm75_vm12 = vcmask 326912   ;;  %vm81_vm13 = vcmask 261312   ;;  %vm87_vm14 = vcmask 195712  }
   0xb   :  { %37 = vrot.lane.b32.xlu2 %v106_v5, %s136_s23  ;;  %vm93_vm15 = vcmask 130112  }
  0x12   :  { %43 = vrot.lane.b32.xlu0 %v107_v6, %s137_s28  ;;  %49 = vrot.lane.b32.xlu1 %v108_v7, %s138_s29 }
  0x13   :  { %55 = vrot.lane.b32.xlu2 %v109_v8, %s139_s3 }
  0x1a   :  { %61 = vrot.lane.b32.xlu0 %v110_v9, %s140_s8  ;;  %67 = vrot.lane.b32.xlu1 %v111_v10, %s141_s9 }
  0x1b   :  { %73 = vrot.lane.b32.xlu2 %v112_v11, %s142_s12 }
  0x22   :  { %79 = vrot.lane.b32.xlu0 %v113_v12, %s143_s17  ;;  %85 = vrot.lane.b32.xlu1 %v114_v13, %s144_s18 }
  0x23   :  { %91 = vrot.lane.b32.xlu2 %v115_v14, %s145_s21 }
  0x5d   :  { %v32_v16 = vpop.permute.xlu2 %31  }
  0x65   :  { %v38_v17 = vpop.permute.xlu2 %37  }
  0x6d   :  { %v56_v18 = vpop.permute.xlu2 %55  }
  0x74   :  { %v8_v19 = vpop.permute.xlu0 %7   ;;  %v20_v20 = vpop.permute.xlu1 %19  }
  0x75   :  { %10 = vst.msk [vmem:[#allocation0] sm:$0x1] %vm9_vm1, %v8_v19   ;;  %v74_v21 = vpop.permute.xlu2 %73  }
  0x7c   :  { %v14_v22 = vpop.permute.xlu0 %13   ;;  %v26_v23 = vpop.permute.xlu1 %25  }
  0x7d   :  { %16 = vst.msk [vmem:[#allocation0] sm:$0x1] %vm15_vm2, %v14_v22   ;;  %v92_v24 = vpop.permute.xlu2 %91  }
  0x7e   :  { %22 = vst.msk [vmem:[#allocation0] sm:$0x1] %vm21_vm3, %v20_v20  }
  0x7f   :  { %28 = vst.msk [vmem:[#allocation0] sm:$0x1] %vm27_vm4, %v26_v23  }
  0x80   :  { %34 = vst.msk [vmem:[#allocation0] sm:$0x1] %vm33_vm5, %v32_v16  }
  0x81   :  { %40 = vst.msk [vmem:[#allocation0] sm:$0x1] %vm39_vm6, %v38_v17  }
  0x84   :  { %v44_v25 = vpop.permute.xlu0 %43   ;;  %v50_v26 = vpop.permute.xlu1 %49  }
  0x85   :  { %46 = vst.msk [vmem:[#allocation0] sm:$0x1] %vm45_vm7, %v44_v25  }
  0x86   :  { %52 = vst.msk [vmem:[#allocation0] sm:$0x1] %vm51_vm8, %v50_v26  }
  0x87   :  { %58 = vst.msk [vmem:[#allocation0] sm:$0x1] %vm57_vm9, %v56_v18  }
  0x8c   :  { %v62_v27 = vpop.permute.xlu0 %61   ;;  %v68_v28 = vpop.permute.xlu1 %67  }
  0x8d   :  { %64 = vst.msk [vmem:[#allocation0] sm:$0x1] %vm63_vm10, %v62_v27  }
  0x8e   :  { %70 = vst.msk [vmem:[#allocation0] sm:$0x1] %vm69_vm11, %v68_v28  }
  0x8f   :  { %76 = vst.msk [vmem:[#allocation0] sm:$0x1] %vm75_vm12, %v74_v21  }
  0x94   :  { %v80_v29 = vpop.permute.xlu0 %79   ;;  %v86_v30 = vpop.permute.xlu1 %85  }
  0x95   :  { %82 = vst.msk [vmem:[#allocation0] sm:$0x1] %vm81_vm13, %v80_v29  }
  0x96   :  { %88 = vst.msk [vmem:[#allocation0] sm:$0x1] %vm87_vm14, %v86_v30  }
  0x97   :  { %94 = vst.msk [vmem:[#allocation0] sm:$0x1] %vm93_vm15, %v92_v24  }
  0x9e   :  { %v97_v31 = vld [vmem:[#allocation0] sm:$0x1] }
  0x9f   :  { %100 = vst [vmem:[%s208_s1] sm:$0x1] %v97_v31 }

// kernel: tile.61
= control target key start
LH: loop header
LB: loop body
LE: loop exit
PB: predicated region body
PF: predicated region fallthrough
CT: control target
= control target key end

     0   :  { %s28_s0 = inlined_call_operand.vmem [shape: f32[3], index: 0, kind: input, shape index: {}]   ;;  %s29_s1 = inlined_call_operand.vmem [shape: f32[16,3], index: 1, kind: output, shape index: {}]  }
   0x1   :  { %v4_v0 = vld [vmem:[%s28_s0] ss:$0 sm:$0xff] }
   0x2   :  { %5 = vst [vmem:[%s29_s1] sm:$0xff] %v4_v0 }
   0x3   :  { %8 = vst [vmem:[%s29_s1 + $0x8] sm:$0xff] %v4_v0 }

// kernel: tile.62
= control target key start
LH: loop header
LB: loop body
LE: loop exit
PB: predicated region body
PF: predicated region fallthrough
CT: control target
= control target key end

     0   :  { %s131_s10 = smov 45   ;;  %s132_s11 = smov 39   ;;  %vm3_vm0 = vcmask 23552   ;;  %vm9_vm1 = vcmask 392552   ;;  %vm15_vm2 = vcmask 367952   ;;  %vm21_vm3 = vcmask 343352   ;;  %s207_s0 = inlined_call_operand.vmem [shape: f32[16,3], index: 0, kind: input, shape index: {}]   ;;  %s208_s1 = inlined_call_operand.vmem [shape: f32[1,48], index: 1, kind: output, shape index: {}]  }
   0x1   :  { %v101_v0 = vld [vmem:[%s207_s0 + $0xf] sm:$0x1]   ;;  %v103_v1 = vld [vmem:[%s207_s0 + $0xd] sm:$0x1]   ;;  %v105_v2 = vld [vmem:[%s207_s0 + $0xb] sm:$0x1]  }
   0x2   :  { %7 = vrot.lane.b32.xlu0 %v101_v0, %s131_s10  ;;  %19 = vrot.lane.b32.xlu1 %v103_v1, %s132_s11  ;;  %s133_s14 = smov 33   ;;  %v102_v3 = vld [vmem:[%s207_s0 + $0xe] sm:$0x1]   ;;  %v104_v4 = vld [vmem:[%s207_s0 + $0xc] sm:$0x1]   ;;  %s134_s19 = smov 42  }
   0x3   :  { %31 = vrot.lane.b32.xlu2 %v105_v2, %s133_s14  ;;  %s135_s20 = smov 36   ;;  %v106_v5 = vld [vmem:[%s207_s0 + $0xa] sm:$0x1]   ;;  %s136_s23 = smov 30   ;;  %v107_v6 = vld [vmem:[%s207_s0 + $0x9] sm:$0x1]  }
   0x4   :  { %v108_v7 = vld [vmem:[%s207_s0 + $0x8] sm:$0x1]   ;;  %s137_s28 = smov 27   ;;  %s138_s29 = smov 24   ;;  %v109_v8 = vld [vmem:[%s207_s0 + $0x7] sm:$0x1]  }
   0x5   :  { %s139_s3 = smov 21   ;;  %v110_v9 = vld [vmem:[%s207_s0 + $0x6] sm:$0x1]   ;;  %v111_v10 = vld [vmem:[%s207_s0 + $0x5] sm:$0x1]   ;;  %s140_s8 = smov 18  }
   0x6   :  { %s141_s9 = smov 15   ;;  %v112_v11 = vld [vmem:[%s207_s0 + $0x4] sm:$0x1]   ;;  %s142_s12 = smov 12   ;;  %v113_v12 = vld [vmem:[%s207_s0 + $0x3] sm:$0x1]  }
   0x7   :  { %v114_v13 = vld [vmem:[%s207_s0 + $0x2] sm:$0x1]   ;;  %s143_s17 = smov 9   ;;  %s144_s18 = smov 6   ;;  %v115_v14 = vld [vmem:[%s207_s0 + $0x1] sm:$0x1]  }
   0x8   :  { %s145_s21 = smov 3   ;;  %v2_v15 = vld [vmem:[%s207_s0] sm:$0x1]   ;;  %vm27_vm4 = vcmask 318752   ;;  %vm33_vm5 = vcmask 294152   ;;  %vm39_vm6 = vcmask 269552  }
   0x9   :  { %4 = vst.msk [vmem:[#allocation0] sm:$0x1] %vm3_vm0, %v2_v15   ;;  %vm45_vm7 = vcmask 244952   ;;  %vm51_vm8 = vcmask 220352   ;;  %vm57_vm9 = vcmask 195752   ;;  %vm63_vm10 = vcmask 171152  }
   0xa   :  { %13 = vrot.lane.b32.xlu0 %v102_v3, %s134_s19  ;;  %25 = vrot.lane.b32.xlu1 %v104_v4, %s135_s20  ;;  %vm69_vm11 = vcmask 146552   ;;  %vm75_vm12 = vcmask 121952   ;;  %vm81_vm13 = vcmask 97352   ;;  %vm87_vm14 = vcmask 72752  }
   0xb   :  { %37 = vrot.lane.b32.xlu2 %v106_v5, %s136_s23  ;;  %vm93_vm15 = vcmask 48152  }
  0x12   :  { %43 = vrot.lane.b32.xlu0 %v107_v6, %s137_s28  ;;  %49 = vrot.lane.b32.xlu1 %v108_v7, %s138_s29 }
  0x13   :  { %55 = vrot.lane.b32.xlu2 %v109_v8, %s139_s3 }
  0x1a   :  { %61 = vrot.lane.b32.xlu0 %v110_v9, %s140_s8  ;;  %67 = vrot.lane.b32.xlu1 %v111_v10, %s141_s9 }
  0x1b   :  { %73 = vrot.lane.b32.xlu2 %v112_v11, %s142_s12 }
  0x22   :  { %79 = vrot.lane.b32.xlu0 %v113_v12, %s143_s17  ;;  %85 = vrot.lane.b32.xlu1 %v114_v13, %s144_s18 }
  0x23   :  { %91 = vrot.lane.b32.xlu2 %v115_v14, %s145_s21 }
  0x5d   :  { %v32_v16 = vpop.permute.xlu2 %31  }
  0x65   :  { %v38_v17 = vpop.permute.xlu2 %37  }
  0x6d   :  { %v56_v18 = vpop.permute.xlu2 %55  }
  0x74   :  { %v8_v19 = vpop.permute.xlu0 %7   ;;  %v20_v20 = vpop.permute.xlu1 %19  }
  0x75   :  { %10 = vst.msk [vmem:[#allocation0] sm:$0x1] %vm9_vm1, %v8_v19   ;;  %v74_v21 = vpop.permute.xlu2 %73  }
  0x7c   :  { %v14_v22 = vpop.permute.xlu0 %13   ;;  %v26_v23 = vpop.permute.xlu1 %25  }
  0x7d   :  { %16 = vst.msk [vmem:[#allocation0] sm:$0x1] %vm15_vm2, %v14_v22   ;;  %v92_v24 = vpop.permute.xlu2 %91  }
  0x7e   :  { %22 = vst.msk [vmem:[#allocation0] sm:$0x1] %vm21_vm3, %v20_v20  }
  0x7f   :  { %28 = vst.msk [vmem:[#allocation0] sm:$0x1] %vm27_vm4, %v26_v23  }
  0x80   :  { %34 = vst.msk [vmem:[#allocation0] sm:$0x1] %vm33_vm5, %v32_v16  }
  0x81   :  { %40 = vst.msk [vmem:[#allocation0] sm:$0x1] %vm39_vm6, %v38_v17  }
  0x84   :  { %v44_v25 = vpop.permute.xlu0 %43   ;;  %v50_v26 = vpop.permute.xlu1 %49  }
  0x85   :  { %46 = vst.msk [vmem:[#allocation0] sm:$0x1] %vm45_vm7, %v44_v25  }
  0x86   :  { %52 = vst.msk [vmem:[#allocation0] sm:$0x1] %vm51_vm8, %v50_v26  }
  0x87   :  { %58 = vst.msk [vmem:[#allocation0] sm:$0x1] %vm57_vm9, %v56_v18  }
  0x8c   :  { %v62_v27 = vpop.permute.xlu0 %61   ;;  %v68_v28 = vpop.permute.xlu1 %67  }
  0x8d   :  { %64 = vst.msk [vmem:[#allocation0] sm:$0x1] %vm63_vm10, %v62_v27  }
  0x8e   :  { %70 = vst.msk [vmem:[#allocation0] sm:$0x1] %vm69_vm11, %v68_v28  }
  0x8f   :  { %76 = vst.msk [vmem:[#allocation0] sm:$0x1] %vm75_vm12, %v74_v21  }
  0x94   :  { %v80_v29 = vpop.permute.xlu0 %79   ;;  %v86_v30 = vpop.permute.xlu1 %85  }
  0x95   :  { %82 = vst.msk [vmem:[#allocation0] sm:$0x1] %vm81_vm13, %v80_v29  }
  0x96   :  { %88 = vst.msk [vmem:[#allocation0] sm:$0x1] %vm87_vm14, %v86_v30  }
  0x97   :  { %94 = vst.msk [vmem:[#allocation0] sm:$0x1] %vm93_vm15, %v92_v24  }
  0x9e   :  { %v97_v31 = vld [vmem:[#allocation0] sm:$0x1] }
  0x9f   :  { %100 = vst [vmem:[%s208_s1] sm:$0x1] %v97_v31 }

// kernel: image_sampler_forward.9
= control target key start
LH: loop header
LB: loop body
LE: loop exit
PB: predicated region body
PF: predicated region fallthrough
CT: control target
= control target key end

     0   :  { %vm90_vm0 = vcmask 785408   ;;  %v221_v31 = vlaneseq  ;;  %v605_v47 = vmov 0   ;;  %vm198_vm10 = vcmask 1040384   ;;  %s799_s3 = inlined_call_operand.vmem [shape: bf16[3,96,96], index: 3, kind: input, shape index: {}]   ;;  %s800_s1 = inlined_call_operand.vmem [shape: f32[1,96], index: 1, kind: input, shape index: {}]   ;;  %s801_s2 = inlined_call_operand.vmem [shape: f32[1,96], index: 2, kind: input, shape index: {}]   ;;  %s802_s0 = inlined_call_operand.vmem [shape: f32[24,96], index: 0, kind: input, shape index: {}]   ;;  %s803_s4 = inlined_call_operand.vmem [shape: f32[96,128], index: 4, kind: input, shape index: {}]   ;;  %s804_s5 = inlined_call_operand.vmem [shape: f32[24,96], index: 5, kind: output, shape index: {0}]   ;;  %s805_s6 = inlined_call_operand.vmem [shape: f32[1,2,128], index: 6, kind: output, shape index: {1}]  }
   0x1   :  { %v589_v0 = vld [vmem:[%s799_s3 + $0x28] sm:$0xff]  ;;  %v595_v2 = vld [vmem:[%s799_s3 + $0x58] sm:$0xff]  ;;  %v588_v3 = vld [vmem:[%s799_s3 + $0x20] sm:$0xff]  ;;  %vm211_vm14 = vcmask 1046528  }
   0x2   :  { %v601_v1 = vld [vmem:[%s799_s3 + $0x88] sm:$0xff]  ;;  %99 = vmatpush.bf16.msra.mxu0 %v589_v0  ;;  %v600_v4 = vld [vmem:[%s799_s3 + $0x80] sm:$0xff]  ;;  %377 = vmatpush.bf16.msra.mxu2 %v595_v2  ;;  %v594_v5 = vld [vmem:[%s799_s3 + $0x50] sm:$0xff]  ;;  %v716_v32 = vshrl.u32 %v221_v31, 7 }
   0x3   :  { %179 = vmatpush.bf16.msra.mxu1 %v601_v1  ;;  %v587_v6 = vld [vmem:[%s799_s3 + $0x18] sm:$0xff]  ;;  %v593_v8 = vld [vmem:[%s799_s3 + $0x48] sm:$0xff]  ;;  %v586_v9 = vld [vmem:[%s799_s3 + $0x10] sm:$0xff] }
   0x4   :  { %v599_v7 = vld [vmem:[%s799_s3 + $0x78] sm:$0xff]  ;;  %v603_v10 = vld [vmem:[%s800_s1] ss:$0 sm:$0xff]  ;;  %v598_v11 = vld [vmem:[%s799_s3 + $0x70] sm:$0xff]  ;;  %v228_v33 = vand.u32 65535, %v716_v32  ;;  %v229_v34 = vshrl.u32 %v716_v32, 16 }
   0x5   :  { %v23_v12 = vld [vmem:[%s802_s0] sm:$0xff]  ;;  %v24_v13 = vld [vmem:[%s802_s0 + $0x8] sm:$0xff]  ;;  %v591_v20 = vld [vmem:[%s799_s3 + $0x38] sm:$0xff]  ;;  %v721_v36 = vadd.s32 8, %v716_v32  ;;  %v725_v43 = vadd.s32 16, %v716_v32 }
   0x6   :  { %100 = vmatpush.bf16.msra.mxu0 %v588_v3  ;;  %378 = vmatpush.bf16.msra.mxu2 %v594_v5  ;;  %v592_v14 = vld [vmem:[%s799_s3 + $0x40] sm:$0xff]  ;;  %v30_v15 = vmul.f32 %v603_v10, %v23_v12  ;;  %v31_v16 = vmul.f32 %v603_v10, %v24_v13  ;;  %v585_v18 = vld [vmem:[%s799_s3 + $0x8] sm:$0xff]  ;;  %v590_v25 = vld [vmem:[%s799_s3 + $0x30] sm:$0xff]  ;;  %v232_v35 = vmul.u32 43690, %v228_v33  ;;  %v233_v37 = vmul.u32 43691, %v229_v34 }
   0x7   :  { %180 = vmatpush.bf16.msra.mxu1 %v600_v4  ;;  %v604_v17 = vld [vmem:[%s801_s2] ss:$0 sm:$0xff]  ;;  %v597_v19 = vld [vmem:[%s799_s3 + $0x68] sm:$0xff]  ;;  %v25_v27 = vld [vmem:[%s802_s0 + $0x10] sm:$0xff]  ;;  %v231_v38 = vmul.u32 43691, %v228_v33  ;;  %v257_v40 = vand.u32 65535, %v721_v36 }
   0x8   :  { %v37_v21 = vadd.f32 %v604_v17, %v30_v15  ;;  %v38_v22 = vadd.f32 %v604_v17, %v31_v16  ;;  %v584_v23 = vld [vmem:[%s799_s3] sm:$0xff]  ;;  %v32_v28 = vmul.f32 %v603_v10, %v25_v27  ;;  %v235_v39 = vshll.u32 %v232_v35, 16 }
   0x9   :  { %v596_v24 = vld [vmem:[%s799_s3 + $0x60] sm:$0xff]  ;;  %v237_v41 = vshll.u32 %v233_v37, 16  ;;  %v234_v44 = vmul.u32 43690, %v229_v34  ;;  %v258_v45 = vshrl.u32 %v721_v36, 16  ;;  %v261_v46 = vmul.u32 43690, %v257_v40  ;;  %v444_v34 = vld [vmem:[%s803_s4 + $0x38] sm:$0xff] }
   0xa   :  { %101 = vmatpush.bf16.msra.mxu0 %v587_v6  ;;  %379 = vmatpush.bf16.msra.mxu2 %v593_v8  ;;  %v40_v26 = vpack.c.bf16 %v38_v22, %v37_v21  ;;  %v39_v29 = vadd.f32 %v604_v17, %v32_v28  ;;  %vm239_vm1 = vc.u32 %v231_v38, %v235_v39  ;;  %v286_v49 = vand.u32 65535, %v725_v43 }
   0xb   :  { %181 = vmatpush.bf16.msra.mxu1 %v599_v7  ;;  %v241_v42 = vadd.s32 %v235_v39, %v231_v38  ;;  %v240_v48 = vsel %vm239_vm1, 1, %v605_v47  ;;  %v260_v51 = vmul.u32 43691, %v257_v40  ;;  %v262_v52 = vmul.u32 43691, %v258_v45  ;;  %v443_v38 = vld [vmem:[%s803_s4 + $0x30] sm:$0xff]  ;;  %v442_v40 = vld [vmem:[%s803_s4 + $0x28] sm:$0xff] }
   0xc   :  { %v41_v30 = vpack.c.bf16 %v39_v29, %v39_v29  ;;  %v242_v50 = vadd.s32 %v240_v48, %v234_v44  ;;  %v264_v53 = vshll.u32 %v261_v46, 16  ;;  %v287_v55 = vshrl.u32 %v725_v43, 16  ;;  %v446_v29 = vld [vmem:[%s803_s4 + $0x48] sm:$0xff] }
   0xd   :  { %vm243_vm2 = vc.u32 %v241_v42, %v237_v41  ;;  %v290_v56 = vmul.u32 43690, %v286_v49  ;;  %v236_v57 = vshrl.u32 %v232_v35, 16  ;;  %v266_v59 = vshll.u32 %v262_v52, 16 }
   0xe   :  { %102 = vmatpush.bf16.msra.mxu0 %v586_v9  ;;  %380 = vmatpush.bf16.msra.mxu2 %v592_v14  ;;  %v244_v54 = vsel %vm243_vm2, 1, %v605_v47  ;;  %vm268_vm3 = vc.u32 %v260_v51, %v264_v53  ;;  %v270_v60 = vadd.s32 %v264_v53, %v260_v51  ;;  %v289_v61 = vmul.u32 43691, %v286_v49 }
   0xf   :  { %182 = vmatpush.bf16.msra.mxu1 %v598_v11  ;;  %v246_v58 = vadd.s32 %v244_v54, %v242_v50  ;;  %v291_v62 = vmul.u32 43691, %v287_v55  ;;  %v293_v63 = vshll.u32 %v290_v56, 16  ;;  %v263_v0 = vmul.u32 43690, %v258_v45  ;;  %v441_v45 = vld [vmem:[%s803_s4 + $0x20] sm:$0xff]  ;;  %v438_v54 = vld [vmem:[%s803_s4 + $0x8] sm:$0xff] }
  0x10   :  { %v238_v1 = vshrl.u32 %v233_v37, 16  ;;  %v269_v3 = vsel %vm268_vm3, 1, %v605_v47  ;;  %vm272_vm4 = vc.u32 %v270_v60, %v266_v59  ;;  %v292_v7 = vmul.u32 43690, %v287_v55 }
  0x11   :  { %v247_v2 = vadd.s32 %v246_v58, %v236_v57  ;;  %v295_v4 = vshll.u32 %v291_v62, 16  ;;  %vm297_vm5 = vc.u32 %v289_v61, %v293_v63  ;;  %v299_v5 = vadd.s32 %v293_v63, %v289_v61 }
  0x12   :  { %103 = vmatpush.bf16.msra.mxu0 %v585_v18  ;;  %381 = vmatpush.bf16.msra.mxu2 %v591_v20  ;;  %v271_v6 = vadd.s32 %v269_v3, %v263_v0  ;;  %v273_v8 = vsel %vm272_vm4, 1, %v605_v47  ;;  %v298_v9 = vsel %vm297_vm5, 1, %v605_v47  ;;  %v265_v11 = vshrl.u32 %v261_v46, 16  ;;  %v440_v46 = vld [vmem:[%s803_s4 + $0x18] sm:$0xff] }
  0x13   :  { %183 = vmatpush.bf16.msra.mxu1 %v597_v19  ;;  %v248_v10 = vadd.s32 %v247_v2, %v238_v1  ;;  %vm301_vm6 = vc.u32 %v299_v5, %v295_v4  ;;  %v300_v13 = vadd.s32 %v298_v9, %v292_v7  ;;  %v267_v16 = vshrl.u32 %v262_v52, 16 }
  0x14   :  { %v275_v12 = vadd.s32 %v273_v8, %v271_v6  ;;  %v302_v14 = vsel %vm301_vm6, 1, %v605_v47  ;;  %v294_v18 = vshrl.u32 %v290_v56, 16  ;;  %v296_v22 = vshrl.u32 %v291_v62, 16 }
  0x15   :  { %v249_v15 = vshrl.u32 %v248_v10, 3  ;;  %v304_v19 = vadd.s32 %v302_v14, %v300_v13 }
  0x16   :  { %104 = vmatpush.bf16.msra.mxu0 %v584_v23  ;;  %382 = vmatpush.bf16.msra.mxu2 %v590_v25  ;;  %v276_v17 = vadd.s32 %v275_v12, %v265_v11 }
  0x17   :  { %184 = vmatpush.bf16.msra.mxu1 %v596_v24  ;;  %v250_v20 = vmul.u32 12, %v249_v15  ;;  %v305_v23 = vadd.s32 %v304_v19, %v294_v18  ;;  %v448_v24 = vld [vmem:[%s803_s4 + $0x58] sm:$0xff] }
  0x18   :  { %v277_v21 = vadd.s32 %v276_v17, %v267_v16  ;;  %456 = vmatpush.msra.mxu3 %v448_v24 }
  0x19   :  { %505 = vmatmul.msk.bf16.vlgmr.msra.gmra.mxu0 %vm90_vm0, %v40_v26  ;;  %581 = vmatmul.msk.bf16.vlgmr.msra.gmra.mxu2 %vm90_vm0, %v40_v26  ;;  %v251_v25 = vsub.s32 %v716_v32, %v250_v20  ;;  %v306_v28 = vadd.s32 %v305_v23, %v296_v22 }
  0x1a   :  { %555 = vmatmul.msk.bf16.vlgmr.msra.gmra.mxu1 %vm90_vm0, %v40_v26  ;;  %v447_v26 = vld [vmem:[%s803_s4 + $0x50] sm:$0xff]  ;;  %v278_v27 = vshrl.u32 %v277_v21, 3 }
  0x1b   :  { %457 = vmatpush.msra.mxu3 %v447_v26  ;;  %vm312_vm7 = vcmp.ne.s32.totalorder %v251_v25, 0  ;;  %vm315_vm8 = vcmp.lt.s32.totalorder %v251_v25, 0  ;;  %v321_v31 = vadd.s32 12, %v251_v25  ;;  %v307_v33 = vshrl.u32 %v306_v28, 3 }
  0x1c   :  { %v279_v32 = vmul.u32 12, %v278_v27  ;;  %vm318_vm9 = vmand %vm315_vm8, %vm312_vm7 }
  0x1d   :  { %458 = vmatpush.msra.mxu3 %v446_v29  ;;  %v324_v41 = vsel %vm318_vm9, %v321_v31, %v251_v25  ;;  %v308_v44 = vmul.u32 12, %v307_v33 }
  0x1e   :  { %v280_v42 = vsub.s32 %v721_v36, %v279_v32  ;;  %vm327_vm11 = vcmp.ne.s32.totalorder %v324_v41, 0  ;;  %v439_v36 = vld [vmem:[%s803_s4 + $0x10] sm:$0xff]  ;;  %vm393_vm15 = vcmp.ne.s32.totalorder %v324_v41, 11 }
  0x1f   :  { %v309_v48 = vsub.s32 %v725_v43, %v308_v44  ;;  %v437_v43 = vld [vmem:[%s803_s4] sm:$0xff] }
  0x20   :  { %vm313_vm12 = vcmp.ne.s32.totalorder %v280_v42, 0  ;;  %vm316_vm13 = vcmp.lt.s32.totalorder %v280_v42, 0  ;;  %v322_v53 = vadd.s32 12, %v280_v42 }
  0x21   :  { %vm319_vm1 = vmand %vm316_vm13, %vm313_vm12  ;;  %vm314_vm2 = vcmp.ne.s32.totalorder %v309_v48, 0  ;;  %vm317_vm3 = vcmp.lt.s32.totalorder %v309_v48, 0  ;;  %v323_v63 = vadd.s32 12, %v309_v48 }
  0x22   :  { %v325_v60 = vsel %vm319_vm1, %v322_v53, %v280_v42  ;;  %vm320_vm4 = vmand %vm317_vm3, %vm314_vm2 }
  0x23   :  { %vm328_vm5 = vcmp.ne.s32.totalorder %v325_v60, 0  ;;  %vm394_vm6 = vcmp.ne.s32.totalorder %v325_v60, 11  ;;  %v326_v6 = vsel %vm320_vm4, %v323_v63, %v309_v48 }
  0x24   :  { %vm329_vm7 = vcmp.ne.s32.totalorder %v326_v6, 0  ;;  %vm395_vm8 = vcmp.ne.s32.totalorder %v326_v6, 11 }
  0x29   :  { %506 = vmatmul.msk.bf16.gmra.mxu0 %vm90_vm0, %v41_v30  ;;  %582 = vmatmul.msk.bf16.gmra.mxu2 %vm90_vm0, %v41_v30 }
  0x2a   :  { %556 = vmatmul.msk.bf16.gmra.mxu1 %vm90_vm0, %v41_v30  ;;  %v445_v30 = vld [vmem:[%s803_s4 + $0x40] sm:$0xff] }
  0x2b   :  { %459 = vmatpush.msra.mxu3 %v445_v30 }
  0x2d   :  { %460 = vmatpush.msra.mxu3 %v444_v34 }
  0x2f   :  { %461 = vmatpush.msra.mxu3 %v443_v38 }
  0x31   :  { %462 = vmatpush.msra.mxu3 %v442_v40 }
  0x33   :  { %463 = vmatpush.msra.mxu3 %v441_v45 }
  0x35   :  { %464 = vmatpush.msra.mxu3 %v440_v46 }
  0x37   :  { %465 = vmatpush.msra.mxu3 %v439_v36 }
  0x39   :  { %466 = vmatpush.msra.mxu3 %v438_v54 }
  0x3b   :  { %467 = vmatpush.msra.mxu3 %v437_v43 }
  0x96   :  { %v106_v35 = vpop.f32.mrf.mxu0 }
  0x97   :  { %v186_v37 = vpop.f32.mrf.mxu1  ;;  %v199_v39 = vrot.slane %v106_v35, 7 }
  0x98   :  { %v212_v55 = vrot.slane %v186_v37, 1 }
  0x99   :  { %v207_v47 = vsel %vm198_vm10, 0.0, %v199_v39 }
  0x9a   :  { %v336_v50 = vsel %vm327_vm11, %v207_v47, 0.0 }
  0x9c   :  { %v384_v49 = vpop.f32.mrf.mxu2 }
  0x9d   :  { %v385_v57 = vadd.f32 %v384_v49, %v336_v50 }
  0x9e   :  { %v108_v51 = vpop.f32.mrf.mxu0 }
  0x9f   :  { %v188_v52 = vpop.f32.mrf.mxu1  ;;  %v200_v58 = vrot.slane %v108_v51, 7 }
  0xa0   :  { %v213_v56 = vrot.slane %v188_v52, 1 }
  0xa1   :  { %v201_v0 = vsel %vm198_vm10, %v199_v39, %v200_v58 }
  0xa2   :  { %v214_v59 = vsel %vm211_vm14, %v212_v55, %v213_v56  ;;  %v337_v7 = vsel %vm328_vm5, %v201_v0, 0.0 }
  0xa3   :  { %v402_v61 = vsel %vm393_vm15, %v214_v59, 0.0 }
  0xa4   :  { %v405_v62 = vadd.f32 %v402_v61, %v385_v57  ;;  %v386_v1 = vpop.f32.mrf.mxu2 }
  0xa5   :  { %v387_v8 = vadd.f32 %v386_v1, %v337_v7 }
  0xa6   :  { %408 = vst.msk [vmem:[%s804_s5] sm:$0xff] %vm90_vm0, %v405_v62  ;;  %v111_v2 = vpop.f32.mrf.mxu0  ;;  %v422_v17 = vmul.f32 %v405_v62, %v405_v62  ;;  %v411_v24 = vsel %vm90_vm0, %v405_v62, 0.0 }
  0xa7   :  { %v191_v3 = vpop.f32.mrf.mxu1  ;;  %v202_v4 = vrot.slane %v111_v2, 7 }
  0xa8   :  { %v215_v5 = vrot.slane %v191_v3, 1  ;;  %v425_v29 = vsel %vm90_vm0, %v422_v17, 0.0 }
  0xa9   :  { %v203_v11 = vsel %vm198_vm10, %v200_v58, %v202_v4 }
  0xaa   :  { %v216_v9 = vsel %vm211_vm14, %v213_v56, %v215_v5  ;;  %v220_v13 = vsel %vm211_vm14, %v215_v5, 0.0  ;;  %v338_v15 = vsel %vm329_vm7, %v203_v11, 0.0 }
  0xab   :  { %v403_v10 = vsel %vm394_vm6, %v216_v9, 0.0  ;;  %v404_v22 = vsel %vm395_vm8, %v220_v13, 0.0 }
  0xac   :  { %v406_v12 = vadd.f32 %v403_v10, %v387_v8  ;;  %v389_v16 = vpop.f32.mrf.mxu2 }
  0xad   :  { %v390_v18 = vadd.f32 %v389_v16, %v338_v15 }
  0xae   :  { %v423_v14 = vmul.f32 %v406_v12, %v406_v12  ;;  %409 = vst.msk [vmem:[%s804_s5 + $0x8] sm:$0xff] %vm90_vm0, %v406_v12  ;;  %v412_v19 = vsel %vm90_vm0, %v406_v12, 0.0  ;;  %v113_v20 = vpop.f32.mrf.mxu0 }
  0xaf   :  { %v193_v21 = vpop.f32.mrf.mxu1  ;;  %v407_v23 = vadd.f32 %v404_v22, %v390_v18  ;;  %v413_v26 = vadd.f32 %v412_v19, %v411_v24 }
  0xb0   :  { %v426_v25 = vsel %vm90_vm0, %v423_v14, 0.0 }
  0xb1   :  { %410 = vst.msk [vmem:[%s804_s5 + $0x10] sm:$0xff] %vm90_vm0, %v407_v23  ;;  %v414_v27 = vsel %vm90_vm0, %v407_v23, 0.0  ;;  %v424_v28 = vmul.f32 %v407_v23, %v407_v23  ;;  %v427_v31 = vadd.f32 %v426_v25, %v425_v29 }
  0xb2   :  { %v415_v30 = vadd.f32 %v414_v27, %v413_v26 }
  0xb3   :  { %v428_v32 = vsel %vm90_vm0, %v424_v28, 0.0 }
  0xb4   :  { %v416_v33 = vrot.slane %v415_v30, 4  ;;  %v429_v34 = vadd.f32 %v428_v32, %v427_v31  ;;  %v391_v35 = vpop.f32.mrf.mxu2 }
  0xb6   :  { %v417_v37 = vadd.f32 %v416_v33, %v415_v30  ;;  %v430_v38 = vrot.slane %v429_v34, 4 }
  0xb8   :  { %v418_v39 = vrot.slane %v417_v37, 2  ;;  %v431_v40 = vadd.f32 %v430_v38, %v429_v34 }
  0xba   :  { %v419_v41 = vadd.f32 %v418_v39, %v417_v37  ;;  %v432_v42 = vrot.slane %v431_v40, 2 }
  0xbc   :  { %v420_v44 = vrot.slane %v419_v41, 1  ;;  %v433_v45 = vadd.f32 %v432_v42, %v431_v40 }
  0xbe   :  { %v434_v46 = vrot.slane %v433_v45, 1  ;;  %v421_v47 = vadd.f32 %v420_v44, %v419_v41 }
  0xc0   :  { %v435_v48 = vadd.f32 %v434_v46, %v433_v45 }
  0xc2   :  { %v436_v36 = vsel %vm198_vm10, %v421_v47, %v435_v48 }
  0xc3   :  { %583 = vmatmul.msk.f32.vlgmr.msra.gmra.mxu3 %vm90_vm0, %v436_v36 }
 0x146   :  { %v469_v49 = vpop.f32.mrf.mxu3 }
 0x147   :  { %472 = vst [vmem:[%s805_s6] sm:$0x3] %v469_v49 }

// kernel: image_sampler_forward.11
= control target key start
LH: loop header
LB: loop body
LE: loop exit
PB: predicated region body
PF: predicated region fallthrough
CT: control target
= control target key end

     0   :  { %vm126_vm5 = vcmask 392192   ;;  %s280_s0 = inlined_call_operand.vmem [shape: f32[32,48], index: 0, kind: input, shape index: {}]   ;;  %s281_s1 = inlined_call_operand.vmem [shape: f32[1,48], index: 1, kind: input, shape index: {}]   ;;  %s282_s2 = inlined_call_operand.vmem [shape: f32[1,48], index: 2, kind: input, shape index: {}]   ;;  %s283_s3 = inlined_call_operand.vmem [shape: f32[32,48], index: 3, kind: output, shape index: {}]  }
   0x1   :  { %v14_v0 = vld [vmem:[%s280_s0] sm:$0xff]  ;;  %v15_v3 = vld [vmem:[%s280_s0 + $0x8] sm:$0xff]  ;;  %v16_v6 = vld [vmem:[%s280_s0 + $0x10] sm:$0xff] }
   0x2   :  { %v135_v1 = vld [vmem:[%s281_s1] ss:$0 sm:$0xff]  ;;  %v17_v7 = vld [vmem:[%s280_s0 + $0x18] sm:$0xff] }
   0x3   :  { %v136_v2 = vld [vmem:[%s282_s2] ss:$0 sm:$0xff]  ;;  %v22_v4 = vmul.f32 %v135_v1, %v14_v0  ;;  %v23_v5 = vmul.f32 %v135_v1, %v15_v3  ;;  %v24_v8 = vmul.f32 %v135_v1, %v16_v6  ;;  %v25_v9 = vmul.f32 %v135_v1, %v17_v7 }
   0x5   :  { %v191_v10 = vadd.f32 %v136_v2, %v22_v4  ;;  %v193_v11 = vadd.f32 %v136_v2, %v23_v5  ;;  %v195_v12 = vadd.f32 %v136_v2, %v24_v8  ;;  %v197_v13 = vadd.f32 %v136_v2, %v25_v9 }
   0x7   :  { %v34_v14 = vand.u32 2147483647, %v191_v10  ;;  %v35_v15 = vand.u32 2147483647, %v193_v11  ;;  %v36_v16 = vand.u32 2147483647, %v195_v12 }
   0x8   :  { %v37_v17 = vand.u32 2147483647, %v197_v13  ;;  %vm114_vm1 = vcmp.ge.f32.partialorder %v191_v10, 0.0  ;;  %vm115_vm14 = vcmp.ge.f32.partialorder %v193_v11, 0.0 }
   0x9   :  { %v38_v18 = vsub.f32 0.0, %v34_v14  ;;  %v39_v19 = vsub.f32 0.0, %v35_v15  ;;  %v40_v20 = vsub.f32 0.0, %v36_v16 }
   0xa   :  { %v41_v21 = vsub.f32 0.0, %v37_v17 }
   0xb   :  { %v42_v22 = vmul.f32 1.442695, %v38_v18  ;;  %v44_v23 = vmul.f32 1.442695, %v39_v19  ;;  %v46_v24 = vmul.f32 1.442695, %v40_v20 }
   0xc   :  { %v48_v25 = vmul.f32 1.442695, %v41_v21 }
   0xd   :  { %137 = vpow2.f32 %v42_v22 }
   0xe   :  { %139 = vpow2.f32 %v44_v23 }
   0xf   :  { %141 = vpow2.f32 %v46_v24 }
  0x10   :  { %143 = vpow2.f32 %v48_v25 }
  0x13   :  { %v138_v26 = vpop.eup %137 }
  0x14   :  { %v203_v27 = vpop.eup %139  ;;  %v50_v28 = vadd.f32 1.0, %v138_v26 }
  0x15   :  { %v205_v29 = vpop.eup %141  ;;  %v51_v30 = vadd.f32 1.0, %v203_v27 }
  0x16   :  { %v208_v31 = vpop.eup %143  ;;  %145 = vrcp.f32 %v50_v28  ;;  %v52_v32 = vadd.f32 1.0, %v205_v29  ;;  %v63_v34 = vand.u32 2147483647, %v50_v28  ;;  %v65_v35 = vand.u32 2147483648, %v50_v28 }
  0x17   :  { %147 = vrcp.f32 %v51_v30  ;;  %v53_v33 = vadd.f32 1.0, %v208_v31  ;;  %v78_v37 = vand.u32 2147483647, %v51_v30  ;;  %v80_v38 = vand.u32 2147483648, %v51_v30 }
  0x18   :  { %149 = vrcp.f32 %v52_v32  ;;  %vm59_vm0 = vweird.f32 %v50_v28  ;;  %vm74_vm2 = vweird.f32 %v51_v30  ;;  %vm213_vm4 = vcmp.eq.f32.partialorder %v63_v34, 8.507059e+37 }
  0x19   :  { %151 = vrcp.f32 %v53_v33  ;;  %v66_v44 = vor.u32 1.1754944e-38, %v65_v35  ;;  %vm217_vm7 = vcmp.eq.f32.partialorder %v78_v37, 8.507059e+37  ;;  %v81_v48 = vor.u32 1.1754944e-38, %v80_v38 }
  0x1a   :  { %vm89_vm8 = vweird.f32 %v52_v32  ;;  %v93_v52 = vand.u32 2147483647, %v52_v32  ;;  %v95_v55 = vand.u32 2147483648, %v52_v32  ;;  %vm104_vm10 = vweird.f32 %v53_v33 }
  0x1b   :  { %v110_v60 = vand.u32 2147483648, %v53_v33  ;;  %v108_v63 = vand.u32 2147483647, %v53_v33 }
  0x1c   :  { %v146_v36 = vpop.eup %145  ;;  %vm234_vm15 = vcmp.eq.f32.partialorder %v93_v52, 8.507059e+37  ;;  %v96_v6 = vor.u32 1.1754944e-38, %v95_v55 }
  0x1d   :  { %v148_v39 = vpop.eup %147  ;;  %v55_v40 = vmul.f32 %v146_v36, %v50_v28  ;;  %vm60_vm3 = vweird.f32 %v146_v36  ;;  %v111_v15 = vor.u32 1.1754944e-38, %v110_v60 }
  0x1e   :  { %v70_v41 = vmul.f32 %v148_v39, %v51_v30  ;;  %v150_v45 = vpop.eup %149  ;;  %vm75_vm6 = vweird.f32 %v148_v39  ;;  %vm222_vm9 = vmor %vm59_vm0, %vm60_vm3  ;;  %vm109_vm3 = vcmp.eq.f32.partialorder %v108_v63, 8.507059e+37 }
  0x1f   :  { %v56_v42 = vsub.f32 1.0, %v55_v40  ;;  %v152_v49 = vpop.eup %151  ;;  %v85_v51 = vmul.f32 %v150_v45, %v52_v32  ;;  %vm227_vm11 = vmor %vm74_vm2, %vm75_vm6  ;;  %vm90_vm12 = vweird.f32 %v150_v45 }
  0x20   :  { %v71_v46 = vsub.f32 1.0, %v70_v41  ;;  %v100_v56 = vmul.f32 %v152_v49, %v53_v33  ;;  %vm105_vm13 = vweird.f32 %v152_v49  ;;  %vm243_vm0 = vmor %vm89_vm8, %vm90_vm12 }
  0x21   :  { %v57_v50 = vmul.f32 %v146_v36, %v56_v42  ;;  %v86_v59 = vsub.f32 1.0, %v85_v51  ;;  %vm106_vm2 = vmor %vm104_vm10, %vm105_vm13 }
  0x22   :  { %v72_v54 = vmul.f32 %v148_v39, %v71_v46  ;;  %v101_v62 = vsub.f32 1.0, %v100_v56 }
  0x23   :  { %v58_v57 = vadd.f32 %v146_v36, %v57_v50  ;;  %v87_v1 = vmul.f32 %v150_v45, %v86_v59 }
  0x24   :  { %v73_v61 = vadd.f32 %v148_v39, %v72_v54  ;;  %v102_v7 = vmul.f32 %v152_v49, %v101_v62 }
  0x25   :  { %v62_v0 = vsel %vm222_vm9, %v146_v36, %v58_v57  ;;  %v88_v14 = vadd.f32 %v150_v45, %v87_v1 }
  0x26   :  { %v67_v3 = vsel %vm213_vm4, %v66_v44, %v62_v0  ;;  %v77_v4 = vsel %vm227_vm11, %v148_v39, %v73_v61  ;;  %v103_v17 = vadd.f32 %v152_v49, %v102_v7  ;;  %vm116_vm4 = vcmp.ge.f32.partialorder %v195_v12, 0.0 }
  0x27   :  { %v118_v8 = vmul.f32 %v138_v26, %v67_v3  ;;  %v82_v9 = vsel %vm217_vm7, %v81_v48, %v77_v4  ;;  %v92_v19 = vsel %vm243_vm0, %v150_v45, %v88_v14 }
  0x28   :  { %v119_v16 = vmul.f32 %v203_v27, %v82_v9  ;;  %v97_v21 = vsel %vm234_vm15, %v96_v6, %v92_v19  ;;  %v107_v22 = vsel %vm106_vm2, %v152_v49, %v103_v17 }
  0x29   :  { %v122_v18 = vsel %vm114_vm1, %v67_v3, %v118_v8  ;;  %v120_v10 = vmul.f32 %v205_v29, %v97_v21  ;;  %v112_v23 = vsel %vm109_vm3, %v111_v15, %v107_v22  ;;  %vm117_vm1 = vcmp.ge.f32.partialorder %v197_v13, 0.0 }
  0x2a   :  { %127 = vst.msk [vmem:[%s283_s3] sm:$0xff] %vm126_vm5, %v122_v18  ;;  %v123_v20 = vsel %vm115_vm14, %v82_v9, %v119_v16  ;;  %v121_v24 = vmul.f32 %v208_v31, %v112_v23 }
  0x2b   :  { %128 = vst.msk [vmem:[%s283_s3 + $0x8] sm:$0xff] %vm126_vm5, %v123_v20  ;;  %v124_v11 = vsel %vm116_vm4, %v97_v21, %v120_v10 }
  0x2c   :  { %129 = vst.msk [vmem:[%s283_s3 + $0x10] sm:$0xff] %vm126_vm5, %v124_v11  ;;  %v125_v12 = vsel %vm117_vm1, %v112_v23, %v121_v24 }
  0x2d   :  { %130 = vst.msk [vmem:[%s283_s3 + $0x18] sm:$0xff] %vm126_vm5, %v125_v12 }

// kernel: image_sampler_forward.10
= control target key start
LH: loop header
LB: loop body
LE: loop exit
PB: predicated region body
PF: predicated region fallthrough
CT: control target
= control target key end

     0   :  { %v266_v44 = vlaneseq  ;;  %vm236_vm0 = vcmask 1040384   ;;  %vm253_vm2 = vcmask 1046528   ;;  %vm422_vm3 = vcmask 392192   ;;  %s839_s3 = inlined_call_operand.vmem [shape: bf16[3,128,48], index: 3, kind: input, shape index: {}]   ;;  %s840_s1 = inlined_call_operand.vmem [shape: f32[1,128], index: 1, kind: input, shape index: {}]   ;;  %s841_s2 = inlined_call_operand.vmem [shape: f32[1,128], index: 2, kind: input, shape index: {}]   ;;  %s842_s0 = inlined_call_operand.vmem [shape: f32[32,128], index: 0, kind: input, shape index: {}]   ;;  %s843_s4 = inlined_call_operand.vmem [shape: f32[48,128], index: 4, kind: input, shape index: {}]   ;;  %s844_s5 = inlined_call_operand.vmem [shape: f32[32,48], index: 5, kind: output, shape index: {0}]   ;;  %s845_s6 = inlined_call_operand.vmem [shape: f32[1,2,128], index: 6, kind: output, shape index: {1}]  }
   0x1   :  { %v648_v0 = vld [vmem:[%s839_s3 + $0xb8] sm:$0xff]  ;;  %v647_v3 = vld [vmem:[%s839_s3 + $0xb0] sm:$0xff]  ;;  %v646_v6 = vld [vmem:[%s839_s3 + $0xa8] sm:$0xff] }
   0x2   :  { %v640_v1 = vld [vmem:[%s839_s3 + $0x78] sm:$0xff]  ;;  %213 = vmatpush.bf16.msra.mxu1 %v648_v0  ;;  %v639_v4 = vld [vmem:[%s839_s3 + $0x70] sm:$0xff]  ;;  %v638_v7 = vld [vmem:[%s839_s3 + $0x68] sm:$0xff]  ;;  %v267_v45 = vshrl.u32 %v266_v44, 7 }
   0x3   :  { %v632_v2 = vld [vmem:[%s839_s3 + $0x38] sm:$0xff]  ;;  %383 = vmatpush.bf16.msra.mxu2 %v640_v1  ;;  %v631_v5 = vld [vmem:[%s839_s3 + $0x30] sm:$0xff]  ;;  %v630_v8 = vld [vmem:[%s839_s3 + $0x28] sm:$0xff] }
   0x4   :  { %112 = vmatpush.bf16.msra.mxu0 %v632_v2  ;;  %649 = vmatpush.bf16.msra.mxu3 %v632_v2  ;;  %v645_v9 = vld [vmem:[%s839_s3 + $0xa0] sm:$0xff]  ;;  %v644_v12 = vld [vmem:[%s839_s3 + $0x98] sm:$0xff]  ;;  %v23_v16 = vld [vmem:[%s842_s0 + $0x8] sm:$0xff]  ;;  %v275_v47 = vand.u32 15, %v267_v45  ;;  %v268_v59 = vadd.s32 8, %v267_v45 }
   0x5   :  { %v637_v10 = vld [vmem:[%s839_s3 + $0x60] sm:$0xff]  ;;  %v636_v14 = vld [vmem:[%s839_s3 + $0x58] sm:$0xff]  ;;  %v24_v18 = vld [vmem:[%s842_s0 + $0x10] sm:$0xff] }
   0x6   :  { %214 = vmatpush.bf16.msra.mxu1 %v647_v3  ;;  %v629_v11 = vld [vmem:[%s839_s3 + $0x20] sm:$0xff]  ;;  %v628_v17 = vld [vmem:[%s839_s3 + $0x18] sm:$0xff]  ;;  %v643_v23 = vld [vmem:[%s839_s3 + $0x90] sm:$0xff]  ;;  %vm319_vm1 = vcmp.ne.s32.totalorder %v275_v47, 0  ;;  %v282_v3 = vand.u32 15, %v268_v59 }
   0x7   :  { %384 = vmatpush.bf16.msra.mxu2 %v639_v4  ;;  %v657_v13 = vld [vmem:[%s840_s1] ss:$0 sm:$0xff]  ;;  %v25_v19 = vld [vmem:[%s842_s0 + $0x18] sm:$0xff]  ;;  %v635_v24 = vld [vmem:[%s839_s3 + $0x50] sm:$0xff] }
   0x8   :  { %113 = vmatpush.bf16.msra.mxu0 %v631_v5  ;;  %650 = vmatpush.bf16.msra.mxu3 %v631_v5  ;;  %v22_v15 = vld [vmem:[%s842_s0] sm:$0xff]  ;;  %v31_v21 = vmul.f32 %v657_v13, %v23_v16  ;;  %v32_v25 = vmul.f32 %v657_v13, %v24_v18  ;;  %v33_v26 = vmul.f32 %v657_v13, %v25_v19  ;;  %v627_v27 = vld [vmem:[%s839_s3 + $0x10] sm:$0xff]  ;;  %v642_v30 = vld [vmem:[%s839_s3 + $0x88] sm:$0xff]  ;;  %v269_v5 = vadd.s32 16, %v267_v45 }
   0x9   :  { %v30_v20 = vmul.f32 %v657_v13, %v22_v15  ;;  %v658_v22 = vld [vmem:[%s841_s2] ss:$0 sm:$0xff]  ;;  %v634_v31 = vld [vmem:[%s839_s3 + $0x48] sm:$0xff]  ;;  %v461_v61 = vld [vmem:[%s843_s4 + $0x18] sm:$0xff]  ;;  %vm403_vm4 = vcmp.ne.s32.totalorder %v282_v3, 15 }
   0xa   :  { %215 = vmatpush.bf16.msra.mxu1 %v646_v6  ;;  %v39_v29 = vadd.f32 %v658_v22, %v31_v21  ;;  %v40_v32 = vadd.f32 %v658_v22, %v32_v25  ;;  %v41_v33 = vadd.f32 %v658_v22, %v33_v26  ;;  %v626_v34 = vld [vmem:[%s839_s3 + $0x8] sm:$0xff]  ;;  %v641_v37 = vld [vmem:[%s839_s3 + $0x80] sm:$0xff]  ;;  %v460_v1 = vld [vmem:[%s843_s4 + $0x10] sm:$0xff] }
   0xb   :  { %385 = vmatpush.bf16.msra.mxu2 %v638_v7  ;;  %v38_v28 = vadd.f32 %v658_v22, %v30_v20  ;;  %v633_v38 = vld [vmem:[%s839_s3 + $0x40] sm:$0xff]  ;;  %v463_v54 = vld [vmem:[%s843_s4 + $0x28] sm:$0xff] }
   0xc   :  { %114 = vmatpush.bf16.msra.mxu0 %v630_v8  ;;  %651 = vmatpush.bf16.msra.mxu3 %v630_v8  ;;  %v43_v36 = vmax.f32 %v39_v29, 0.0  ;;  %v44_v39 = vmax.f32 %v40_v32, 0.0  ;;  %v45_v40 = vmax.f32 %v41_v33, 0.0  ;;  %v625_v41 = vld [vmem:[%s839_s3] sm:$0xff]  ;;  %v459_v6 = vld [vmem:[%s843_s4 + $0x8] sm:$0xff] }
   0xd   :  { %v42_v35 = vmax.f32 %v38_v28, 0.0  ;;  %v462_v55 = vld [vmem:[%s843_s4 + $0x20] sm:$0xff] }
   0xe   :  { %216 = vmatpush.bf16.msra.mxu1 %v645_v9  ;;  %v47_v43 = vpack.c.bf16 %v45_v40, %v44_v39  ;;  %v458_v9 = vld [vmem:[%s843_s4] sm:$0xff] }
   0xf   :  { %386 = vmatpush.bf16.msra.mxu2 %v637_v10  ;;  %v46_v42 = vpack.c.bf16 %v43_v36, %v42_v35 }
  0x10   :  { %115 = vmatpush.bf16.msra.mxu0 %v629_v11  ;;  %652 = vmatpush.bf16.msra.mxu3 %v629_v11 }
  0x12   :  { %217 = vmatpush.bf16.msra.mxu1 %v644_v12  ;;  %v289_v12 = vand.u32 15, %v269_v5 }
  0x13   :  { %387 = vmatpush.bf16.msra.mxu2 %v636_v14 }
  0x14   :  { %116 = vmatpush.bf16.msra.mxu0 %v628_v17  ;;  %653 = vmatpush.bf16.msra.mxu3 %v628_v17  ;;  %v270_v17 = vadd.s32 24, %v267_v45  ;;  %vm321_vm5 = vcmp.ne.s32.totalorder %v289_v12, 0 }
  0x16   :  { %218 = vmatpush.bf16.msra.mxu1 %v643_v23 }
  0x17   :  { %388 = vmatpush.bf16.msra.mxu2 %v635_v24  ;;  %v296_v24 = vand.u32 15, %v270_v17 }
  0x18   :  { %117 = vmatpush.bf16.msra.mxu0 %v627_v27  ;;  %654 = vmatpush.bf16.msra.mxu3 %v627_v27 }
  0x19   :  { %vm405_vm6 = vcmp.ne.s32.totalorder %v296_v24, 15 }
  0x1a   :  { %219 = vmatpush.bf16.msra.mxu1 %v642_v30 }
  0x1b   :  { %389 = vmatpush.bf16.msra.mxu2 %v634_v31 }
  0x1c   :  { %118 = vmatpush.bf16.msra.mxu0 %v626_v34  ;;  %655 = vmatpush.bf16.msra.mxu3 %v626_v34 }
  0x1e   :  { %220 = vmatpush.bf16.msra.mxu1 %v641_v37 }
  0x1f   :  { %390 = vmatpush.bf16.msra.mxu2 %v633_v38 }
  0x20   :  { %119 = vmatpush.bf16.msra.mxu0 %v625_v41  ;;  %656 = vmatpush.bf16.msra.mxu3 %v625_v41 }
  0x21   :  { %221 = vmatmul.bf16.vlgmr.msra.gmra.mxu1 %v46_v42 }
  0x22   :  { %391 = vmatmul.bf16.vlgmr.msra.gmra.mxu2 %v46_v42 }
  0x23   :  { %120 = vmatmul.bf16.vlgmr.msra.gmra.mxu0 %v46_v42  ;;  %125 = vmatmul.bf16.vlgmr.msra.gmra.mxu3 %v47_v43 }
  0x24   :  { %477 = vmatpush.msrb.mxu3 %v463_v54 }
  0x26   :  { %478 = vmatpush.msrb.mxu3 %v462_v55 }
  0x28   :  { %479 = vmatpush.msrb.mxu3 %v461_v61 }
  0x2a   :  { %480 = vmatpush.msrb.mxu3 %v460_v1 }
  0x2c   :  { %481 = vmatpush.msrb.mxu3 %v459_v6 }
  0x2e   :  { %482 = vmatpush.msrb.mxu3 %v458_v9 }
  0x31   :  { %226 = vmatmul.bf16.gmra.mxu1 %v47_v43 }
  0x32   :  { %396 = vmatmul.bf16.gmra.mxu2 %v47_v43 }
  0x9e   :  { %v222_v46 = vpop.f32.mrf.mxu1 }
  0x9f   :  { %v254_v56 = vrot.slane %v222_v46, 1 }
  0xa0   :  { %v121_v48 = vpop.f32.mrf.mxu0 }
  0xa1   :  { %v237_v49 = vrot.slane %v121_v48, 7 }
  0xa3   :  { %v248_v50 = vsel %vm236_vm0, 0.0, %v237_v49 }
  0xa4   :  { %v331_v52 = vsel %vm319_vm1, %v248_v50, 0.0 }
  0xa5   :  { %v392_v51 = vpop.f32.mrf.mxu2 }
  0xa6   :  { %v224_v53 = vpop.f32.mrf.mxu1  ;;  %v393_v60 = vadd.f32 %v392_v51, %v331_v52  ;;  %v126_v2 = vpop.f32.mrf.mxu3 }
  0xa7   :  { %v255_v57 = vrot.slane %v224_v53, 1  ;;  %v240_v11 = vrot.slane %v126_v2, 7 }
  0xa8   :  { %v123_v58 = vpop.f32.mrf.mxu0 }
  0xa9   :  { %v256_v62 = vsel %vm253_vm2, %v254_v56, %v255_v57  ;;  %v238_v0 = vrot.slane %v123_v58, 7 }
  0xaa   :  { %v418_v63 = vadd.f32 %v393_v60, %v256_v62 }
  0xab   :  { %v239_v7 = vsel %vm236_vm0, %v237_v49, %v238_v0  ;;  %v241_v18 = vsel %vm236_vm0, %v238_v0, %v240_v11 }
  0xac   :  { %423 = vst.msk [vmem:[%s844_s5] sm:$0xff] %vm422_vm3, %v418_v63  ;;  %v333_v22 = vsel %vm321_vm5, %v241_v18, 0.0  ;;  %v440_v30 = vmul.f32 %v418_v63, %v418_v63  ;;  %v427_v36 = vsel %vm422_vm3, %v418_v63, 0.0 }
  0xad   :  { %v394_v4 = vpop.f32.mrf.mxu2 }
  0xae   :  { %v227_v8 = vpop.f32.mrf.mxu1  ;;  %v395_v13 = vadd.f32 %v394_v4, %v239_v7  ;;  %v128_v20 = vpop.f32.mrf.mxu3  ;;  %v444_v42 = vsel %vm422_vm3, %v440_v30, 0.0 }
  0xaf   :  { %v257_v10 = vrot.slane %v227_v8, 1  ;;  %v242_v25 = vrot.slane %v128_v20, 7 }
  0xb1   :  { %v258_v14 = vsel %vm253_vm2, %v255_v57, %v257_v10  ;;  %v243_v34 = vsel %vm236_vm0, %v240_v11, %v242_v25 }
  0xb2   :  { %v415_v15 = vsel %vm403_vm4, %v258_v14, 0.0 }
  0xb3   :  { %v419_v16 = vadd.f32 %v415_v15, %v395_v13 }
  0xb5   :  { %v397_v19 = vpop.f32.mrf.mxu2  ;;  %424 = vst.msk [vmem:[%s844_s5 + $0x8] sm:$0xff] %vm422_vm3, %v419_v16  ;;  %v441_v27 = vmul.f32 %v419_v16, %v419_v16  ;;  %v428_v31 = vsel %vm422_vm3, %v419_v16, 0.0 }
  0xb6   :  { %v229_v21 = vpop.f32.mrf.mxu1  ;;  %v398_v26 = vadd.f32 %v397_v19, %v333_v22  ;;  %v429_v41 = vadd.f32 %v428_v31, %v427_v36 }
  0xb7   :  { %v259_v23 = vrot.slane %v229_v21, 1  ;;  %v445_v37 = vsel %vm422_vm3, %v441_v27, 0.0 }
  0xb8   :  { %v446_v46 = vadd.f32 %v445_v37, %v444_v42 }
  0xb9   :  { %v260_v28 = vsel %vm253_vm2, %v257_v10, %v259_v23  ;;  %v265_v32 = vsel %vm253_vm2, %v259_v23, 0.0 }
  0xba   :  { %v420_v29 = vadd.f32 %v398_v26, %v260_v28  ;;  %v417_v40 = vsel %vm405_vm6, %v265_v32, 0.0 }
  0xbc   :  { %425 = vst.msk [vmem:[%s844_s5 + $0x10] sm:$0xff] %vm422_vm3, %v420_v29  ;;  %v442_v33 = vmul.f32 %v420_v29, %v420_v29  ;;  %v430_v38 = vsel %vm422_vm3, %v420_v29, 0.0 }
  0xbd   :  { %v399_v35 = vpop.f32.mrf.mxu2  ;;  %v431_v45 = vadd.f32 %v430_v38, %v429_v41 }
  0xbe   :  { %v400_v39 = vadd.f32 %v399_v35, %v243_v34  ;;  %v447_v43 = vsel %vm422_vm3, %v442_v33, 0.0 }
  0xbf   :  { %v448_v50 = vadd.f32 %v447_v43, %v446_v46 }
  0xc0   :  { %v421_v44 = vadd.f32 %v417_v40, %v400_v39 }
  0xc2   :  { %426 = vst.msk [vmem:[%s844_s5 + $0x18] sm:$0xff] %vm422_vm3, %v421_v44  ;;  %v432_v47 = vsel %vm422_vm3, %v421_v44, 0.0  ;;  %v443_v48 = vmul.f32 %v421_v44, %v421_v44 }
  0xc3   :  { %v433_v49 = vadd.f32 %v432_v47, %v431_v45 }
  0xc4   :  { %v449_v51 = vsel %vm422_vm3, %v443_v48, 0.0 }
  0xc5   :  { %v434_v52 = vrot.slane %v433_v49, 4  ;;  %v450_v53 = vadd.f32 %v449_v51, %v448_v50 }
  0xc7   :  { %v435_v54 = vadd.f32 %v434_v52, %v433_v49  ;;  %v451_v55 = vrot.slane %v450_v53, 4 }
  0xc9   :  { %v436_v56 = vrot.slane %v435_v54, 2  ;;  %v452_v57 = vadd.f32 %v451_v55, %v450_v53 }
  0xcb   :  { %v437_v58 = vadd.f32 %v436_v56, %v435_v54  ;;  %v453_v59 = vrot.slane %v452_v57, 2 }
  0xcd   :  { %v438_v60 = vrot.slane %v437_v58, 1  ;;  %v454_v61 = vadd.f32 %v453_v59, %v452_v57 }
  0xcf   :  { %v455_v62 = vrot.slane %v454_v61, 1  ;;  %v439_v63 = vadd.f32 %v438_v60, %v437_v58 }
  0xd1   :  { %v456_v0 = vadd.f32 %v455_v62, %v454_v61 }
  0xd3   :  { %v457_v1 = vsel %vm236_vm0, %v439_v63, %v456_v0 }
  0xd4   :  { %624 = vmatmul.msk.f32.vlgmr.msrb.gmra.mxu3 %vm422_vm3, %v457_v1 }
 0x157   :  { %v484_v2 = vpop.f32.mrf.mxu3 }
 0x158   :  { %487 = vst [vmem:[%s845_s6] sm:$0x3] %v484_v2 }

</bundles_post_ra>
